<compile_context>
chip_gen: v7x
topology: tpu7x:2x2x1
jax: 0.10.0
libtpu: 0.0.40
codegen_flags: <defaults>
</compile_context>

<pallas_src>
import functools
import math

import jax
import jax.numpy as jnp
from jax.experimental import pallas as pl
from jax.experimental.pallas import tpu as pltpu

LANE = 128
_VMEM_LIMIT = 64 * 1024 * 1024


# ------------------------------------------------------------------ helpers

def _pick_tile(dim, pref, align):
    """Largest tile <= pref that divides dim and is a multiple of align (or the full dim)."""
    if dim <= pref:
        return dim
    t = (pref // align) * align
    while t >= align:
        if dim % t == 0:
            return t
        t -= align
    return dim


def _heads_per_group(num_heads, head_dim):
    """Heads per 128-lane group (2 for head_dim=64); must divide num_heads."""
    hpg = max(1, LANE // head_dim) if head_dim < LANE else 1
    hpg = min(hpg, num_heads)
    while num_heads % hpg:
        hpg -= 1
    return hpg


# ------------------------------------------------------------------ dense (tiled matmul)

def _dense_kernel(x_ref, w_ref, b_ref, o_ref, acc_ref, *, activation):
    @pl.when(pl.program_id(2) == 0)
    def _():
        acc_ref[...] = jnp.zeros_like(acc_ref)

    acc_ref[...] += jnp.dot(x_ref[...], w_ref[...],
                            preferred_element_type=jnp.float32)

    @pl.when(pl.program_id(2) == pl.num_programs(2) - 1)
    def _():
        y = acc_ref[...] + b_ref[...].astype(jnp.float32)
        if activation == "gelu":
            # TODO(synk): tanh-approx GELU (HF BERT default is erf-based; tiny per-layer drift).
            y = 0.5 * y * (1.0 + jnp.tanh(0.7978845608028654 * (y + 0.044715 * y * y * y)))
        elif activation == "tanh":
            y = jnp.tanh(y)
        o_ref[...] = y.astype(o_ref.dtype)


def dense(x, w, b, activation="none", out_dtype=jnp.bfloat16, tm=256, tn=512, tk=1024):
    M, K = x.shape
    N = w.shape[1]
    tm = _pick_tile(M, tm, 16)     # bf16 packs 16 rows / vreg
    tn = _pick_tile(N, tn, 128)
    tk = _pick_tile(K, tk, 128)    # covers full K (768) for all H-projections
    grid = (M // tm, N // tn, K // tk)
    return pl.pallas_call(
        functools.partial(_dense_kernel, activation=activation),
        out_shape=jax.ShapeDtypeStruct((M, N), out_dtype),
        grid=grid,
        in_specs=[pl.BlockSpec((tm, tk), lambda i, j, k: (i, k)),
                  pl.BlockSpec((tk, tn), lambda i, j, k: (k, j)),
                  pl.BlockSpec((1, tn), lambda i, j, k: (0, j))],
        out_specs=pl.BlockSpec((tm, tn), lambda i, j, k: (i, j)),
        scratch_shapes=[pltpu.VMEM((tm, tn), jnp.float32)],
        compiler_params=pltpu.CompilerParams(
            dimension_semantics=("parallel", "parallel", "arbitrary"),
            vmem_limit_bytes=_VMEM_LIMIT),
    )(x.astype(jnp.bfloat16), w.astype(jnp.bfloat16), b.reshape(1, N).astype(jnp.float32))


# ---------------------------------------------- dense + residual-add + LayerNorm (fused epilogue)

def _dense_add_ln_kernel(x_ref, w_ref, b_ref, r_ref, g_ref, beta_ref, o_ref, acc_ref, *, eps):
    @pl.when(pl.program_id(1) == 0)
    def _():
        acc_ref[...] = jnp.zeros_like(acc_ref)

    acc_ref[...] += jnp.dot(x_ref[...], w_ref[...],
                            preferred_element_type=jnp.float32)

    @pl.when(pl.program_id(1) == pl.num_programs(1) - 1)
    def _():
        y = (acc_ref[...] + b_ref[...].astype(jnp.float32)
             + r_ref[...].astype(jnp.float32))
        mu = jnp.mean(y, axis=-1, keepdims=True)
        var = jnp.mean(jnp.square(y - mu), axis=-1, keepdims=True)
        o_ref[...] = ((y - mu) * jax.lax.rsqrt(var + eps)
                      * g_ref[...].astype(jnp.float32)
                      + beta_ref[...].astype(jnp.float32)).astype(o_ref.dtype)


def dense_add_ln(x, w, b, residual, gamma, beta, eps=1e-12,
                 out_dtype=jnp.bfloat16, tm=256, tk=1536):
    """out = LayerNorm(x @ w + b + residual).  tn = full N so add+LN fuse into the finalize."""
    M, K = x.shape
    N = w.shape[1]
    tm = _pick_tile(M, tm, 16)
    tk = _pick_tile(K, tk, 128)
    grid = (M // tm, K // tk)
    return pl.pallas_call(
        functools.partial(_dense_add_ln_kernel, eps=eps),
        out_shape=jax.ShapeDtypeStruct((M, N), out_dtype),
        grid=grid,
        in_specs=[pl.BlockSpec((tm, tk), lambda i, k: (i, k)),
                  pl.BlockSpec((tk, N), lambda i, k: (k, 0)),
                  pl.BlockSpec((1, N), lambda i, k: (0, 0)),
                  pl.BlockSpec((tm, N), lambda i, k: (i, 0)),
                  pl.BlockSpec((1, N), lambda i, k: (0, 0)),
                  pl.BlockSpec((1, N), lambda i, k: (0, 0))],
        out_specs=pl.BlockSpec((tm, N), lambda i, k: (i, 0)),
        scratch_shapes=[pltpu.VMEM((tm, N), jnp.float32)],
        compiler_params=pltpu.CompilerParams(
            dimension_semantics=("parallel", "arbitrary"),
            vmem_limit_bytes=_VMEM_LIMIT),
    )(x.astype(jnp.bfloat16), w.astype(jnp.bfloat16),
      b.reshape(1, N).astype(jnp.float32), residual,
      gamma.reshape(1, N).astype(jnp.float32), beta.reshape(1, N).astype(jnp.float32))


# ------------------------------------------------------------------ layernorm (row-tiled)

def _ln_kernel(x_ref, g_ref, b_ref, o_ref, *, eps):
    x = x_ref[...].astype(jnp.float32)
    mu = jnp.mean(x, axis=-1, keepdims=True)
    var = jnp.mean(jnp.square(x - mu), axis=-1, keepdims=True)
    o_ref[...] = ((x - mu) * jax.lax.rsqrt(var + eps)
                  * g_ref[...] + b_ref[...]).astype(o_ref.dtype)


def layernorm(x, g, b, eps=1e-12, tm=1024, out_dtype=jnp.bfloat16):
    M, H = x.shape
    tm = _pick_tile(M, tm, 16)
    return pl.pallas_call(
        functools.partial(_ln_kernel, eps=eps),
        out_shape=jax.ShapeDtypeStruct((M, H), out_dtype),
        grid=(M // tm,),
        in_specs=[pl.BlockSpec((tm, H), lambda i: (i, 0)),
                  pl.BlockSpec((1, H), lambda i: (0, 0)),
                  pl.BlockSpec((1, H), lambda i: (0, 0))],
        out_specs=pl.BlockSpec((tm, H), lambda i: (i, 0)),
        compiler_params=pltpu.CompilerParams(dimension_semantics=("parallel",)),
    )(x, g.reshape(1, H), b.reshape(1, H))


# ------------------------------------------------------------------ attention (grouped heads)

def _attn_kernel(qkv_ref, o_ref, *, hpg, head_dim):
    # qkv_ref: (bb, S, 3*gw) for one head group; layout [Q_group | K_group | V_group].
    # 1/sqrt(head_dim) already folded into the Q weight columns.
    gw = hpg * head_dim
    qkv = qkv_ref[...]
    q = qkv[:, :, :gw]            # group-aligned (128-lane at real shapes) slices: free views
    k = qkv[:, :, gw:2 * gw]
    v = qkv[:, :, 2 * gw:]
    outs = []
    for h in range(hpg):
        off = h * head_dim
        qh = q[:, :, off:off + head_dim]
        kh = k[:, :, off:off + head_dim]
        vh = v[:, :, off:off + head_dim]
        s = jnp.einsum("bqd,bkd->bqk", qh, kh, preferred_element_type=jnp.float32)
        m = jnp.max(s, axis=-1, keepdims=True)
        p = jnp.exp(s - m)
        l = jnp.sum(p, axis=-1, keepdims=True)
        o = jnp.einsum("bqk,bkd->bqd", p.astype(qkv.dtype), vh,
                       preferred_element_type=jnp.float32)
        outs.append(o * pl.reciprocal(l, approx=True))
    out = outs[0] if hpg == 1 else jnp.concatenate(outs, axis=-1)
    o_ref[...] = out.astype(o_ref.dtype)   # single lane-dense full-block store per group


def attention(qkv, num_heads, bb=2):
    # qkv: (B, S, 3H) bf16 in head-group layout -> (B, S, H) bf16 in natural head-major order.
    # TODO(synk): attention padding mask omitted (module forward passes no mask; all-ones assumed).
    # TODO(synk): full SxS scores per group; switch to flash-style KV tiling for S >= 512 (v7x VMEM).
    B, S, H3 = qkv.shape
    H = H3 // 3
    D = H // num_heads
    hpg = _heads_per_group(num_heads, D)
    gw = hpg * D
    n_groups = num_heads // hpg
    bb = _pick_tile(B, bb, 1)
    return pl.pallas_call(
        functools.partial(_attn_kernel, hpg=hpg, head_dim=D),
        out_shape=jax.ShapeDtypeStruct((B, S, H), jnp.bfloat16),
        grid=(B // bb, n_groups),
        in_specs=[pl.BlockSpec((bb, S, 3 * gw), lambda i, g: (i, 0, g))],
        out_specs=pl.BlockSpec((bb, S, gw), lambda i, g: (i, 0, g)),
        compiler_params=pltpu.CompilerParams(
            dimension_semantics=("parallel", "parallel"),
            vmem_limit_bytes=_VMEM_LIMIT),
    )(qkv)


# ------------------------------------------------------------------ fused TextCNN head

def _textcnn_kernel(x_ref, *refs, kernel_sizes, f_pad):
    # refs = [conv0_w, conv0_b, conv1_w, conv1_b, ..., fc_w, fc_b, out]
    o_ref = refs[-1]
    fc_w_ref = refs[-3]
    fc_b_ref = refs[-2]
    conv_refs = refs[:2 * len(kernel_sizes)]

    x = x_ref[...]                                    # (bb, S, H) bf16
    bb, S, H = x.shape
    x2 = x.reshape(bb * S, H)                         # merge of leading dims only: layout-free
    feats = []
    for idx, k in enumerate(kernel_sizes):
        w_ref = conv_refs[2 * idx]                    # (k, H, F_pad) bf16
        b_ref = conv_refs[2 * idx + 1]                # (1, F_pad) f32
        T = S - k + 1
        acc = jnp.zeros((bb, S, f_pad), jnp.float32)
        for j in range(k):
            # full-S matmul per tap; align contribution of row t+j to row t via XLU roll
            yj = jnp.dot(x2, w_ref[j], preferred_element_type=jnp.float32).reshape(bb, S, f_pad)
            if j:
                yj = pltpu.roll(yj, shift=S - j, axis=1)
            acc = acc + yj
        y = jnp.tanh(acc + b_ref[...].astype(jnp.float32))
        # rows t >= T hold wrapped / partial sums: mask below tanh range before max-pool
        t_ids = jax.lax.broadcasted_iota(jnp.int32, (S, f_pad), 0)
        y = jnp.where(t_ids < T, y, -2.0)
        feats.append(jnp.max(y, axis=1))              # (bb, F_pad) max-pool over time
    feat = jnp.concatenate(feats, axis=-1).astype(jnp.bfloat16)   # 128-aligned pieces
    logits = (jnp.dot(feat, fc_w_ref[...], preferred_element_type=jnp.float32)
              + fc_b_ref[...].astype(jnp.float32))
    o_ref[...] = logits                               # (bb, 128) lane-dense slab


def textcnn_head(seq_out, conv_ws, conv_bs, fc_w_pad, fc_b_pad, *, kernel_sizes, bb=8):
    # bb kept small enough that the double-buffered (bb,S,H) bf16 block stays a few MiB (v7x-safe).
    B, S, H = seq_out.shape
    f_pad = conv_ws[0].shape[2]
    U_pad = fc_w_pad.shape[1]
    bb = _pick_tile(B, bb, 8)

    in_specs = [pl.BlockSpec((bb, S, H), lambda i: (i, 0, 0))]
    inputs = [seq_out]
    for idx in range(len(kernel_sizes)):
        in_specs.append(pl.BlockSpec(conv_ws[idx].shape, lambda i: (0, 0, 0)))
        in_specs.append(pl.BlockSpec((1, f_pad), lambda i: (0, 0)))
        inputs.append(conv_ws[idx])
        inputs.append(conv_bs[idx])
    in_specs.append(pl.BlockSpec(fc_w_pad.shape, lambda i: (0, 0)))
    in_specs.append(pl.BlockSpec((1, U_pad), lambda i: (0, 0)))
    inputs += [fc_w_pad, fc_b_pad]

    return pl.pallas_call(
        functools.partial(_textcnn_kernel, kernel_sizes=tuple(kernel_sizes), f_pad=f_pad),
        out_shape=jax.ShapeDtypeStruct((B, U_pad), jnp.float32),
        grid=(B // bb,),
        in_specs=in_specs,
        out_specs=pl.BlockSpec((bb, U_pad), lambda i: (i, 0)),
        compiler_params=pltpu.CompilerParams(
            dimension_semantics=("parallel",), vmem_limit_bytes=_VMEM_LIMIT),
    )(*inputs)


# ------------------------------------------------------------------ parameters

def init_params(key, *, vocab_size, type_vocab_size, max_pos, hidden, inter,
                num_layers, num_heads, filter_num, kernel_sizes, units):
    """Checkpoint-like standard-layout float32 parameters (as PyTorch would hold them)."""
    def nrm(k, shape):
        return 0.02 * jax.random.normal(k, shape, dtype=jnp.float32)

    keys = iter(jax.random.split(key, 1024))
    p = {
        "word_emb": nrm(next(keys), (vocab_size, hidden)),
        "pos_emb": nrm(next(keys), (max_pos, hidden)),
        "type_emb": nrm(next(keys), (type_vocab_size, hidden)),
        "emb_ln_g": jnp.ones((hidden,), jnp.float32),
        "emb_ln_b": jnp.zeros((hidden,), jnp.float32),
        "layers": [],
    }
    for _ in range(num_layers):
        p["layers"].append({
            "wq": nrm(next(keys), (hidden, hidden)), "bq": jnp.zeros((hidden,), jnp.float32),
            "wk": nrm(next(keys), (hidden, hidden)), "bk": jnp.zeros((hidden,), jnp.float32),
            "wv": nrm(next(keys), (hidden, hidden)), "bv": jnp.zeros((hidden,), jnp.float32),
            "wo": nrm(next(keys), (hidden, hidden)), "bo": jnp.zeros((hidden,), jnp.float32),
            "ln1_g": jnp.ones((hidden,), jnp.float32), "ln1_b": jnp.zeros((hidden,), jnp.float32),
            "w1": nrm(next(keys), (hidden, inter)), "b1": jnp.zeros((inter,), jnp.float32),
            "w2": nrm(next(keys), (inter, hidden)), "b2": jnp.zeros((hidden,), jnp.float32),
            "ln2_g": jnp.ones((hidden,), jnp.float32), "ln2_b": jnp.zeros((hidden,), jnp.float32),
        })
    for i, k in enumerate(kernel_sizes):
        # Conv2d(1, F, (k, H)) stored as (k, H, F) for in-kernel per-tap matmuls
        p[f"conv{i}_w"] = nrm(next(keys), (k, hidden, filter_num))
        p[f"conv{i}_b"] = jnp.zeros((filter_num,), jnp.float32)
    p["fc_w"] = nrm(next(keys), (len(kernel_sizes) * filter_num, units))
    p["fc_b"] = jnp.zeros((units,), jnp.float32)
    return p


def _qkv_group_perm(hidden, num_heads, head_dim, hpg):
    """Column permutation of [Wq|Wk|Wv]: per head group -> [Q_group | K_group | V_group]."""
    perm = []
    n_groups = num_heads // hpg
    for g in range(n_groups):
        for part in range(3):                      # Q, K, V
            for h in range(g * hpg, (g + 1) * hpg):
                base = part * hidden + h * head_dim
                perm.extend(range(base, base + head_dim))
    return jnp.asarray(perm, dtype=jnp.int32)


def prepare_params(p, *, num_heads, kernel_sizes, filter_num, units):
    """One-time weight prep: QKV group permutation + scale fold, bf16 casts, lane padding."""
    hidden = p["word_emb"].shape[1]
    D = hidden // num_heads
    hpg = _heads_per_group(num_heads, D)
    perm = _qkv_group_perm(hidden, num_heads, D, hpg)
    scale = 1.0 / math.sqrt(D)

    q = {
        "word_emb": p["word_emb"].astype(jnp.bfloat16),
        "pos_emb": p["pos_emb"].astype(jnp.bfloat16),
        "type_emb": p["type_emb"].astype(jnp.bfloat16),
        "emb_ln_g": p["emb_ln_g"], "emb_ln_b": p["emb_ln_b"],
        "layers": [],
    }
    for lp in p["layers"]:
        w_qkv = jnp.concatenate([lp["wq"] * scale, lp["wk"], lp["wv"]], axis=1)[:, perm]
        b_qkv = jnp.concatenate([lp["bq"] * scale, lp["bk"], lp["bv"]])[perm]
        q["layers"].append({
            "w_qkv": w_qkv.astype(jnp.bfloat16), "b_qkv": b_qkv.astype(jnp.float32),
            "wo": lp["wo"].astype(jnp.bfloat16), "bo": lp["bo"],
            "ln1_g": lp["ln1_g"], "ln1_b": lp["ln1_b"],
            "w1": lp["w1"].astype(jnp.bfloat16), "b1": lp["b1"],
            "w2": lp["w2"].astype(jnp.bfloat16), "b2": lp["b2"],
            "ln2_g": lp["ln2_g"], "ln2_b": lp["ln2_b"],
        })

    nks = len(kernel_sizes)
    F = filter_num
    F_pad = max(LANE, ((F + LANE - 1) // LANE) * LANE)
    U_pad = max(LANE, ((units + LANE - 1) // LANE) * LANE)
    q["conv_ws"], q["conv_bs"] = [], []
    for i, k in enumerate(kernel_sizes):
        w = jnp.zeros((k, hidden, F_pad), jnp.float32).at[:, :, :F].set(p[f"conv{i}_w"])
        b = jnp.zeros((1, F_pad), jnp.float32).at[0, :F].set(p[f"conv{i}_b"])
        q["conv_ws"].append(w.astype(jnp.bfloat16))
        q["conv_bs"].append(b)
    fc_w = jnp.zeros((nks * F_pad, U_pad), jnp.float32)
    for i in range(nks):
        fc_w = fc_w.at[i * F_pad:i * F_pad + F, :units].set(p["fc_w"][i * F:(i + 1) * F, :])
    q["fc_w"] = fc_w.astype(jnp.bfloat16)
    q["fc_b"] = jnp.zeros((1, U_pad), jnp.float32).at[0, :units].set(p["fc_b"])
    return q


# ------------------------------------------------------------------ model glue

def bert_encoder(input_ids, token_type_ids, p, *, num_heads):
    B, S = input_ids.shape
    H = p["word_emb"].shape[1]

    emb = (jnp.take(p["word_emb"], input_ids, axis=0)
           + jnp.take(p["type_emb"], token_type_ids, axis=0)
           + p["pos_emb"][None, :S, :]).astype(jnp.bfloat16)
    h = layernorm(emb.reshape(B * S, H), p["emb_ln_g"], p["emb_ln_b"])   # (B*S, H) bf16

    for lp in p["layers"]:
        qkv = dense(h, lp["w_qkv"], lp["b_qkv"])                  # fused/grouped Q|K|V: (B*S, 3H)
        ctx = attention(qkv.reshape(B, S, 3 * H), num_heads)      # (B, S, H), heads merged
        h1 = dense_add_ln(ctx.reshape(B * S, H), lp["wo"], lp["bo"], h,
                          lp["ln1_g"], lp["ln1_b"])               # attn out + residual + LN fused
        ff = dense(h1, lp["w1"], lp["b1"], activation="gelu")
        h = dense_add_ln(ff, lp["w2"], lp["b2"], h1, lp["ln2_g"], lp["ln2_b"])
    return h.reshape(B, S, H)


def text_cnn(seq_out, p, *, kernel_sizes, units):
    logits_pad = textcnn_head(seq_out, p["conv_ws"], p["conv_bs"], p["fc_w"], p["fc_b"],
                              kernel_sizes=kernel_sizes)
    return logits_pad[:, :units]


def model_forward(input_ids, token_type_ids, params, *, num_heads, kernel_sizes, units):
    seq_out = bert_encoder(input_ids, token_type_ids, params, num_heads=num_heads)
    return text_cnn(seq_out, params, kernel_sizes=kernel_sizes, units=units)


# ------------------------------------------------------------------ main

if __name__ == "__main__":
    # small synthetic config
    batch_size = 2
    seq_len = 8
    hidden = 32
    inter = 64
    num_layers = 2
    num_heads = 2
    vocab_size = 100
    type_vocab_size = 2
    max_pos = 16
    filter_num = 4
    kernel_sizes = (3, 4, 5)
    units = 2

    root = jax.random.PRNGKey(0)
    k_param, k_ids = jax.random.split(root)
    raw = init_params(
        k_param, vocab_size=vocab_size, type_vocab_size=type_vocab_size, max_pos=max_pos,
        hidden=hidden, inter=inter, num_layers=num_layers, num_heads=num_heads,
        filter_num=filter_num, kernel_sizes=kernel_sizes, units=units)
    params = prepare_params(raw, num_heads=num_heads, kernel_sizes=kernel_sizes,
                            filter_num=filter_num, units=units)

    input_ids = jax.random.randint(k_ids, (batch_size, seq_len), 0, vocab_size, dtype=jnp.int32)
    token_type_ids = jnp.zeros((batch_size, seq_len), dtype=jnp.int32)

    fwd = jax.jit(functools.partial(model_forward, num_heads=num_heads,
                                    kernel_sizes=kernel_sizes, units=units))
    out = fwd(input_ids, token_type_ids, params)
    out = jax.block_until_ready(out)
    assert out.shape == (batch_size, units) and out.dtype == jnp.float32
    print("KERNEL_OK")
</pallas_src>

<mosaic_0001>
module attributes {stable_mosaic.version = 11 : i64} {
  func.func @_ln_kernel(%arg0: i32, %arg1: memref<16x32xbf16, #tpu.memory_space<vmem>>, %arg2: memref<1x32xf32, #tpu.memory_space<vmem>>, %arg3: memref<1x32xf32, #tpu.memory_space<vmem>>, %arg4: memref<16x32xbf16, #tpu.memory_space<vmem>>) attributes {dimension_semantics = [#tpu.dimension_semantics<parallel>], iteration_bounds = array<i64: 1>, scalar_prefetch = 0 : i64, scratch_operands = 0 : i64, tpu.core_type = #tpu.core_type<tc>, window_params = [{transform_indices = @transform_0, window_bounds = array<i64: 16, 32>}, {pipeline_mode = #tpu.pipeline_mode<synchronous>, transform_indices = @transform_1, window_bounds = array<i64: 1, 32>}, {pipeline_mode = #tpu.pipeline_mode<synchronous>, transform_indices = @transform_2, window_bounds = array<i64: 1, 32>}, {transform_indices = @transform_3, window_bounds = array<i64: 16, 32>}]} {
    %c0 = arith.constant 0 : index
    %c0_0 = arith.constant 0 : index
    %0 = vector.load %arg1[%c0, %c0_0] : memref<16x32xbf16, #tpu.memory_space<vmem>>, vector<16x32xbf16>
    %1 = arith.extf %0 : vector<16x32xbf16> to vector<16x32xf32>
    %cst = arith.constant dense<0.000000e+00> : vector<16xf32>
    %2 = vector.multi_reduction <add>, %1, %cst [1] : vector<16x32xf32> to vector<16xf32>
    %3 = vector.shape_cast %2 : vector<16xf32> to vector<16x1xf32>
    %cst_1 = arith.constant 3.200000e+01 : f32
    %4 = vector.broadcast %cst_1 : f32 to vector<16x1xf32>
    %5 = arith.divf %3, %4 : vector<16x1xf32>
    %6 = vector.broadcast %5 : vector<16x1xf32> to vector<16x32xf32>
    %7 = arith.subf %1, %6 : vector<16x32xf32>
    %8 = arith.mulf %7, %7 : vector<16x32xf32>
    %cst_2 = arith.constant dense<0.000000e+00> : vector<16xf32>
    %9 = vector.multi_reduction <add>, %8, %cst_2 [1] : vector<16x32xf32> to vector<16xf32>
    %10 = vector.shape_cast %9 : vector<16xf32> to vector<16x1xf32>
    %cst_3 = arith.constant 3.200000e+01 : f32
    %11 = vector.broadcast %cst_3 : f32 to vector<16x1xf32>
    %12 = arith.divf %10, %11 : vector<16x1xf32>
    %13 = vector.broadcast %5 : vector<16x1xf32> to vector<16x32xf32>
    %14 = arith.subf %1, %13 : vector<16x32xf32>
    %cst_4 = arith.constant 9.99999996E-13 : f32
    %15 = vector.broadcast %cst_4 : f32 to vector<16x1xf32>
    %16 = arith.addf %12, %15 : vector<16x1xf32>
    %17 = math.rsqrt %16 : vector<16x1xf32>
    %18 = vector.broadcast %17 : vector<16x1xf32> to vector<16x32xf32>
    %19 = arith.mulf %14, %18 : vector<16x32xf32>
    %c0_5 = arith.constant 0 : index
    %c0_6 = arith.constant 0 : index
    %20 = vector.load %arg2[%c0_5, %c0_6] : memref<1x32xf32, #tpu.memory_space<vmem>>, vector<1x32xf32>
    %21 = vector.broadcast %20 : vector<1x32xf32> to vector<16x32xf32>
    %22 = arith.mulf %19, %21 : vector<16x32xf32>
    %c0_7 = arith.constant 0 : index
    %c0_8 = arith.constant 0 : index
    %23 = vector.load %arg3[%c0_7, %c0_8] : memref<1x32xf32, #tpu.memory_space<vmem>>, vector<1x32xf32>
    %24 = vector.broadcast %23 : vector<1x32xf32> to vector<16x32xf32>
    %25 = arith.addf %22, %24 : vector<16x32xf32>
    %26 = arith.truncf %25 : vector<16x32xf32> to vector<16x32xbf16>
    %c0_9 = arith.constant 0 : index
    %c0_10 = arith.constant 0 : index
    %27 = vector.load %arg4[%c0_9, %c0_10] : memref<16x32xbf16, #tpu.memory_space<vmem>>, vector<16x32xbf16>
    tpu.vector_store %arg4[%c0_9, %c0_10], %26 {strides = array<i32>} : memref<16x32xbf16, #tpu.memory_space<vmem>>, vector<16x32xbf16>,
    return
  }
  func.func @transform_0(%arg0: i32) -> (i32, i32) {
    %c0_i32 = arith.constant 0 : i32
    %c0_i32_0 = arith.constant 0 : i32
    return %arg0, %c0_i32 : i32, i32
  }
  func.func @transform_1(%arg0: i32) -> (i32, i32) {
    %c0_i32 = arith.constant 0 : i32
    %c0_i32_0 = arith.constant 0 : i32
    %c0_i32_1 = arith.constant 0 : i32
    return %c0_i32, %c0_i32_0 : i32, i32
  }
  func.func @transform_2(%arg0: i32) -> (i32, i32) {
    %c0_i32 = arith.constant 0 : i32
    %c0_i32_0 = arith.constant 0 : i32
    %c0_i32_1 = arith.constant 0 : i32
    return %c0_i32, %c0_i32_0 : i32, i32
  }
  func.func @transform_3(%arg0: i32) -> (i32, i32) {
    %c0_i32 = arith.constant 0 : i32
    %c0_i32_0 = arith.constant 0 : i32
    return %arg0, %c0_i32 : i32, i32
  }
}

module attributes {stable_mosaic.version = 11 : i64} {
  func.func @_dense_kernel(%arg0: i32, %arg1: i32, %arg2: i32, %arg3: memref<16x32xbf16, #tpu.memory_space<vmem>>, %arg4: memref<32x96xbf16, #tpu.memory_space<vmem>>, %arg5: memref<1x96xf32, #tpu.memory_space<vmem>>, %arg6: memref<16x96xbf16, #tpu.memory_space<vmem>>, %arg7: memref<16x96xf32, #tpu.memory_space<vmem>>) attributes {dimension_semantics = [#tpu.dimension_semantics<parallel>, #tpu.dimension_semantics<parallel>, #tpu.dimension_semantics<arbitrary>], iteration_bounds = array<i64: 1, 1, 1>, scalar_prefetch = 0 : i64, scratch_operands = 1 : i64, tpu.core_type = #tpu.core_type<tc>, window_params = [{transform_indices = @transform_0, window_bounds = array<i64: 16, 32>}, {transform_indices = @transform_1, window_bounds = array<i64: 32, 96>}, {transform_indices = @transform_2, window_bounds = array<i64: 1, 96>}, {transform_indices = @transform_3, window_bounds = array<i64: 16, 96>}]} {
    %c0_i32 = arith.constant 0 : i32
    %0 = arith.cmpi eq, %arg2, %c0_i32 : i32
    %1 = arith.extui %0 : i1 to i32
    %c0_i32_0 = arith.constant 0 : i32
    %2 = arith.cmpi ne, %1, %c0_i32_0 : i32
    scf.if %2 {
      %cst_10 = arith.constant 0.000000e+00 : f32
      %12 = vector.broadcast %cst_10 : f32 to vector<16x96xf32>
      %c0_11 = arith.constant 0 : index
      %c0_12 = arith.constant 0 : index
      %13 = vector.load %arg7[%c0_11, %c0_12] : memref<16x96xf32, #tpu.memory_space<vmem>>, vector<16x96xf32>
      tpu.vector_store %arg7[%c0_11, %c0_12], %12 {strides = array<i32>} : memref<16x96xf32, #tpu.memory_space<vmem>>, vector<16x96xf32>,
    } else {
    }
    %c0 = arith.constant 0 : index
    %c0_1 = arith.constant 0 : index
    %3 = vector.load %arg7[%c0, %c0_1] : memref<16x96xf32, #tpu.memory_space<vmem>>, vector<16x96xf32>
    %c0_2 = arith.constant 0 : index
    %c0_3 = arith.constant 0 : index
    %4 = vector.load %arg3[%c0_2, %c0_3] : memref<16x32xbf16, #tpu.memory_space<vmem>>, vector<16x32xbf16>
    %c0_4 = arith.constant 0 : index
    %c0_5 = arith.constant 0 : index
    %5 = vector.load %arg4[%c0_4, %c0_5] : memref<32x96xbf16, #tpu.memory_space<vmem>>, vector<32x96xbf16>
    %cst = arith.constant dense<0.000000e+00> : vector<16x96xf32>
    %6 = tpu.matmul %4, %5, %cst {dimension_numbers = #tpu.dot_dimension_numbers<[1], [0], [0], [1], [0, 0, 1, 1], [], []>} : vector<16x32xbf16>, vector<32x96xbf16>, vector<16x96xf32> -> vector<16x96xf32>
    %7 = arith.addf %3, %6 : vector<16x96xf32>
    %c0_6 = arith.constant 0 : index
    %c0_7 = arith.constant 0 : index
    %8 = vector.load %arg7[%c0_6, %c0_7] : memref<16x96xf32, #tpu.memory_space<vmem>>, vector<16x96xf32>
    tpu.vector_store %arg7[%c0_6, %c0_7], %7 {strides = array<i32>} : memref<16x96xf32, #tpu.memory_space<vmem>>, vector<16x96xf32>,
    %c0_i32_8 = arith.constant 0 : i32
    %9 = arith.cmpi eq, %arg2, %c0_i32_8 : i32
    %10 = arith.extui %9 : i1 to i32
    %c0_i32_9 = arith.constant 0 : i32
    %11 = arith.cmpi ne, %10, %c0_i32_9 : i32
    scf.if %11 {
      %c0_10 = arith.constant 0 : index
      %c0_11 = arith.constant 0 : index
      %12 = vector.load %arg7[%c0_10, %c0_11] : memref<16x96xf32, #tpu.memory_space<vmem>>, vector<16x96xf32>
      %c0_12 = arith.constant 0 : index
      %c0_13 = arith.constant 0 : index
      %13 = vector.load %arg5[%c0_12, %c0_13] : memref<1x96xf32, #tpu.memory_space<vmem>>, vector<1x96xf32>
      %14 = vector.broadcast %13 : vector<1x96xf32> to vector<16x96xf32>
      %15 = arith.addf %12, %14 : vector<16x96xf32>
      %16 = arith.truncf %15 : vector<16x96xf32> to vector<16x96xbf16>
      %c0_14 = arith.constant 0 : index
      %c0_15 = arith.constant 0 : index
      %17 = vector.load %arg6[%c0_14, %c0_15] : memref<16x96xbf16, #tpu.memory_space<vmem>>, vector<16x96xbf16>
      tpu.vector_store %arg6[%c0_14, %c0_15], %16 {strides = array<i32>} : memref<16x96xbf16, #tpu.memory_space<vmem>>, vector<16x96xbf16>,
    } else {
    }
    return
  }
  func.func @transform_0(%arg0: i32, %arg1: i32, %arg2: i32) -> (i32, i32) {
    %c0_i32 = arith.constant 0 : i32
    return %arg0, %arg2 : i32, i32
  }
  func.func @transform_1(%arg0: i32, %arg1: i32, %arg2: i32) -> (i32, i32) {
    %c0_i32 = arith.constant 0 : i32
    return %arg2, %arg1 : i32, i32
  }
  func.func @transform_2(%arg0: i32, %arg1: i32, %arg2: i32) -> (i32, i32) {
    %c0_i32 = arith.constant 0 : i32
    %c0_i32_0 = arith.constant 0 : i32
    return %c0_i32, %arg1 : i32, i32
  }
  func.func @transform_3(%arg0: i32, %arg1: i32, %arg2: i32) -> (i32, i32) {
    %c0_i32 = arith.constant 0 : i32
    return %arg0, %arg1 : i32, i32
  }
}

module attributes {stable_mosaic.version = 11 : i64} {
  func.func @_attn_kernel(%arg0: i32, %arg1: i32, %arg2: memref<2x8x96xbf16, #tpu.memory_space<vmem>>, %arg3: memref<2x8x32xbf16, #tpu.memory_space<vmem>>) attributes {dimension_semantics = [#tpu.dimension_semantics<parallel>, #tpu.dimension_semantics<parallel>], iteration_bounds = array<i64: 1, 1>, scalar_prefetch = 0 : i64, scratch_operands = 0 : i64, tpu.core_type = #tpu.core_type<tc>, window_params = [{transform_indices = @transform_0, window_bounds = array<i64: 2, 8, 96>}, {transform_indices = @transform_1, window_bounds = array<i64: 2, 8, 32>}]} {
    %c0 = arith.constant 0 : index
    %c0_0 = arith.constant 0 : index
    %c0_1 = arith.constant 0 : index
    %0 = vector.load %arg2[%c0, %c0_0, %c0_1] : memref<2x8x96xbf16, #tpu.memory_space<vmem>>, vector<2x8x96xbf16>
    %1 = vector.extract_strided_slice %0 {offsets = [0, 0, 0], sizes = [2, 8, 32], strides = [1, 1, 1]} : vector<2x8x96xbf16> to vector<2x8x32xbf16>
    %2 = vector.extract_strided_slice %0 {offsets = [0, 0, 32], sizes = [2, 8, 32], strides = [1, 1, 1]} : vector<2x8x96xbf16> to vector<2x8x32xbf16>
    %3 = vector.extract_strided_slice %0 {offsets = [0, 0, 64], sizes = [2, 8, 32], strides = [1, 1, 1]} : vector<2x8x96xbf16> to vector<2x8x32xbf16>
    %4 = vector.extract_strided_slice %1 {offsets = [0, 0, 0], sizes = [2, 8, 16], strides = [1, 1, 1]} : vector<2x8x32xbf16> to vector<2x8x16xbf16>
    %5 = vector.extract_strided_slice %2 {offsets = [0, 0, 0], sizes = [2, 8, 16], strides = [1, 1, 1]} : vector<2x8x32xbf16> to vector<2x8x16xbf16>
    %6 = vector.extract_strided_slice %3 {offsets = [0, 0, 0], sizes = [2, 8, 16], strides = [1, 1, 1]} : vector<2x8x32xbf16> to vector<2x8x16xbf16>
    "tpu.trace_start"() <{level = 10 : i32, message = "bqd,bkd->bqk"}> : () -> ()
    %cst = arith.constant dense<0.000000e+00> : vector<2x8x8xf32>
    %7 = tpu.matmul %4, %5, %cst {dimension_numbers = #tpu.dot_dimension_numbers<[2], [2], [1], [1], [0, 0, 0, 1, 1, 1], [0], [0]>} : vector<2x8x16xbf16>, vector<2x8x16xbf16>, vector<2x8x8xf32> -> vector<2x8x8xf32>
    "tpu.trace_stop"() : () -> ()
    %cst_2 = arith.constant dense<0xFF800000> : vector<2x8xf32>
    %8 = vector.multi_reduction <maximumf>, %7, %cst_2 [2] : vector<2x8x8xf32> to vector<2x8xf32>
    %9 = vector.shape_cast %8 : vector<2x8xf32> to vector<2x8x1xf32>
    %10 = vector.broadcast %9 : vector<2x8x1xf32> to vector<2x8x8xf32>
    %11 = arith.subf %7, %10 : vector<2x8x8xf32>
    %12 = math.exp %11 : vector<2x8x8xf32>
    %cst_3 = arith.constant dense<0.000000e+00> : vector<2x8xf32>
    %13 = vector.multi_reduction <add>, %12, %cst_3 [2] : vector<2x8x8xf32> to vector<2x8xf32>
    %14 = vector.shape_cast %13 : vector<2x8xf32> to vector<2x8x1xf32>
    %15 = arith.truncf %12 : vector<2x8x8xf32> to vector<2x8x8xbf16>
    "tpu.trace_start"() <{level = 10 : i32, message = "bqk,bkd->bqd"}> : () -> ()
    %cst_4 = arith.constant dense<0.000000e+00> : vector<2x8x16xf32>
    %16 = tpu.matmul %15, %6, %cst_4 {dimension_numbers = #tpu.dot_dimension_numbers<[2], [1], [1], [2], [0, 0, 0, 1, 1, 2], [0], [0]>} : vector<2x8x8xbf16>, vector<2x8x16xbf16>, vector<2x8x16xf32> -> vector<2x8x16xf32>
    "tpu.trace_stop"() : () -> ()
    %17 = tpu.reciprocal %14 {approx = true} : vector<2x8x1xf32> -> vector<2x8x1xf32>
    %18 = vector.broadcast %17 : vector<2x8x1xf32> to vector<2x8x16xf32>
    %19 = arith.mulf %16, %18 : vector<2x8x16xf32>
    %20 = vector.extract_strided_slice %1 {offsets = [0, 0, 16], sizes = [2, 8, 16], strides = [1, 1, 1]} : vector<2x8x32xbf16> to vector<2x8x16xbf16>
    %21 = vector.extract_strided_slice %2 {offsets = [0, 0, 16], sizes = [2, 8, 16], strides = [1, 1, 1]} : vector<2x8x32xbf16> to vector<2x8x16xbf16>
    %22 = vector.extract_strided_slice %3 {offsets = [0, 0, 16], sizes = [2, 8, 16], strides = [1, 1, 1]} : vector<2x8x32xbf16> to vector<2x8x16xbf16>
    "tpu.trace_start"() <{level = 10 : i32, message = "bqd,bkd->bqk"}> : () -> ()
    %cst_5 = arith.constant dense<0.000000e+00> : vector<2x8x8xf32>
    %23 = tpu.matmul %20, %21, %cst_5 {dimension_numbers = #tpu.dot_dimension_numbers<[2], [2], [1], [1], [0, 0, 0, 1, 1, 1], [0], [0]>} : vector<2x8x16xbf16>, vector<2x8x16xbf16>, vector<2x8x8xf32> -> vector<2x8x8xf32>
    "tpu.trace_stop"() : () -> ()
    %cst_6 = arith.constant dense<0xFF800000> : vector<2x8xf32>
    %24 = vector.multi_reduction <maximumf>, %23, %cst_6 [2] : vector<2x8x8xf32> to vector<2x8xf32>
    %25 = vector.shape_cast %24 : vector<2x8xf32> to vector<2x8x1xf32>
    %26 = vector.broadcast %25 : vector<2x8x1xf32> to vector<2x8x8xf32>
    %27 = arith.subf %23, %26 : vector<2x8x8xf32>
    %28 = math.exp %27 : vector<2x8x8xf32>
    %cst_7 = arith.constant dense<0.000000e+00> : vector<2x8xf32>
    %29 = vector.multi_reduction <add>, %28, %cst_7 [2] : vector<2x8x8xf32> to vector<2x8xf32>
    %30 = vector.shape_cast %29 : vector<2x8xf32> to vector<2x8x1xf32>
    %31 = arith.truncf %28 : vector<2x8x8xf32> to vector<2x8x8xbf16>
    "tpu.trace_start"() <{level = 10 : i32, message = "bqk,bkd->bqd"}> : () -> ()
    %cst_8 = arith.constant dense<0.000000e+00> : vector<2x8x16xf32>
    %32 = tpu.matmul %31, %22, %cst_8 {dimension_numbers = #tpu.dot_dimension_numbers<[2], [1], [1], [2], [0, 0, 0, 1, 1, 2], [0], [0]>} : vector<2x8x8xbf16>, vector<2x8x16xbf16>, vector<2x8x16xf32> -> vector<2x8x16xf32>
    "tpu.trace_stop"() : () -> ()
    %33 = tpu.reciprocal %30 {approx = true} : vector<2x8x1xf32> -> vector<2x8x1xf32>
    %34 = vector.broadcast %33 : vector<2x8x1xf32> to vector<2x8x16xf32>
    %35 = arith.mulf %32, %34 : vector<2x8x16xf32>
    %36 = tpu.concatenate %19, %35 in 2 : vector<2x8x16xf32>, vector<2x8x16xf32> -> vector<2x8x32xf32>
    %37 = arith.truncf %36 : vector<2x8x32xf32> to vector<2x8x32xbf16>
    %c0_9 = arith.constant 0 : index
    %c0_10 = arith.constant 0 : index
    %c0_11 = arith.constant 0 : index
    %38 = vector.load %arg3[%c0_9, %c0_10, %c0_11] : memref<2x8x32xbf16, #tpu.memory_space<vmem>>, vector<2x8x32xbf16>
    tpu.vector_store %arg3[%c0_9, %c0_10, %c0_11], %37 {strides = array<i32>} : memref<2x8x32xbf16, #tpu.memory_space<vmem>>, vector<2x8x32xbf16>,
    return
  }
  func.func @transform_0(%arg0: i32, %arg1: i32) -> (i32, i32, i32) {
    %c0_i32 = arith.constant 0 : i32
    %c0_i32_0 = arith.constant 0 : i32
    return %arg0, %c0_i32, %arg1 : i32, i32, i32
  }
  func.func @transform_1(%arg0: i32, %arg1: i32) -> (i32, i32, i32) {
    %c0_i32 = arith.constant 0 : i32
    %c0_i32_0 = arith.constant 0 : i32
    return %arg0, %c0_i32, %arg1 : i32, i32, i32
  }
}

module attributes {stable_mosaic.version = 11 : i64} {
  func.func @_dense_add_ln_kernel(%arg0: i32, %arg1: i32, %arg2: memref<16x32xbf16, #tpu.memory_space<vmem>>, %arg3: memref<32x32xbf16, #tpu.memory_space<vmem>>, %arg4: memref<1x32xf32, #tpu.memory_space<vmem>>, %arg5: memref<16x32xbf16, #tpu.memory_space<vmem>>, %arg6: memref<1x32xf32, #tpu.memory_space<vmem>>, %arg7: memref<1x32xf32, #tpu.memory_space<vmem>>, %arg8: memref<16x32xbf16, #tpu.memory_space<vmem>>, %arg9: memref<16x32xf32, #tpu.memory_space<vmem>>) attributes {dimension_semantics = [#tpu.dimension_semantics<parallel>, #tpu.dimension_semantics<arbitrary>], iteration_bounds = array<i64: 1, 1>, scalar_prefetch = 0 : i64, scratch_operands = 1 : i64, tpu.core_type = #tpu.core_type<tc>, window_params = [{transform_indices = @transform_0, window_bounds = array<i64: 16, 32>}, {transform_indices = @transform_1, window_bounds = array<i64: 32, 32>}, {pipeline_mode = #tpu.pipeline_mode<synchronous>, transform_indices = @transform_2, window_bounds = array<i64: 1, 32>}, {transform_indices = @transform_3, window_bounds = array<i64: 16, 32>}, {pipeline_mode = #tpu.pipeline_mode<synchronous>, transform_indices = @transform_4, window_bounds = array<i64: 1, 32>}, {pipeline_mode = #tpu.pipeline_mode<synchronous>, transform_indices = @transform_5, window_bounds = array<i64: 1, 32>}, {transform_indices = @transform_6, window_bounds = array<i64: 16, 32>}]} {
    %c0_i32 = arith.constant 0 : i32
    %0 = arith.cmpi eq, %arg1, %c0_i32 : i32
    %1 = arith.extui %0 : i1 to i32
    %c0_i32_0 = arith.constant 0 : i32
    %2 = arith.cmpi ne, %1, %c0_i32_0 : i32
    scf.if %2 {
      %cst_10 = arith.constant 0.000000e+00 : f32
      %12 = vector.broadcast %cst_10 : f32 to vector<16x32xf32>
      %c0_11 = arith.constant 0 : index
      %c0_12 = arith.constant 0 : index
      %13 = vector.load %arg9[%c0_11, %c0_12] : memref<16x32xf32, #tpu.memory_space<vmem>>, vector<16x32xf32>
      tpu.vector_store %arg9[%c0_11, %c0_12], %12 {strides = array<i32>} : memref<16x32xf32, #tpu.memory_space<vmem>>, vector<16x32xf32>,
    } else {
    }
    %c0 = arith.constant 0 : index
    %c0_1 = arith.constant 0 : index
    %3 = vector.load %arg9[%c0, %c0_1] : memref<16x32xf32, #tpu.memory_space<vmem>>, vector<16x32xf32>
    %c0_2 = arith.constant 0 : index
    %c0_3 = arith.constant 0 : index
    %4 = vector.load %arg2[%c0_2, %c0_3] : memref<16x32xbf16, #tpu.memory_space<vmem>>, vector<16x32xbf16>
    %c0_4 = arith.constant 0 : index
    %c0_5 = arith.constant 0 : index
    %5 = vector.load %arg3[%c0_4, %c0_5] : memref<32x32xbf16, #tpu.memory_space<vmem>>, vector<32x32xbf16>
    %cst = arith.constant dense<0.000000e+00> : vector<16x32xf32>
    %6 = tpu.matmul %4, %5, %cst {dimension_numbers = #tpu.dot_dimension_numbers<[1], [0], [0], [1], [0, 0, 1, 1], [], []>} : vector<16x32xbf16>, vector<32x32xbf16>, vector<16x32xf32> -> vector<16x32xf32>
    %7 = arith.addf %3, %6 : vector<16x32xf32>
    %c0_6 = arith.constant 0 : index
    %c0_7 = arith.constant 0 : index
    %8 = vector.load %arg9[%c0_6, %c0_7] : memref<16x32xf32, #tpu.memory_space<vmem>>, vector<16x32xf32>
    tpu.vector_store %arg9[%c0_6, %c0_7], %7 {strides = array<i32>} : memref<16x32xf32, #tpu.memory_space<vmem>>, vector<16x32xf32>,
    %c0_i32_8 = arith.constant 0 : i32
    %9 = arith.cmpi eq, %arg1, %c0_i32_8 : i32
    %10 = arith.extui %9 : i1 to i32
    %c0_i32_9 = arith.constant 0 : i32
    %11 = arith.cmpi ne, %10, %c0_i32_9 : i32
    scf.if %11 {
      %c0_10 = arith.constant 0 : index
      %c0_11 = arith.constant 0 : index
      %12 = vector.load %arg9[%c0_10, %c0_11] : memref<16x32xf32, #tpu.memory_space<vmem>>, vector<16x32xf32>
      %c0_12 = arith.constant 0 : index
      %c0_13 = arith.constant 0 : index
      %13 = vector.load %arg4[%c0_12, %c0_13] : memref<1x32xf32, #tpu.memory_space<vmem>>, vector<1x32xf32>
      %14 = vector.broadcast %13 : vector<1x32xf32> to vector<16x32xf32>
      %15 = arith.addf %12, %14 : vector<16x32xf32>
      %c0_14 = arith.constant 0 : index
      %c0_15 = arith.constant 0 : index
      %16 = vector.load %arg5[%c0_14, %c0_15] : memref<16x32xbf16, #tpu.memory_space<vmem>>, vector<16x32xbf16>
      %17 = arith.extf %16 : vector<16x32xbf16> to vector<16x32xf32>
      %18 = arith.addf %15, %17 : vector<16x32xf32>
      %cst_16 = arith.constant dense<0.000000e+00> : vector<16xf32>
      %19 = vector.multi_reduction <add>, %18, %cst_16 [1] : vector<16x32xf32> to vector<16xf32>
      %20 = vector.shape_cast %19 : vector<16xf32> to vector<16x1xf32>
      %cst_17 = arith.constant 3.200000e+01 : f32
      %21 = vector.broadcast %cst_17 : f32 to vector<16x1xf32>
      %22 = arith.divf %20, %21 : vector<16x1xf32>
      %23 = vector.broadcast %22 : vector<16x1xf32> to vector<16x32xf32>
      %24 = arith.subf %18, %23 : vector<16x32xf32>
      %25 = arith.mulf %24, %24 : vector<16x32xf32>
      %cst_18 = arith.constant dense<0.000000e+00> : vector<16xf32>
      %26 = vector.multi_reduction <add>, %25, %cst_18 [1] : vector<16x32xf32> to vector<16xf32>
      %27 = vector.shape_cast %26 : vector<16xf32> to vector<16x1xf32>
      %cst_19 = arith.constant 3.200000e+01 : f32
      %28 = vector.broadcast %cst_19 : f32 to vector<16x1xf32>
      %29 = arith.divf %27, %28 : vector<16x1xf32>
      %30 = vector.broadcast %22 : vector<16x1xf32> to vector<16x32xf32>
      %31 = arith.subf %18, %30 : vector<16x32xf32>
      %cst_20 = arith.constant 9.99999996E-13 : f32
      %32 = vector.broadcast %cst_20 : f32 to vector<16x1xf32>
      %33 = arith.addf %29, %32 : vector<16x1xf32>
      %34 = math.rsqrt %33 : vector<16x1xf32>
      %35 = vector.broadcast %34 : vector<16x1xf32> to vector<16x32xf32>
      %36 = arith.mulf %31, %35 : vector<16x32xf32>
      %c0_21 = arith.constant 0 : index
      %c0_22 = arith.constant 0 : index
      %37 = vector.load %arg6[%c0_21, %c0_22] : memref<1x32xf32, #tpu.memory_space<vmem>>, vector<1x32xf32>
      %38 = vector.broadcast %37 : vector<1x32xf32> to vector<16x32xf32>
      %39 = arith.mulf %36, %38 : vector<16x32xf32>
      %c0_23 = arith.constant 0 : index
      %c0_24 = arith.constant 0 : index
      %40 = vector.load %arg7[%c0_23, %c0_24] : memref<1x32xf32, #tpu.memory_space<vmem>>, vector<1x32xf32>
      %41 = vector.broadcast %40 : vector<1x32xf32> to vector<16x32xf32>
      %42 = arith.addf %39, %41 : vector<16x32xf32>
      %43 = arith.truncf %42 : vector<16x32xf32> to vector<16x32xbf16>
      %c0_25 = arith.constant 0 : index
      %c0_26 = arith.constant 0 : index
      %44 = vector.load %arg8[%c0_25, %c0_26] : memref<16x32xbf16, #tpu.memory_space<vmem>>, vector<16x32xbf16>
      tpu.vector_store %arg8[%c0_25, %c0_26], %43 {strides = array<i32>} : memref<16x32xbf16, #tpu.memory_space<vmem>>, vector<16x32xbf16>,
    } else {
    }
    return
  }
  func.func @transform_0(%arg0: i32, %arg1: i32) -> (i32, i32) {
    %c0_i32 = arith.constant 0 : i32
    return %arg0, %arg1 : i32, i32
  }
  func.func @transform_1(%arg0: i32, %arg1: i32) -> (i32, i32) {
    %c0_i32 = arith.constant 0 : i32
    %c0_i32_0 = arith.constant 0 : i32
    return %arg1, %c0_i32 : i32, i32
  }
  func.func @transform_2(%arg0: i32, %arg1: i32) -> (i32, i32) {
    %c0_i32 = arith.constant 0 : i32
    %c0_i32_0 = arith.constant 0 : i32
    %c0_i32_1 = arith.constant 0 : i32
    return %c0_i32, %c0_i32_0 : i32, i32
  }
  func.func @transform_3(%arg0: i32, %arg1: i32) -> (i32, i32) {
    %c0_i32 = arith.constant 0 : i32
    %c0_i32_0 = arith.constant 0 : i32
    return %arg0, %c0_i32 : i32, i32
  }
  func.func @transform_4(%arg0: i32, %arg1: i32) -> (i32, i32) {
    %c0_i32 = arith.constant 0 : i32
    %c0_i32_0 = arith.constant 0 : i32
    %c0_i32_1 = arith.constant 0 : i32
    return %c0_i32, %c0_i32_0 : i32, i32
  }
  func.func @transform_5(%arg0: i32, %arg1: i32) -> (i32, i32) {
    %c0_i32 = arith.constant 0 : i32
    %c0_i32_0 = arith.constant 0 : i32
    %c0_i32_1 = arith.constant 0 : i32
    return %c0_i32, %c0_i32_0 : i32, i32
  }
  func.func @transform_6(%arg0: i32, %arg1: i32) -> (i32, i32) {
    %c0_i32 = arith.constant 0 : i32
    %c0_i32_0 = arith.constant 0 : i32
    return %arg0, %c0_i32 : i32, i32
  }
}

module attributes {stable_mosaic.version = 11 : i64} {
  func.func @_dense_kernel(%arg0: i32, %arg1: i32, %arg2: i32, %arg3: memref<16x32xbf16, #tpu.memory_space<vmem>>, %arg4: memref<32x64xbf16, #tpu.memory_space<vmem>>, %arg5: memref<1x64xf32, #tpu.memory_space<vmem>>, %arg6: memref<16x64xbf16, #tpu.memory_space<vmem>>, %arg7: memref<16x64xf32, #tpu.memory_space<vmem>>) attributes {dimension_semantics = [#tpu.dimension_semantics<parallel>, #tpu.dimension_semantics<parallel>, #tpu.dimension_semantics<arbitrary>], iteration_bounds = array<i64: 1, 1, 1>, scalar_prefetch = 0 : i64, scratch_operands = 1 : i64, tpu.core_type = #tpu.core_type<tc>, window_params = [{transform_indices = @transform_0, window_bounds = array<i64: 16, 32>}, {transform_indices = @transform_1, window_bounds = array<i64: 32, 64>}, {transform_indices = @transform_2, window_bounds = array<i64: 1, 64>}, {transform_indices = @transform_3, window_bounds = array<i64: 16, 64>}]} {
    %c0_i32 = arith.constant 0 : i32
    %0 = arith.cmpi eq, %arg2, %c0_i32 : i32
    %1 = arith.extui %0 : i1 to i32
    %c0_i32_0 = arith.constant 0 : i32
    %2 = arith.cmpi ne, %1, %c0_i32_0 : i32
    scf.if %2 {
      %cst_10 = arith.constant 0.000000e+00 : f32
      %12 = vector.broadcast %cst_10 : f32 to vector<16x64xf32>
      %c0_11 = arith.constant 0 : index
      %c0_12 = arith.constant 0 : index
      %13 = vector.load %arg7[%c0_11, %c0_12] : memref<16x64xf32, #tpu.memory_space<vmem>>, vector<16x64xf32>
      tpu.vector_store %arg7[%c0_11, %c0_12], %12 {strides = array<i32>} : memref<16x64xf32, #tpu.memory_space<vmem>>, vector<16x64xf32>,
    } else {
    }
    %c0 = arith.constant 0 : index
    %c0_1 = arith.constant 0 : index
    %3 = vector.load %arg7[%c0, %c0_1] : memref<16x64xf32, #tpu.memory_space<vmem>>, vector<16x64xf32>
    %c0_2 = arith.constant 0 : index
    %c0_3 = arith.constant 0 : index
    %4 = vector.load %arg3[%c0_2, %c0_3] : memref<16x32xbf16, #tpu.memory_space<vmem>>, vector<16x32xbf16>
    %c0_4 = arith.constant 0 : index
    %c0_5 = arith.constant 0 : index
    %5 = vector.load %arg4[%c0_4, %c0_5] : memref<32x64xbf16, #tpu.memory_space<vmem>>, vector<32x64xbf16>
    %cst = arith.constant dense<0.000000e+00> : vector<16x64xf32>
    %6 = tpu.matmul %4, %5, %cst {dimension_numbers = #tpu.dot_dimension_numbers<[1], [0], [0], [1], [0, 0, 1, 1], [], []>} : vector<16x32xbf16>, vector<32x64xbf16>, vector<16x64xf32> -> vector<16x64xf32>
    %7 = arith.addf %3, %6 : vector<16x64xf32>
    %c0_6 = arith.constant 0 : index
    %c0_7 = arith.constant 0 : index
    %8 = vector.load %arg7[%c0_6, %c0_7] : memref<16x64xf32, #tpu.memory_space<vmem>>, vector<16x64xf32>
    tpu.vector_store %arg7[%c0_6, %c0_7], %7 {strides = array<i32>} : memref<16x64xf32, #tpu.memory_space<vmem>>, vector<16x64xf32>,
    %c0_i32_8 = arith.constant 0 : i32
    %9 = arith.cmpi eq, %arg2, %c0_i32_8 : i32
    %10 = arith.extui %9 : i1 to i32
    %c0_i32_9 = arith.constant 0 : i32
    %11 = arith.cmpi ne, %10, %c0_i32_9 : i32
    scf.if %11 {
      %c0_10 = arith.constant 0 : index
      %c0_11 = arith.constant 0 : index
      %12 = vector.load %arg7[%c0_10, %c0_11] : memref<16x64xf32, #tpu.memory_space<vmem>>, vector<16x64xf32>
      %c0_12 = arith.constant 0 : index
      %c0_13 = arith.constant 0 : index
      %13 = vector.load %arg5[%c0_12, %c0_13] : memref<1x64xf32, #tpu.memory_space<vmem>>, vector<1x64xf32>
      %14 = vector.broadcast %13 : vector<1x64xf32> to vector<16x64xf32>
      %15 = arith.addf %12, %14 : vector<16x64xf32>
      %cst_14 = arith.constant 5.000000e-01 : f32
      %16 = vector.broadcast %cst_14 : f32 to vector<16x64xf32>
      %17 = arith.mulf %16, %15 : vector<16x64xf32>
      %cst_15 = arith.constant 4.471500e-02 : f32
      %18 = vector.broadcast %cst_15 : f32 to vector<16x64xf32>
      %19 = arith.mulf %18, %15 : vector<16x64xf32>
      %20 = arith.mulf %19, %15 : vector<16x64xf32>
      %21 = arith.mulf %20, %15 : vector<16x64xf32>
      %22 = arith.addf %15, %21 : vector<16x64xf32>
      %cst_16 = arith.constant 0.797884583 : f32
      %23 = vector.broadcast %cst_16 : f32 to vector<16x64xf32>
      %24 = arith.mulf %23, %22 : vector<16x64xf32>
      %25 = math.tanh %24 : vector<16x64xf32>
      %cst_17 = arith.constant 1.000000e+00 : f32
      %26 = vector.broadcast %cst_17 : f32 to vector<16x64xf32>
      %27 = arith.addf %26, %25 : vector<16x64xf32>
      %28 = arith.mulf %17, %27 : vector<16x64xf32>
      %29 = arith.truncf %28 : vector<16x64xf32> to vector<16x64xbf16>
      %c0_18 = arith.constant 0 : index
      %c0_19 = arith.constant 0 : index
      %30 = vector.load %arg6[%c0_18, %c0_19] : memref<16x64xbf16, #tpu.memory_space<vmem>>, vector<16x64xbf16>
      tpu.vector_store %arg6[%c0_18, %c0_19], %29 {strides = array<i32>} : memref<16x64xbf16, #tpu.memory_space<vmem>>, vector<16x64xbf16>,
    } else {
    }
    return
  }
  func.func @transform_0(%arg0: i32, %arg1: i32, %arg2: i32) -> (i32, i32) {
    %c0_i32 = arith.constant 0 : i32
    return %arg0, %arg2 : i32, i32
  }
  func.func @transform_1(%arg0: i32, %arg1: i32, %arg2: i32) -> (i32, i32) {
    %c0_i32 = arith.constant 0 : i32
    return %arg2, %arg1 : i32, i32
  }
  func.func @transform_2(%arg0: i32, %arg1: i32, %arg2: i32) -> (i32, i32) {
    %c0_i32 = arith.constant 0 : i32
    %c0_i32_0 = arith.constant 0 : i32
    return %c0_i32, %arg1 : i32, i32
  }
  func.func @transform_3(%arg0: i32, %arg1: i32, %arg2: i32) -> (i32, i32) {
    %c0_i32 = arith.constant 0 : i32
    return %arg0, %arg1 : i32, i32
  }
}

module attributes {stable_mosaic.version = 11 : i64} {
  func.func @_dense_add_ln_kernel(%arg0: i32, %arg1: i32, %arg2: memref<16x64xbf16, #tpu.memory_space<vmem>>, %arg3: memref<64x32xbf16, #tpu.memory_space<vmem>>, %arg4: memref<1x32xf32, #tpu.memory_space<vmem>>, %arg5: memref<16x32xbf16, #tpu.memory_space<vmem>>, %arg6: memref<1x32xf32, #tpu.memory_space<vmem>>, %arg7: memref<1x32xf32, #tpu.memory_space<vmem>>, %arg8: memref<16x32xbf16, #tpu.memory_space<vmem>>, %arg9: memref<16x32xf32, #tpu.memory_space<vmem>>) attributes {dimension_semantics = [#tpu.dimension_semantics<parallel>, #tpu.dimension_semantics<arbitrary>], iteration_bounds = array<i64: 1, 1>, scalar_prefetch = 0 : i64, scratch_operands = 1 : i64, tpu.core_type = #tpu.core_type<tc>, window_params = [{transform_indices = @transform_0, window_bounds = array<i64: 16, 64>}, {transform_indices = @transform_1, window_bounds = array<i64: 64, 32>}, {pipeline_mode = #tpu.pipeline_mode<synchronous>, transform_indices = @transform_2, window_bounds = array<i64: 1, 32>}, {transform_indices = @transform_3, window_bounds = array<i64: 16, 32>}, {pipeline_mode = #tpu.pipeline_mode<synchronous>, transform_indices = @transform_4, window_bounds = array<i64: 1, 32>}, {pipeline_mode = #tpu.pipeline_mode<synchronous>, transform_indices = @transform_5, window_bounds = array<i64: 1, 32>}, {transform_indices = @transform_6, window_bounds = array<i64: 16, 32>}]} {
    %c0_i32 = arith.constant 0 : i32
    %0 = arith.cmpi eq, %arg1, %c0_i32 : i32
    %1 = arith.extui %0 : i1 to i32
    %c0_i32_0 = arith.constant 0 : i32
    %2 = arith.cmpi ne, %1, %c0_i32_0 : i32
    scf.if %2 {
      %cst_10 = arith.constant 0.000000e+00 : f32
      %12 = vector.broadcast %cst_10 : f32 to vector<16x32xf32>
      %c0_11 = arith.constant 0 : index
      %c0_12 = arith.constant 0 : index
      %13 = vector.load %arg9[%c0_11, %c0_12] : memref<16x32xf32, #tpu.memory_space<vmem>>, vector<16x32xf32>
      tpu.vector_store %arg9[%c0_11, %c0_12], %12 {strides = array<i32>} : memref<16x32xf32, #tpu.memory_space<vmem>>, vector<16x32xf32>,
    } else {
    }
    %c0 = arith.constant 0 : index
    %c0_1 = arith.constant 0 : index
    %3 = vector.load %arg9[%c0, %c0_1] : memref<16x32xf32, #tpu.memory_space<vmem>>, vector<16x32xf32>
    %c0_2 = arith.constant 0 : index
    %c0_3 = arith.constant 0 : index
    %4 = vector.load %arg2[%c0_2, %c0_3] : memref<16x64xbf16, #tpu.memory_space<vmem>>, vector<16x64xbf16>
    %c0_4 = arith.constant 0 : index
    %c0_5 = arith.constant 0 : index
    %5 = vector.load %arg3[%c0_4, %c0_5] : memref<64x32xbf16, #tpu.memory_space<vmem>>, vector<64x32xbf16>
    %cst = arith.constant dense<0.000000e+00> : vector<16x32xf32>
    %6 = tpu.matmul %4, %5, %cst {dimension_numbers = #tpu.dot_dimension_numbers<[1], [0], [0], [1], [0, 0, 1, 1], [], []>} : vector<16x64xbf16>, vector<64x32xbf16>, vector<16x32xf32> -> vector<16x32xf32>
    %7 = arith.addf %3, %6 : vector<16x32xf32>
    %c0_6 = arith.constant 0 : index
    %c0_7 = arith.constant 0 : index
    %8 = vector.load %arg9[%c0_6, %c0_7] : memref<16x32xf32, #tpu.memory_space<vmem>>, vector<16x32xf32>
    tpu.vector_store %arg9[%c0_6, %c0_7], %7 {strides = array<i32>} : memref<16x32xf32, #tpu.memory_space<vmem>>, vector<16x32xf32>,
    %c0_i32_8 = arith.constant 0 : i32
    %9 = arith.cmpi eq, %arg1, %c0_i32_8 : i32
    %10 = arith.extui %9 : i1 to i32
    %c0_i32_9 = arith.constant 0 : i32
    %11 = arith.cmpi ne, %10, %c0_i32_9 : i32
    scf.if %11 {
      %c0_10 = arith.constant 0 : index
      %c0_11 = arith.constant 0 : index
      %12 = vector.load %arg9[%c0_10, %c0_11] : memref<16x32xf32, #tpu.memory_space<vmem>>, vector<16x32xf32>
      %c0_12 = arith.constant 0 : index
      %c0_13 = arith.constant 0 : index
      %13 = vector.load %arg4[%c0_12, %c0_13] : memref<1x32xf32, #tpu.memory_space<vmem>>, vector<1x32xf32>
      %14 = vector.broadcast %13 : vector<1x32xf32> to vector<16x32xf32>
      %15 = arith.addf %12, %14 : vector<16x32xf32>
      %c0_14 = arith.constant 0 : index
      %c0_15 = arith.constant 0 : index
      %16 = vector.load %arg5[%c0_14, %c0_15] : memref<16x32xbf16, #tpu.memory_space<vmem>>, vector<16x32xbf16>
      %17 = arith.extf %16 : vector<16x32xbf16> to vector<16x32xf32>
      %18 = arith.addf %15, %17 : vector<16x32xf32>
      %cst_16 = arith.constant dense<0.000000e+00> : vector<16xf32>
      %19 = vector.multi_reduction <add>, %18, %cst_16 [1] : vector<16x32xf32> to vector<16xf32>
      %20 = vector.shape_cast %19 : vector<16xf32> to vector<16x1xf32>
      %cst_17 = arith.constant 3.200000e+01 : f32
      %21 = vector.broadcast %cst_17 : f32 to vector<16x1xf32>
      %22 = arith.divf %20, %21 : vector<16x1xf32>
      %23 = vector.broadcast %22 : vector<16x1xf32> to vector<16x32xf32>
      %24 = arith.subf %18, %23 : vector<16x32xf32>
      %25 = arith.mulf %24, %24 : vector<16x32xf32>
      %cst_18 = arith.constant dense<0.000000e+00> : vector<16xf32>
      %26 = vector.multi_reduction <add>, %25, %cst_18 [1] : vector<16x32xf32> to vector<16xf32>
      %27 = vector.shape_cast %26 : vector<16xf32> to vector<16x1xf32>
      %cst_19 = arith.constant 3.200000e+01 : f32
      %28 = vector.broadcast %cst_19 : f32 to vector<16x1xf32>
      %29 = arith.divf %27, %28 : vector<16x1xf32>
      %30 = vector.broadcast %22 : vector<16x1xf32> to vector<16x32xf32>
      %31 = arith.subf %18, %30 : vector<16x32xf32>
      %cst_20 = arith.constant 9.99999996E-13 : f32
      %32 = vector.broadcast %cst_20 : f32 to vector<16x1xf32>
      %33 = arith.addf %29, %32 : vector<16x1xf32>
      %34 = math.rsqrt %33 : vector<16x1xf32>
      %35 = vector.broadcast %34 : vector<16x1xf32> to vector<16x32xf32>
      %36 = arith.mulf %31, %35 : vector<16x32xf32>
      %c0_21 = arith.constant 0 : index
      %c0_22 = arith.constant 0 : index
      %37 = vector.load %arg6[%c0_21, %c0_22] : memref<1x32xf32, #tpu.memory_space<vmem>>, vector<1x32xf32>
      %38 = vector.broadcast %37 : vector<1x32xf32> to vector<16x32xf32>
      %39 = arith.mulf %36, %38 : vector<16x32xf32>
      %c0_23 = arith.constant 0 : index
      %c0_24 = arith.constant 0 : index
      %40 = vector.load %arg7[%c0_23, %c0_24] : memref<1x32xf32, #tpu.memory_space<vmem>>, vector<1x32xf32>
      %41 = vector.broadcast %40 : vector<1x32xf32> to vector<16x32xf32>
      %42 = arith.addf %39, %41 : vector<16x32xf32>
      %43 = arith.truncf %42 : vector<16x32xf32> to vector<16x32xbf16>
      %c0_25 = arith.constant 0 : index
      %c0_26 = arith.constant 0 : index
      %44 = vector.load %arg8[%c0_25, %c0_26] : memref<16x32xbf16, #tpu.memory_space<vmem>>, vector<16x32xbf16>
      tpu.vector_store %arg8[%c0_25, %c0_26], %43 {strides = array<i32>} : memref<16x32xbf16, #tpu.memory_space<vmem>>, vector<16x32xbf16>,
    } else {
    }
    return
  }
  func.func @transform_0(%arg0: i32, %arg1: i32) -> (i32, i32) {
    %c0_i32 = arith.constant 0 : i32
    return %arg0, %arg1 : i32, i32
  }
  func.func @transform_1(%arg0: i32, %arg1: i32) -> (i32, i32) {
    %c0_i32 = arith.constant 0 : i32
    %c0_i32_0 = arith.constant 0 : i32
    return %arg1, %c0_i32 : i32, i32
  }
  func.func @transform_2(%arg0: i32, %arg1: i32) -> (i32, i32) {
    %c0_i32 = arith.constant 0 : i32
    %c0_i32_0 = arith.constant 0 : i32
    %c0_i32_1 = arith.constant 0 : i32
    return %c0_i32, %c0_i32_0 : i32, i32
  }
  func.func @transform_3(%arg0: i32, %arg1: i32) -> (i32, i32) {
    %c0_i32 = arith.constant 0 : i32
    %c0_i32_0 = arith.constant 0 : i32
    return %arg0, %c0_i32 : i32, i32
  }
  func.func @transform_4(%arg0: i32, %arg1: i32) -> (i32, i32) {
    %c0_i32 = arith.constant 0 : i32
    %c0_i32_0 = arith.constant 0 : i32
    %c0_i32_1 = arith.constant 0 : i32
    return %c0_i32, %c0_i32_0 : i32, i32
  }
  func.func @transform_5(%arg0: i32, %arg1: i32) -> (i32, i32) {
    %c0_i32 = arith.constant 0 : i32
    %c0_i32_0 = arith.constant 0 : i32
    %c0_i32_1 = arith.constant 0 : i32
    return %c0_i32, %c0_i32_0 : i32, i32
  }
  func.func @transform_6(%arg0: i32, %arg1: i32) -> (i32, i32) {
    %c0_i32 = arith.constant 0 : i32
    %c0_i32_0 = arith.constant 0 : i32
    return %arg0, %c0_i32 : i32, i32
  }
}

module attributes {stable_mosaic.version = 11 : i64} {
  func.func @_textcnn_kernel(%arg0: i32, %arg1: memref<2x8x32xbf16, #tpu.memory_space<vmem>>, %arg2: memref<3x32x128xbf16, #tpu.memory_space<vmem>>, %arg3: memref<1x128xf32, #tpu.memory_space<vmem>>, %arg4: memref<4x32x128xbf16, #tpu.memory_space<vmem>>, %arg5: memref<1x128xf32, #tpu.memory_space<vmem>>, %arg6: memref<5x32x128xbf16, #tpu.memory_space<vmem>>, %arg7: memref<1x128xf32, #tpu.memory_space<vmem>>, %arg8: memref<384x128xbf16, #tpu.memory_space<vmem>>, %arg9: memref<1x128xf32, #tpu.memory_space<vmem>>, %arg10: memref<2x128xf32, #tpu.memory_space<vmem>>) attributes {dimension_semantics = [#tpu.dimension_semantics<parallel>], iteration_bounds = array<i64: 1>, scalar_prefetch = 0 : i64, scratch_operands = 0 : i64, tpu.core_type = #tpu.core_type<tc>, window_params = [{transform_indices = @transform_0, window_bounds = array<i64: 2, 8, 32>}, {pipeline_mode = #tpu.pipeline_mode<synchronous>, transform_indices = @transform_1, window_bounds = array<i64: 3, 32, 128>}, {pipeline_mode = #tpu.pipeline_mode<synchronous>, transform_indices = @transform_2, window_bounds = array<i64: 1, 128>}, {pipeline_mode = #tpu.pipeline_mode<synchronous>, transform_indices = @transform_3, window_bounds = array<i64: 4, 32, 128>}, {pipeline_mode = #tpu.pipeline_mode<synchronous>, transform_indices = @transform_4, window_bounds = array<i64: 1, 128>}, {pipeline_mode = #tpu.pipeline_mode<synchronous>, transform_indices = @transform_5, window_bounds = array<i64: 5, 32, 128>}, {pipeline_mode = #tpu.pipeline_mode<synchronous>, transform_indices = @transform_6, window_bounds = array<i64: 1, 128>}, {pipeline_mode = #tpu.pipeline_mode<synchronous>, transform_indices = @transform_7, window_bounds = array<i64: 384, 128>}, {pipeline_mode = #tpu.pipeline_mode<synchronous>, transform_indices = @transform_8, window_bounds = array<i64: 1, 128>}, {transform_indices = @transform_9, window_bounds = array<i64: 2, 128>}]} {
    %c0 = arith.constant 0 : index
    %c0_0 = arith.constant 0 : index
    %c0_1 = arith.constant 0 : index
    %0 = vector.load %arg1[%c0, %c0_0, %c0_1] : memref<2x8x32xbf16, #tpu.memory_space<vmem>>, vector<2x8x32xbf16>
    %1 = vector.shape_cast %0 : vector<2x8x32xbf16> to vector<16x32xbf16>
    %cst = arith.constant 0.000000e+00 : f32
    %2 = vector.broadcast %cst : f32 to vector<2x8x128xf32>
    %c0_2 = arith.constant 0 : index
    %c0_3 = arith.constant 0 : index
    %c0_4 = arith.constant 0 : index
    %3 = vector.load %arg2[%c0_2, %c0_3, %c0_4] : memref<3x32x128xbf16, #tpu.memory_space<vmem>>, vector<1x32x128xbf16>
    %4 = vector.shape_cast %3 : vector<1x32x128xbf16> to vector<32x128xbf16>
    %cst_5 = arith.constant dense<0.000000e+00> : vector<16x128xf32>
    %5 = tpu.matmul %1, %4, %cst_5 {dimension_numbers = #tpu.dot_dimension_numbers<[1], [0], [0], [1], [0, 0, 1, 1], [], []>} : vector<16x32xbf16>, vector<32x128xbf16>, vector<16x128xf32> -> vector<16x128xf32>
    %6 = vector.shape_cast %5 : vector<16x128xf32> to vector<2x8x128xf32>
    %7 = arith.addf %2, %6 : vector<2x8x128xf32>
    %c1 = arith.constant 1 : index
    %c0_6 = arith.constant 0 : index
    %c0_7 = arith.constant 0 : index
    %8 = vector.load %arg2[%c1, %c0_6, %c0_7] : memref<3x32x128xbf16, #tpu.memory_space<vmem>>, vector<1x32x128xbf16>
    %9 = vector.shape_cast %8 : vector<1x32x128xbf16> to vector<32x128xbf16>
    %cst_8 = arith.constant dense<0.000000e+00> : vector<16x128xf32>
    %10 = tpu.matmul %1, %9, %cst_8 {dimension_numbers = #tpu.dot_dimension_numbers<[1], [0], [0], [1], [0, 0, 1, 1], [], []>} : vector<16x32xbf16>, vector<32x128xbf16>, vector<16x128xf32> -> vector<16x128xf32>
    %11 = vector.shape_cast %10 : vector<16x128xf32> to vector<2x8x128xf32>
    %c7_i32 = arith.constant 7 : i32
    %12 = tpu.dynamic_rotate %11 by %c7_i32 dim 1 : vector<2x8x128xf32>, i32 -> vector<2x8x128xf32>
    %13 = arith.addf %7, %12 : vector<2x8x128xf32>
    %c2 = arith.constant 2 : index
    %c0_9 = arith.constant 0 : index
    %c0_10 = arith.constant 0 : index
    %14 = vector.load %arg2[%c2, %c0_9, %c0_10] : memref<3x32x128xbf16, #tpu.memory_space<vmem>>, vector<1x32x128xbf16>
    %15 = vector.shape_cast %14 : vector<1x32x128xbf16> to vector<32x128xbf16>
    %cst_11 = arith.constant dense<0.000000e+00> : vector<16x128xf32>
    %16 = tpu.matmul %1, %15, %cst_11 {dimension_numbers = #tpu.dot_dimension_numbers<[1], [0], [0], [1], [0, 0, 1, 1], [], []>} : vector<16x32xbf16>, vector<32x128xbf16>, vector<16x128xf32> -> vector<16x128xf32>
    %17 = vector.shape_cast %16 : vector<16x128xf32> to vector<2x8x128xf32>
    %c6_i32 = arith.constant 6 : i32
    %18 = tpu.dynamic_rotate %17 by %c6_i32 dim 1 : vector<2x8x128xf32>, i32 -> vector<2x8x128xf32>
    %19 = arith.addf %13, %18 : vector<2x8x128xf32>
    %c0_12 = arith.constant 0 : index
    %c0_13 = arith.constant 0 : index
    %20 = vector.load %arg3[%c0_12, %c0_13] : memref<1x128xf32, #tpu.memory_space<vmem>>, vector<1x128xf32>
    %21 = vector.shape_cast %20 : vector<1x128xf32> to vector<1x1x128xf32>
    %22 = vector.broadcast %21 : vector<1x1x128xf32> to vector<2x8x128xf32>
    %23 = arith.addf %19, %22 : vector<2x8x128xf32>
    %24 = math.tanh %23 : vector<2x8x128xf32>
    %25 = tpu.iota {dimensions = array<i32: 0>} : vector<8x128xi32>
    %c6_i32_14 = arith.constant 6 : i32
    %26 = vector.broadcast %c6_i32_14 : i32 to vector<8x128xi32>
    %27 = arith.cmpi slt, %25, %26 : vector<8x128xi32>
    %cst_15 = arith.constant -2.000000e+00 : f32
    %28 = vector.shape_cast %27 : vector<8x128xi1> to vector<1x8x128xi1>
    %29 = vector.broadcast %28 : vector<1x8x128xi1> to vector<2x8x128xi1>
    %30 = vector.broadcast %cst_15 : f32 to vector<2x8x128xf32>
    %31 = arith.select %29, %24, %30 : vector<2x8x128xi1>, vector<2x8x128xf32>
    %cst_16 = arith.constant dense<0xFF800000> : vector<2x128xf32>
    %32 = vector.multi_reduction <maximumf>, %31, %cst_16 [1] : vector<2x8x128xf32> to vector<2x128xf32>
    %cst_17 = arith.constant 0.000000e+00 : f32
    %33 = vector.broadcast %cst_17 : f32 to vector<2x8x128xf32>
    %c0_18 = arith.constant 0 : index
    %c0_19 = arith.constant 0 : index
    %c0_20 = arith.constant 0 : index
    %34 = vector.load %arg4[%c0_18, %c0_19, %c0_20] : memref<4x32x128xbf16, #tpu.memory_space<vmem>>, vector<1x32x128xbf16>
    %35 = vector.shape_cast %34 : vector<1x32x128xbf16> to vector<32x128xbf16>
    %cst_21 = arith.constant dense<0.000000e+00> : vector<16x128xf32>
    %36 = tpu.matmul %1, %35, %cst_21 {dimension_numbers = #tpu.dot_dimension_numbers<[1], [0], [0], [1], [0, 0, 1, 1], [], []>} : vector<16x32xbf16>, vector<32x128xbf16>, vector<16x128xf32> -> vector<16x128xf32>
    %37 = vector.shape_cast %36 : vector<16x128xf32> to vector<2x8x128xf32>
    %38 = arith.addf %33, %37 : vector<2x8x128xf32>
    %c1_22 = arith.constant 1 : index
    %c0_23 = arith.constant 0 : index
    %c0_24 = arith.constant 0 : index
    %39 = vector.load %arg4[%c1_22, %c0_23, %c0_24] : memref<4x32x128xbf16, #tpu.memory_space<vmem>>, vector<1x32x128xbf16>
    %40 = vector.shape_cast %39 : vector<1x32x128xbf16> to vector<32x128xbf16>
    %cst_25 = arith.constant dense<0.000000e+00> : vector<16x128xf32>
    %41 = tpu.matmul %1, %40, %cst_25 {dimension_numbers = #tpu.dot_dimension_numbers<[1], [0], [0], [1], [0, 0, 1, 1], [], []>} : vector<16x32xbf16>, vector<32x128xbf16>, vector<16x128xf32> -> vector<16x128xf32>
    %42 = vector.shape_cast %41 : vector<16x128xf32> to vector<2x8x128xf32>
    %c7_i32_26 = arith.constant 7 : i32
    %43 = tpu.dynamic_rotate %42 by %c7_i32_26 dim 1 : vector<2x8x128xf32>, i32 -> vector<2x8x128xf32>
    %44 = arith.addf %38, %43 : vector<2x8x128xf32>
    %c2_27 = arith.constant 2 : index
    %c0_28 = arith.constant 0 : index
    %c0_29 = arith.constant 0 : index
    %45 = vector.load %arg4[%c2_27, %c0_28, %c0_29] : memref<4x32x128xbf16, #tpu.memory_space<vmem>>, vector<1x32x128xbf16>
    %46 = vector.shape_cast %45 : vector<1x32x128xbf16> to vector<32x128xbf16>
    %cst_30 = arith.constant dense<0.000000e+00> : vector<16x128xf32>
    %47 = tpu.matmul %1, %46, %cst_30 {dimension_numbers = #tpu.dot_dimension_numbers<[1], [0], [0], [1], [0, 0, 1, 1], [], []>} : vector<16x32xbf16>, vector<32x128xbf16>, vector<16x128xf32> -> vector<16x128xf32>
    %48 = vector.shape_cast %47 : vector<16x128xf32> to vector<2x8x128xf32>
    %c6_i32_31 = arith.constant 6 : i32
    %49 = tpu.dynamic_rotate %48 by %c6_i32_31 dim 1 : vector<2x8x128xf32>, i32 -> vector<2x8x128xf32>
    %50 = arith.addf %44, %49 : vector<2x8x128xf32>
    %c3 = arith.constant 3 : index
    %c0_32 = arith.constant 0 : index
    %c0_33 = arith.constant 0 : index
    %51 = vector.load %arg4[%c3, %c0_32, %c0_33] : memref<4x32x128xbf16, #tpu.memory_space<vmem>>, vector<1x32x128xbf16>
    %52 = vector.shape_cast %51 : vector<1x32x128xbf16> to vector<32x128xbf16>
    %cst_34 = arith.constant dense<0.000000e+00> : vector<16x128xf32>
    %53 = tpu.matmul %1, %52, %cst_34 {dimension_numbers = #tpu.dot_dimension_numbers<[1], [0], [0], [1], [0, 0, 1, 1], [], []>} : vector<16x32xbf16>, vector<32x128xbf16>, vector<16x128xf32> -> vector<16x128xf32>
    %54 = vector.shape_cast %53 : vector<16x128xf32> to vector<2x8x128xf32>
    %c5_i32 = arith.constant 5 : i32
    %55 = tpu.dynamic_rotate %54 by %c5_i32 dim 1 : vector<2x8x128xf32>, i32 -> vector<2x8x128xf32>
    %56 = arith.addf %50, %55 : vector<2x8x128xf32>
    %c0_35 = arith.constant 0 : index
    %c0_36 = arith.constant 0 : index
    %57 = vector.load %arg5[%c0_35, %c0_36] : memref<1x128xf32, #tpu.memory_space<vmem>>, vector<1x128xf32>
    %58 = vector.shape_cast %57 : vector<1x128xf32> to vector<1x1x128xf32>
    %59 = vector.broadcast %58 : vector<1x1x128xf32> to vector<2x8x128xf32>
    %60 = arith.addf %56, %59 : vector<2x8x128xf32>
    %61 = math.tanh %60 : vector<2x8x128xf32>
    %62 = tpu.iota {dimensions = array<i32: 0>} : vector<8x128xi32>
    %c5_i32_37 = arith.constant 5 : i32
    %63 = vector.broadcast %c5_i32_37 : i32 to vector<8x128xi32>
    %64 = arith.cmpi slt, %62, %63 : vector<8x128xi32>
    %cst_38 = arith.constant -2.000000e+00 : f32
    %65 = vector.shape_cast %64 : vector<8x128xi1> to vector<1x8x128xi1>
    %66 = vector.broadcast %65 : vector<1x8x128xi1> to vector<2x8x128xi1>
    %67 = vector.broadcast %cst_38 : f32 to vector<2x8x128xf32>
    %68 = arith.select %66, %61, %67 : vector<2x8x128xi1>, vector<2x8x128xf32>
    %cst_39 = arith.constant dense<0xFF800000> : vector<2x128xf32>
    %69 = vector.multi_reduction <maximumf>, %68, %cst_39 [1] : vector<2x8x128xf32> to vector<2x128xf32>
    %cst_40 = arith.constant 0.000000e+00 : f32
    %70 = vector.broadcast %cst_40 : f32 to vector<2x8x128xf32>
    %c0_41 = arith.constant 0 : index
    %c0_42 = arith.constant 0 : index
    %c0_43 = arith.constant 0 : index
    %71 = vector.load %arg6[%c0_41, %c0_42, %c0_43] : memref<5x32x128xbf16, #tpu.memory_space<vmem>>, vector<1x32x128xbf16>
    %72 = vector.shape_cast %71 : vector<1x32x128xbf16> to vector<32x128xbf16>
    %cst_44 = arith.constant dense<0.000000e+00> : vector<16x128xf32>
    %73 = tpu.matmul %1, %72, %cst_44 {dimension_numbers = #tpu.dot_dimension_numbers<[1], [0], [0], [1], [0, 0, 1, 1], [], []>} : vector<16x32xbf16>, vector<32x128xbf16>, vector<16x128xf32> -> vector<16x128xf32>
    %74 = vector.shape_cast %73 : vector<16x128xf32> to vector<2x8x128xf32>
    %75 = arith.addf %70, %74 : vector<2x8x128xf32>
    %c1_45 = arith.constant 1 : index
    %c0_46 = arith.constant 0 : index
    %c0_47 = arith.constant 0 : index
    %76 = vector.load %arg6[%c1_45, %c0_46, %c0_47] : memref<5x32x128xbf16, #tpu.memory_space<vmem>>, vector<1x32x128xbf16>
    %77 = vector.shape_cast %76 : vector<1x32x128xbf16> to vector<32x128xbf16>
    %cst_48 = arith.constant dense<0.000000e+00> : vector<16x128xf32>
    %78 = tpu.matmul %1, %77, %cst_48 {dimension_numbers = #tpu.dot_dimension_numbers<[1], [0], [0], [1], [0, 0, 1, 1], [], []>} : vector<16x32xbf16>, vector<32x128xbf16>, vector<16x128xf32> -> vector<16x128xf32>
    %79 = vector.shape_cast %78 : vector<16x128xf32> to vector<2x8x128xf32>
    %c7_i32_49 = arith.constant 7 : i32
    %80 = tpu.dynamic_rotate %79 by %c7_i32_49 dim 1 : vector<2x8x128xf32>, i32 -> vector<2x8x128xf32>
    %81 = arith.addf %75, %80 : vector<2x8x128xf32>
    %c2_50 = arith.constant 2 : index
    %c0_51 = arith.constant 0 : index
    %c0_52 = arith.constant 0 : index
    %82 = vector.load %arg6[%c2_50, %c0_51, %c0_52] : memref<5x32x128xbf16, #tpu.memory_space<vmem>>, vector<1x32x128xbf16>
    %83 = vector.shape_cast %82 : vector<1x32x128xbf16> to vector<32x128xbf16>
    %cst_53 = arith.constant dense<0.000000e+00> : vector<16x128xf32>
    %84 = tpu.matmul %1, %83, %cst_53 {dimension_numbers = #tpu.dot_dimension_numbers<[1], [0], [0], [1], [0, 0, 1, 1], [], []>} : vector<16x32xbf16>, vector<32x128xbf16>, vector<16x128xf32> -> vector<16x128xf32>
    %85 = vector.shape_cast %84 : vector<16x128xf32> to vector<2x8x128xf32>
    %c6_i32_54 = arith.constant 6 : i32
    %86 = tpu.dynamic_rotate %85 by %c6_i32_54 dim 1 : vector<2x8x128xf32>, i32 -> vector<2x8x128xf32>
    %87 = arith.addf %81, %86 : vector<2x8x128xf32>
    %c3_55 = arith.constant 3 : index
    %c0_56 = arith.constant 0 : index
    %c0_57 = arith.constant 0 : index
    %88 = vector.load %arg6[%c3_55, %c0_56, %c0_57] : memref<5x32x128xbf16, #tpu.memory_space<vmem>>, vector<1x32x128xbf16>
    %89 = vector.shape_cast %88 : vector<1x32x128xbf16> to vector<32x128xbf16>
    %cst_58 = arith.constant dense<0.000000e+00> : vector<16x128xf32>
    %90 = tpu.matmul %1, %89, %cst_58 {dimension_numbers = #tpu.dot_dimension_numbers<[1], [0], [0], [1], [0, 0, 1, 1], [], []>} : vector<16x32xbf16>, vector<32x128xbf16>, vector<16x128xf32> -> vector<16x128xf32>
    %91 = vector.shape_cast %90 : vector<16x128xf32> to vector<2x8x128xf32>
    %c5_i32_59 = arith.constant 5 : i32
    %92 = tpu.dynamic_rotate %91 by %c5_i32_59 dim 1 : vector<2x8x128xf32>, i32 -> vector<2x8x128xf32>
    %93 = arith.addf %87, %92 : vector<2x8x128xf32>
    %c4 = arith.constant 4 : index
    %c0_60 = arith.constant 0 : index
    %c0_61 = arith.constant 0 : index
    %94 = vector.load %arg6[%c4, %c0_60, %c0_61] : memref<5x32x128xbf16, #tpu.memory_space<vmem>>, vector<1x32x128xbf16>
    %95 = vector.shape_cast %94 : vector<1x32x128xbf16> to vector<32x128xbf16>
    %cst_62 = arith.constant dense<0.000000e+00> : vector<16x128xf32>
    %96 = tpu.matmul %1, %95, %cst_62 {dimension_numbers = #tpu.dot_dimension_numbers<[1], [0], [0], [1], [0, 0, 1, 1], [], []>} : vector<16x32xbf16>, vector<32x128xbf16>, vector<16x128xf32> -> vector<16x128xf32>
    %97 = vector.shape_cast %96 : vector<16x128xf32> to vector<2x8x128xf32>
    %c4_i32 = arith.constant 4 : i32
    %98 = tpu.dynamic_rotate %97 by %c4_i32 dim 1 : vector<2x8x128xf32>, i32 -> vector<2x8x128xf32>
    %99 = arith.addf %93, %98 : vector<2x8x128xf32>
    %c0_63 = arith.constant 0 : index
    %c0_64 = arith.constant 0 : index
    %100 = vector.load %arg7[%c0_63, %c0_64] : memref<1x128xf32, #tpu.memory_space<vmem>>, vector<1x128xf32>
    %101 = vector.shape_cast %100 : vector<1x128xf32> to vector<1x1x128xf32>
    %102 = vector.broadcast %101 : vector<1x1x128xf32> to vector<2x8x128xf32>
    %103 = arith.addf %99, %102 : vector<2x8x128xf32>
    %104 = math.tanh %103 : vector<2x8x128xf32>
    %105 = tpu.iota {dimensions = array<i32: 0>} : vector<8x128xi32>
    %c4_i32_65 = arith.constant 4 : i32
    %106 = vector.broadcast %c4_i32_65 : i32 to vector<8x128xi32>
    %107 = arith.cmpi slt, %105, %106 : vector<8x128xi32>
    %cst_66 = arith.constant -2.000000e+00 : f32
    %108 = vector.shape_cast %107 : vector<8x128xi1> to vector<1x8x128xi1>
    %109 = vector.broadcast %108 : vector<1x8x128xi1> to vector<2x8x128xi1>
    %110 = vector.broadcast %cst_66 : f32 to vector<2x8x128xf32>
    %111 = arith.select %109, %104, %110 : vector<2x8x128xi1>, vector<2x8x128xf32>
    %cst_67 = arith.constant dense<0xFF800000> : vector<2x128xf32>
    %112 = vector.multi_reduction <maximumf>, %111, %cst_67 [1] : vector<2x8x128xf32> to vector<2x128xf32>
    %113 = tpu.concatenate %32, %69, %112 in 1 : vector<2x128xf32>, vector<2x128xf32>, vector<2x128xf32> -> vector<2x384xf32>
    %114 = arith.truncf %113 : vector<2x384xf32> to vector<2x384xbf16>
    %c0_68 = arith.constant 0 : index
    %c0_69 = arith.constant 0 : index
    %115 = vector.load %arg8[%c0_68, %c0_69] : memref<384x128xbf16, #tpu.memory_space<vmem>>, vector<384x128xbf16>
    %cst_70 = arith.constant dense<0.000000e+00> : vector<2x128xf32>
    %116 = tpu.matmul %114, %115, %cst_70 {dimension_numbers = #tpu.dot_dimension_numbers<[1], [0], [0], [1], [0, 0, 1, 1], [], []>} : vector<2x384xbf16>, vector<384x128xbf16>, vector<2x128xf32> -> vector<2x128xf32>
    %c0_71 = arith.constant 0 : index
    %c0_72 = arith.constant 0 : index
    %117 = vector.load %arg9[%c0_71, %c0_72] : memref<1x128xf32, #tpu.memory_space<vmem>>, vector<1x128xf32>
    %118 = vector.broadcast %117 : vector<1x128xf32> to vector<2x128xf32>
    %119 = arith.addf %116, %118 : vector<2x128xf32>
    %c0_73 = arith.constant 0 : index
    %c0_74 = arith.constant 0 : index
    %120 = vector.load %arg10[%c0_73, %c0_74] : memref<2x128xf32, #tpu.memory_space<vmem>>, vector<2x128xf32>
    tpu.vector_store %arg10[%c0_73, %c0_74], %119 {strides = array<i32>} : memref<2x128xf32, #tpu.memory_space<vmem>>, vector<2x128xf32>,
    return
  }
  func.func @transform_0(%arg0: i32) -> (i32, i32, i32) {
    %c0_i32 = arith.constant 0 : i32
    %c0_i32_0 = arith.constant 0 : i32
    %c0_i32_1 = arith.constant 0 : i32
    return %arg0, %c0_i32, %c0_i32_0 : i32, i32, i32
  }
  func.func @transform_1(%arg0: i32) -> (i32, i32, i32) {
    %c0_i32 = arith.constant 0 : i32
    %c0_i32_0 = arith.constant 0 : i32
    %c0_i32_1 = arith.constant 0 : i32
    %c0_i32_2 = arith.constant 0 : i32
    return %c0_i32, %c0_i32_0, %c0_i32_1 : i32, i32, i32
  }
  func.func @transform_2(%arg0: i32) -> (i32, i32) {
    %c0_i32 = arith.constant 0 : i32
    %c0_i32_0 = arith.constant 0 : i32
    %c0_i32_1 = arith.constant 0 : i32
    return %c0_i32, %c0_i32_0 : i32, i32
  }
  func.func @transform_3(%arg0: i32) -> (i32, i32, i32) {
    %c0_i32 = arith.constant 0 : i32
    %c0_i32_0 = arith.constant 0 : i32
    %c0_i32_1 = arith.constant 0 : i32
    %c0_i32_2 = arith.constant 0 : i32
    return %c0_i32, %c0_i32_0, %c0_i32_1 : i32, i32, i32
  }
  func.func @transform_4(%arg0: i32) -> (i32, i32) {
    %c0_i32 = arith.constant 0 : i32
    %c0_i32_0 = arith.constant 0 : i32
    %c0_i32_1 = arith.constant 0 : i32
    return %c0_i32, %c0_i32_0 : i32, i32
  }
  func.func @transform_5(%arg0: i32) -> (i32, i32, i32) {
    %c0_i32 = arith.constant 0 : i32
    %c0_i32_0 = arith.constant 0 : i32
    %c0_i32_1 = arith.constant 0 : i32
    %c0_i32_2 = arith.constant 0 : i32
    return %c0_i32, %c0_i32_0, %c0_i32_1 : i32, i32, i32
  }
  func.func @transform_6(%arg0: i32) -> (i32, i32) {
    %c0_i32 = arith.constant 0 : i32
    %c0_i32_0 = arith.constant 0 : i32
    %c0_i32_1 = arith.constant 0 : i32
    return %c0_i32, %c0_i32_0 : i32, i32
  }
  func.func @transform_7(%arg0: i32) -> (i32, i32) {
    %c0_i32 = arith.constant 0 : i32
    %c0_i32_0 = arith.constant 0 : i32
    %c0_i32_1 = arith.constant 0 : i32
    return %c0_i32, %c0_i32_0 : i32, i32
  }
  func.func @transform_8(%arg0: i32) -> (i32, i32) {
    %c0_i32 = arith.constant 0 : i32
    %c0_i32_0 = arith.constant 0 : i32
    %c0_i32_1 = arith.constant 0 : i32
    return %c0_i32, %c0_i32_0 : i32, i32
  }
  func.func @transform_9(%arg0: i32) -> (i32, i32) {
    %c0_i32 = arith.constant 0 : i32
    %c0_i32_0 = arith.constant 0 : i32
    return %arg0, %c0_i32 : i32, i32
  }
}

</mosaic_0001>

<bundles_post_ra>
// kernel: model_forward.12
= control target key start
LH: loop header
LB: loop body
LE: loop exit
PB: predicated region body
PF: predicated region fallthrough
CT: control target
= control target key end

     0   :  { %vm19_vm0 = vcmask 261120   ;;  %s181_s0 = inlined_call_operand.vmem [shape: bf16[16,32], index: 0, kind: input, shape index: {}]   ;;  %s182_s1 = inlined_call_operand.vmem [shape: f32[1,32], index: 1, kind: input, shape index: {}]   ;;  %s183_s2 = inlined_call_operand.vmem [shape: f32[1,32], index: 2, kind: input, shape index: {}]   ;;  %s184_s3 = inlined_call_operand.hbm [shape: bf16[16,32], index: 3, kind: output, shape index: {}]  }
   0x1   :  { %v99_v0 = vld [vmem:[%s181_s0] sm:$0xff]  }
   0x2   :  { %8 = vsyncpa [#allocation3], 0  ;;  %v100_v1 = vunpack.c.l.bf16 %v99_v0  ;;  %v101_v2 = vunpack.c.h.bf16 %v99_v0  ;;  %v92_v22 = vld [vmem:[%s182_s1] ss:$0 sm:$0xff]  ;;  %vm73_vm1 = vcmask 257024   ;;  %s133_s17 = smov [#allocation2]  }
   0x3   :  { %v93_v24 = vld [vmem:[%s183_s2] ss:$0 sm:$0xff]  ;;  %s81_s18 = sshll.u32 %s133_s17, 4  ;;  %s82_s18 = int_to_ptr.vmem [resolvable:$true] %s81_s18 }
   0x4   :  { %v20_v3 = vsel %vm19_vm0, %v100_v1, 0.0  ;;  %v23_v4 = vsel %vm19_vm0, %v101_v2, 0.0  ;;  %s109_s1 = scalar_lea.vmem %s82_s18, 128  ;;  %p114_p1 = scmp.lt.s32.totalorder %s82_s18, %s82_s18 }
   0x5   :  { %21 = vadd.xlane.f32.xlu0 %v20_v3  ;;  %p110_p0 = scmp.ne.s32.totalorder %s82_s18, %s109_s1  ;;  %p115_p2 = scmp.lt.s32.totalorder %s109_s1, %s109_s1 }
   0x7   :  { %p116_p3 = por %p115_p2, %p114_p1 }
   0x9   :  { %24 = vadd.xlane.f32.xlu0 %v23_v4  ;;  %p117_p4 = pnand %p116_p3, %p110_p0 }
  0x92   :  { %v22_v5 = vpop.xlane.xlu0 %21 }
  0x93   :  { %v27_v6 = vmul.f32 0.03125, %v22_v5 }
  0x95   :  { %v29_v7 = vsub.f32 %v100_v1, %v27_v6 }
  0x96   :  { %v25_v8 = vpop.xlane.xlu0 %24 }
  0x97   :  { %v28_v9 = vmul.f32 0.03125, %v25_v8  ;;  %v31_v10 = vmul.f32 %v29_v7, %v29_v7 }
  0x99   :  { %v30_v11 = vsub.f32 %v101_v2, %v28_v9  ;;  %v33_v12 = vsel %vm19_vm0, %v31_v10, 0.0 }
  0x9a   :  { %34 = vadd.xlane.f32.xlu1 %v33_v12 }
  0x9b   :  { %v32_v13 = vmul.f32 %v30_v11, %v30_v11 }
  0x9d   :  { %v36_v14 = vsel %vm19_vm0, %v32_v13, 0.0 }
  0x9e   :  { %37 = vadd.xlane.f32.xlu1 %v36_v14 }
 0x127   :  { %v35_v15 = vpop.xlane.xlu1 %34 }
 0x128   :  { %v39_v16 = vmul.f32 0.03125, %v35_v15 }
 0x12a   :  { %v41_v17 = vadd.f32 1e-12, %v39_v16 }
 0x12b   :  { %v38_v18 = vpop.xlane.xlu1 %37 }
 0x12c   :  { %105 = vrsqrt.f32 %v41_v17  ;;  %v40_v19 = vmul.f32 0.03125, %v38_v18 }
 0x12e   :  { %v42_v20 = vadd.f32 1e-12, %v40_v19 }
 0x130   :  { %107 = vrsqrt.f32 %v42_v20 }
 0x136   :  { %v106_v21 = vpop.eup %105 }
 0x137   :  { %v45_v23 = vmul.f32 %v106_v21, %v29_v7 }
 0x139   :  { %v54_v25 = vmul.f32 %v92_v22, %v45_v23 }
 0x13a   :  { %v108_v26 = vpop.eup %107 }
 0x13b   :  { %v46_v27 = vmul.f32 %v108_v26, %v30_v11  ;;  %v63_v28 = vadd.f32 %v93_v24, %v54_v25 }
 0x13d   :  { %v55_v29 = vmul.f32 %v92_v22, %v46_v27  ;;  %v96_v30 = vpack.c.bf16 %v63_v28, %v63_v28 }
 0x13f   :  { %v64_v31 = vadd.f32 %v93_v24, %v55_v29  ;;  %74 = vst.msk [vmem:[#allocation2] sm:$0xf] %vm73_vm1, %v96_v30 }
 0x141   :  { %v97_v32 = vpack.c.bf16 %v64_v31, %v64_v31 }
 0x143   :  { %75 = vst.msk [vmem:[#allocation2 + $0x4] sm:$0xf] %vm73_vm1, %v97_v32 }
 0x144   :  { %120 = shalt.err (!%p117_p4)
}
 0x145   :  { %s121_s20 = scalar_lea.hbm %s184_s3, 128 }
 0x146   :  { %p122_p5 = scmp.ne.s32.totalorder %s184_s3, %s121_s20  ;;  %p125_p6 = scmp.lt.u32.totalorder %s121_s20, %s184_s3 }
 0x148   :  { %p127_p7 = pnand %p125_p6, %p122_p5 }
 0x14a   :  { %130 = shalt.err (!%p127_p7)
}
 0x14b   :  { %s134_s25 = smov 64   ;;  %s135_s26 = smov 4  }
 0x14c   :  { %87 = dma.vmem_to_hbm [thread:$0]  %s82_s18, 128, %s184_s3, [#allocation3], %s134_s25, %s134_s25, %s135_s26  }
 0x14d   :  { %131 = dma.done.wait [#allocation3], 128  }
 0x14e   :  { %132 = vsyncadd [#allocation3], 4294967168 }
 0x14f   :  { %91 = vsyncpa [#allocation3], 1 }

// kernel: model_forward.13
= control target key start
LH: loop header
LB: loop body
LE: loop exit
PB: predicated region body
PF: predicated region fallthrough
CT: control target
= control target key end

     0   :  { %8 = vsyncpa [#allocation4], 0  ;;  %s401_s0 = inlined_call_operand.hbm [shape: bf16[16,32], index: 0, kind: input, shape index: {}]   ;;  %s402_s1 = inlined_call_operand.hbm [shape: bf16[32,96], index: 1, kind: input, shape index: {}]   ;;  %s403_s2 = inlined_call_operand.hbm [shape: f32[1,96], index: 2, kind: input, shape index: {}]   ;;  %s404_s3 = inlined_call_operand.hbm [shape: bf16[16,96], index: 3, kind: output, shape index: {}]  }
   0x1   :  { %9 = vsyncpa [#allocation7], 0 }
   0x2   :  { %10 = vsyncpa [#allocation5], 0  ;;  %s305_s12 = smov [#allocation6]   ;;  %s306_s14 = smov [#allocation3]  }
   0x3   :  { %s28_s13 = sshll.u32 %s305_s12, 4  ;;  %s16_s15 = sshll.u32 %s306_s14, 4  ;;  %s29_s13 = int_to_ptr.vmem [resolvable:$true] %s28_s13  ;;  %s333_s15 = int_to_ptr.vmem [resolvable:$true] %s16_s15 }
   0x4   :  { %s211_s18 = scalar_lea.hbm %s402_s1, 256 }
   0x5   :  { %p212_p0 = scmp.ne.s32.totalorder %s402_s1, %s211_s18  ;;  %p215_p1 = scmp.lt.u32.totalorder %s211_s18, %s402_s1 }
   0x7   :  { %p217_p2 = pnand %p215_p1, %p212_p0 }
   0x9   :  { %220 = shalt.err (!%p217_p2)
}
   0xa   :  { %s221_s23 = scalar_lea.vmem %s29_s13, 256  ;;  %p226_p4 = scmp.lt.s32.totalorder %s29_s13, %s29_s13 }
   0xb   :  { %p222_p3 = scmp.ne.s32.totalorder %s29_s13, %s221_s23  ;;  %p227_p5 = scmp.lt.s32.totalorder %s221_s23, %s221_s23 }
   0xd   :  { %p228_p6 = por %p227_p5, %p226_p4 }
   0xf   :  { %p229_p7 = pnand %p228_p6, %p222_p3 }
  0x11   :  { %232 = shalt.err (!%p229_p7)
}
  0x12   :  { %s307_s24 = smov 64   ;;  %s308_s25 = smov 4  }
  0x13   :  { %34 = dma.hbm_to_vmem [thread:$0]  %s402_s1, 256, %s29_s13, [#allocation7], %s307_s24, %s307_s24, %s308_s25  }
  0x14   :  { %s233_s30 = scalar_lea.hbm %s401_s0, 128 }
  0x15   :  { %p234_p8 = scmp.ne.s32.totalorder %s401_s0, %s233_s30  ;;  %p237_p9 = scmp.lt.u32.totalorder %s233_s30, %s401_s0 }
  0x17   :  { %p239_p10 = pnand %p237_p9, %p234_p8 }
  0x19   :  { %242 = shalt.err (!%p239_p10)
}
  0x1a   :  { %s243_s8 = scalar_lea.vmem %s333_s15, 128  ;;  %p248_p12 = scmp.lt.s32.totalorder %s333_s15, %s333_s15 }
  0x1b   :  { %p244_p11 = scmp.ne.s32.totalorder %s333_s15, %s243_s8  ;;  %p249_p13 = scmp.lt.s32.totalorder %s243_s8, %s243_s8 }
  0x1d   :  { %p250_p0 = por %p249_p13, %p248_p12 }
  0x1f   :  { %p251_p1 = pnand %p250_p0, %p244_p11 }
  0x21   :  { %254 = shalt.err (!%p251_p1)
}
  0x22   :  { %22 = dma.hbm_to_vmem [thread:$0]  %s401_s0, 128, %s333_s15, [#allocation4], %s307_s24, %s307_s24, %s308_s25  }
  0x23   :  { %s309_s10 = smov [#allocation8]   ;;  %s255_s14 = scalar_lea.hbm %s403_s2, 16 }
  0x24   :  { %s41_s11 = sshll.u32 %s309_s10, 4  ;;  %p256_p2 = scmp.ne.s32.totalorder %s403_s2, %s255_s14  ;;  %s42_s11 = int_to_ptr.vmem [resolvable:$true] %s41_s11 }
  0x25   :  { %p259_p3 = scmp.lt.u32.totalorder %s255_s14, %s403_s2 }
  0x27   :  { %p261_p4 = pnand %p259_p3, %p256_p2 }
  0x29   :  { %264 = shalt.err (!%p261_p4)
}
  0x2a   :  { %s265_s20 = scalar_lea.vmem %s42_s11, 16  ;;  %s269_s0 = scalar_lea.vmem %s42_s11, 32 }
  0x2b   :  { %p266_p5 = scmp.ne.s32.totalorder %s42_s11, %s265_s20  ;;  %p270_p6 = scmp.lt.s32.totalorder %s42_s11, %s42_s11 }
  0x2c   :  { %p271_p7 = scmp.lt.s32.totalorder %s269_s0, %s265_s20 }
  0x2e   :  { %p272_p8 = por %p271_p7, %p270_p6 }
  0x30   :  { %p273_p9 = pnand %p272_p8, %p266_p5 }
  0x32   :  { %276 = shalt.err (!%p273_p9)
}
  0x33   :  { %44 = dma.hbm_to_vmem [thread:$0]  %s403_s2, 16, %s42_s11, [#allocation7]  }
  0x34   :  { %299 = dma.done.wait [#allocation4], 128  }
  0x35   :  { %300 = vsyncadd [#allocation4], 4294967168 }
  0x36   :  { %301 = dma.done.wait [#allocation7], 272  }
  0x37   :  { %302 = vsyncadd [#allocation7], 4294967024  ;;  %vm59_vm0 = vcmask 785408   ;;  %v310_v0 = vmov 0.0   ;;  %vm311_vm1 = vmmov 0   ;;  %v208_v1 = vld [vmem:[#allocation6] sm:$0xff]  }
  0x38   :  { %60 = vst.msk [vmem:[#allocation2] sm:$0xff] %vm59_vm0, %v310_v0  ;;  %61 = vst.msk [vmem:[#allocation2 + $0x8] sm:$0xff] %vm59_vm0, %v310_v0  ;;  %192 = vmatprep.subr.bf16.mxu0 %v310_v0  ;;  %196 = vmatprep.mubr.msk.bf16.mxu0 %vm311_vm1, %v310_v0  ;;  %v209_v2 = vld [vmem:[#allocation6 + $0x8] sm:$0xff]   ;;  %v210_v3 = vld [vmem:[#allocation3] sm:$0xff]   ;;  %vm87_vm2 = vcmask 261120   ;;  %vm159_vm3 = vcmask 781312  }
  0x39   :  { %193 = vmatpush3.bf16.msra.mxu0 %v208_v1  ;;  %v184_v12 = vld [vmem:[#allocation8] ss:$0 sm:$0xff]  ;;  %s312_s2 = smov [#allocation9]  }
  0x3a   :  { %194 = vmatprep.subr.bf16.mxu0 %v310_v0  ;;  %s167_s22 = sshll.u32 %s312_s2, 4  ;;  %s168_s22 = int_to_ptr.vmem [resolvable:$true] %s167_s22 }
  0x3b   :  { %s277_s23 = scalar_lea.vmem %s168_s22, 128  ;;  %p282_p11 = scmp.lt.s32.totalorder %s168_s22, %s168_s22 }
  0x3c   :  { %p278_p10 = scmp.ne.s32.totalorder %s168_s22, %s277_s23  ;;  %p283_p12 = scmp.lt.s32.totalorder %s277_s23, %s277_s23 }
  0x3d   :  { %195 = vmatpush3.bf16.msra.mxu0 %v209_v2 }
  0x3e   :  { %p284_p13 = por %p283_p12, %p282_p11 }
  0x3f   :  { %v62_v4 = vld [vmem:[#allocation2] sm:$0xff]  ;;  %v63_v6 = vld [vmem:[#allocation2 + $0x8] sm:$0xff] }
  0x40   :  { %197 = vmatmul.mubr.msk.bf16.vlgmr.msra.gmra.mrb[0].mxu0 %vm87_vm2, %v210_v3  ;;  %p285_p0 = pnand %p284_p13, %p278_p10 }
 0x113   :  { %v125_v5 = vpop.f32.mrb[0].mxu0 }
 0x114   :  { %v132_v7 = vadd.f32 %v125_v5, %v62_v4  ;;  %v198_v8 = vpop.f32.mrb[1].mxu0 }
 0x115   :  { %v128_v9 = vpop.f32.mrb[2].mxu0 }
 0x116   :  { %135 = vst.msk [vmem:[#allocation2] sm:$0xff] %vm59_vm0, %v132_v7  ;;  %v133_v10 = vadd.f32 %v128_v9, %v63_v6  ;;  %v199_v11 = vpop.f32.mrb[3].mxu0 }
 0x118   :  { %136 = vst.msk [vmem:[#allocation2 + $0x8] sm:$0xff] %vm59_vm0, %v133_v10 }
 0x11d   :  { %v140_v13 = vld [vmem:[#allocation2] sm:$0xff] }
 0x11e   :  { %v149_v14 = vadd.f32 %v184_v12, %v140_v13 }
 0x11f   :  { %v141_v15 = vld [vmem:[#allocation2 + $0x8] sm:$0xff] }
 0x120   :  { %v150_v16 = vadd.f32 %v184_v12, %v141_v15  ;;  %v187_v17 = vpack.c.bf16 %v149_v14, %v149_v14 }
 0x122   :  { %v188_v18 = vpack.c.bf16 %v150_v16, %v150_v16  ;;  %160 = vst.msk [vmem:[#allocation9] sm:$0xf] %vm159_vm3, %v187_v17 }
 0x124   :  { %161 = vst.msk [vmem:[#allocation9 + $0x4] sm:$0xf] %vm159_vm3, %v188_v18 }
 0x125   :  { %288 = shalt.err (!%p285_p0)
}
 0x126   :  { %s289_s28 = scalar_lea.hbm %s404_s3, 128 }
 0x127   :  { %p290_p1 = scmp.ne.s32.totalorder %s404_s3, %s289_s28  ;;  %p293_p2 = scmp.lt.u32.totalorder %s289_s28, %s404_s3 }
 0x129   :  { %p295_p3 = pnand %p293_p2, %p290_p1 }
 0x12b   :  { %298 = shalt.err (!%p295_p3)
}
 0x12c   :  { %173 = dma.vmem_to_hbm [thread:$0]  %s168_s22, 128, %s404_s3, [#allocation5], %s307_s24, %s307_s24, %s308_s25  }
 0x12d   :  { %303 = dma.done.wait [#allocation5], 128  }
 0x12e   :  { %304 = vsyncadd [#allocation5], 4294967168 }
 0x12f   :  { %177 = vsyncpa [#allocation4], 1 }
 0x130   :  { %178 = vsyncpa [#allocation7], 1 }
 0x131   :  { %179 = vsyncpa [#allocation5], 1 }

// kernel: model_forward.15
= control target key start
LH: loop header
LB: loop body
LE: loop exit
PB: predicated region body
PF: predicated region fallthrough
CT: control target
= control target key end

     0   :  { %11 = vsyncpa [#allocation4], 0  ;;  %s644_s0 = inlined_call_operand.hbm [shape: bf16[16,32], index: 0, kind: input, shape index: {}]   ;;  %s645_s1 = inlined_call_operand.hbm [shape: bf16[32,32], index: 1, kind: input, shape index: {}]   ;;  %s646_s2 = inlined_call_operand.hbm [shape: f32[1,32], index: 2, kind: input, shape index: {}]   ;;  %s647_s3 = inlined_call_operand.hbm [shape: bf16[16,32], index: 3, kind: input, shape index: {}]   ;;  %s648_s4 = inlined_call_operand.hbm [shape: f32[1,32], index: 4, kind: input, shape index: {}]   ;;  %s649_s5 = inlined_call_operand.hbm [shape: f32[1,32], index: 5, kind: input, shape index: {}]   ;;  %s650_s6 = inlined_call_operand.hbm [shape: bf16[16,32], index: 6, kind: output, shape index: {}]  }
   0x1   :  { %12 = vsyncpa [#allocation7], 0 }
   0x2   :  { %13 = vsyncpa [#allocation10], 0 }
   0x3   :  { %14 = vsyncpa [#allocation13], 0 }
   0x4   :  { %15 = vsyncpa [#allocation5], 0  ;;  %s486_s21 = smov [#allocation6]   ;;  %s487_s23 = smov [#allocation9]  }
   0x5   :  { %s33_s22 = sshll.u32 %s486_s21, 4  ;;  %s55_s24 = sshll.u32 %s487_s23, 4  ;;  %s34_s22 = int_to_ptr.vmem [resolvable:$true] %s33_s22  ;;  %s532_s24 = int_to_ptr.vmem [resolvable:$true] %s55_s24 }
   0x6   :  { %s322_s27 = scalar_lea.hbm %s645_s1, 256 }
   0x7   :  { %p323_p0 = scmp.ne.s32.totalorder %s645_s1, %s322_s27  ;;  %p326_p1 = scmp.lt.u32.totalorder %s322_s27, %s645_s1 }
   0x9   :  { %p328_p2 = pnand %p326_p1, %p323_p0 }
   0xb   :  { %331 = shalt.err (!%p328_p2)
}
   0xc   :  { %s332_s8 = scalar_lea.vmem %s34_s22, 256  ;;  %p337_p4 = scmp.lt.s32.totalorder %s34_s22, %s34_s22 }
   0xd   :  { %p333_p3 = scmp.ne.s32.totalorder %s34_s22, %s332_s8  ;;  %p338_p5 = scmp.lt.s32.totalorder %s332_s8, %s332_s8 }
   0xf   :  { %p339_p6 = por %p338_p5, %p337_p4 }
  0x11   :  { %p340_p7 = pnand %p339_p6, %p333_p3 }
  0x13   :  { %343 = shalt.err (!%p340_p7)
}
  0x14   :  { %s488_s9 = smov 64   ;;  %s489_s10 = smov 4  }
  0x15   :  { %39 = dma.hbm_to_vmem [thread:$0]  %s645_s1, 256, %s34_s22, [#allocation7], %s488_s9, %s488_s9, %s489_s10  }
  0x16   :  { %s344_s15 = scalar_lea.hbm %s647_s3, 128 }
  0x17   :  { %p345_p8 = scmp.ne.s32.totalorder %s647_s3, %s344_s15  ;;  %p348_p9 = scmp.lt.u32.totalorder %s344_s15, %s647_s3 }
  0x19   :  { %p350_p10 = pnand %p348_p9, %p345_p8 }
  0x1b   :  { %353 = shalt.err (!%p350_p10)
}
  0x1c   :  { %s354_s20 = scalar_lea.vmem %s532_s24, 128  ;;  %p359_p12 = scmp.lt.s32.totalorder %s532_s24, %s532_s24 }
  0x1d   :  { %p355_p11 = scmp.ne.s32.totalorder %s532_s24, %s354_s20  ;;  %p360_p13 = scmp.lt.s32.totalorder %s354_s20, %s354_s20 }
  0x1f   :  { %p361_p0 = por %p360_p13, %p359_p12 }
  0x21   :  { %p362_p1 = pnand %p361_p0, %p355_p11 }
  0x23   :  { %365 = shalt.err (!%p362_p1)
}
  0x24   :  { %61 = dma.hbm_to_vmem [thread:$0]  %s647_s3, 128, %s532_s24, [#allocation10], %s488_s9, %s488_s9, %s489_s10  }
  0x25   :  { %s490_s22 = smov [#allocation3]   ;;  %s491_s25 = smov [#allocation8]  }
  0x26   :  { %s21_s23 = sshll.u32 %s490_s22, 4  ;;  %s46_s26 = sshll.u32 %s491_s25, 4  ;;  %s22_s23 = int_to_ptr.vmem [resolvable:$true] %s21_s23  ;;  %s47_s26 = int_to_ptr.vmem [resolvable:$true] %s46_s26 }
  0x27   :  { %s366_s29 = scalar_lea.hbm %s644_s0, 128 }
  0x28   :  { %p367_p2 = scmp.ne.s32.totalorder %s644_s0, %s366_s29  ;;  %p370_p3 = scmp.lt.u32.totalorder %s366_s29, %s644_s0 }
  0x2a   :  { %p372_p4 = pnand %p370_p3, %p367_p2 }
  0x2c   :  { %375 = shalt.err (!%p372_p4)
}
  0x2d   :  { %s376_s3 = scalar_lea.vmem %s22_s23, 128  ;;  %p381_p6 = scmp.lt.s32.totalorder %s22_s23, %s22_s23 }
  0x2e   :  { %p377_p5 = scmp.ne.s32.totalorder %s22_s23, %s376_s3  ;;  %p382_p7 = scmp.lt.s32.totalorder %s376_s3, %s376_s3 }
  0x30   :  { %p383_p8 = por %p382_p7, %p381_p6 }
  0x32   :  { %p384_p9 = pnand %p383_p8, %p377_p5 }
  0x34   :  { %387 = shalt.err (!%p384_p9)
}
  0x35   :  { %27 = dma.hbm_to_vmem [thread:$0]  %s644_s0, 128, %s22_s23, [#allocation4], %s488_s9, %s488_s9, %s489_s10  }
  0x36   :  { %s388_s15 = scalar_lea.hbm %s646_s2, 16 }
  0x37   :  { %p389_p10 = scmp.ne.s32.totalorder %s646_s2, %s388_s15  ;;  %p392_p11 = scmp.lt.u32.totalorder %s388_s15, %s646_s2 }
  0x39   :  { %p394_p12 = pnand %p392_p11, %p389_p10 }
  0x3b   :  { %397 = shalt.err (!%p394_p12)
}
  0x3c   :  { %s398_s20 = scalar_lea.vmem %s47_s26, 16  ;;  %s402_s1 = scalar_lea.vmem %s47_s26, 32 }
  0x3d   :  { %p399_p13 = scmp.ne.s32.totalorder %s47_s26, %s398_s20  ;;  %p403_p0 = scmp.lt.s32.totalorder %s47_s26, %s47_s26 }
  0x3e   :  { %p404_p1 = scmp.lt.s32.totalorder %s402_s1, %s398_s20 }
  0x40   :  { %p405_p2 = por %p404_p1, %p403_p0 }
  0x42   :  { %p406_p3 = pnand %p405_p2, %p399_p13 }
  0x44   :  { %409 = shalt.err (!%p406_p3)
}
  0x45   :  { %49 = dma.hbm_to_vmem [thread:$0]  %s646_s2, 16, %s47_s26, [#allocation7]  }
  0x46   :  { %s492_s22 = smov [#allocation11]   ;;  %s493_s25 = smov [#allocation12]  }
  0x47   :  { %s68_s23 = sshll.u32 %s492_s22, 4  ;;  %s78_s27 = sshll.u32 %s493_s25, 4  ;;  %s69_s23 = int_to_ptr.vmem [resolvable:$true] %s68_s23  ;;  %s79_s27 = int_to_ptr.vmem [resolvable:$true] %s78_s27 }
  0x48   :  { %s410_s30 = scalar_lea.hbm %s648_s4, 16 }
  0x49   :  { %p411_p4 = scmp.ne.s32.totalorder %s648_s4, %s410_s30  ;;  %p414_p5 = scmp.lt.u32.totalorder %s410_s30, %s648_s4 }
  0x4b   :  { %p416_p6 = pnand %p414_p5, %p411_p4 }
  0x4d   :  { %419 = shalt.err (!%p416_p6)
}
  0x4e   :  { %s420_s2 = scalar_lea.vmem %s69_s23, 16  ;;  %s424_s26 = scalar_lea.vmem %s69_s23, 32 }
  0x4f   :  { %p421_p7 = scmp.ne.s32.totalorder %s69_s23, %s420_s2  ;;  %p425_p8 = scmp.lt.s32.totalorder %s69_s23, %s69_s23 }
  0x50   :  { %p426_p9 = scmp.lt.s32.totalorder %s424_s26, %s420_s2 }
  0x52   :  { %p427_p10 = por %p426_p9, %p425_p8 }
  0x54   :  { %p428_p11 = pnand %p427_p10, %p421_p7 }
  0x56   :  { %431 = shalt.err (!%p428_p11)
}
  0x57   :  { %71 = dma.hbm_to_vmem [thread:$0]  %s648_s4, 16, %s69_s23, [#allocation10]  }
  0x58   :  { %s432_s15 = scalar_lea.hbm %s649_s5, 16 }
  0x59   :  { %p433_p12 = scmp.ne.s32.totalorder %s649_s5, %s432_s15  ;;  %p436_p13 = scmp.lt.u32.totalorder %s432_s15, %s649_s5 }
  0x5b   :  { %p438_p0 = pnand %p436_p13, %p433_p12 }
  0x5d   :  { %441 = shalt.err (!%p438_p0)
}
  0x5e   :  { %s442_s20 = scalar_lea.vmem %s79_s27, 16  ;;  %s446_s1 = scalar_lea.vmem %s79_s27, 32 }
  0x5f   :  { %p443_p1 = scmp.ne.s32.totalorder %s79_s27, %s442_s20  ;;  %p447_p2 = scmp.lt.s32.totalorder %s79_s27, %s79_s27 }
  0x60   :  { %p448_p3 = scmp.lt.s32.totalorder %s446_s1, %s442_s20 }
  0x62   :  { %p449_p4 = por %p448_p3, %p447_p2 }
  0x64   :  { %p450_p5 = pnand %p449_p4, %p443_p1 }
  0x66   :  { %453 = shalt.err (!%p450_p5)
}
  0x67   :  { %81 = dma.hbm_to_vmem [thread:$0]  %s649_s5, 16, %s79_s27, [#allocation13]  }
  0x68   :  { %476 = dma.done.wait [#allocation4], 128  }
  0x69   :  { %477 = vsyncadd [#allocation4], 4294967168 }
  0x6a   :  { %478 = dma.done.wait [#allocation7], 272  }
  0x6b   :  { %479 = vsyncadd [#allocation7], 4294967024 }
  0x6c   :  { %480 = dma.done.wait [#allocation10], 144  }
  0x6d   :  { %481 = vsyncadd [#allocation10], 4294967152 }
  0x6e   :  { %482 = dma.done.wait [#allocation13], 16  }
  0x6f   :  { %483 = vsyncadd [#allocation13], 4294967280  ;;  %vm105_vm0 = vcmask 261120   ;;  %v494_v0 = vmov 0.0   ;;  %vm495_vm1 = vmmov 0   ;;  %v315_v1 = vld [vmem:[#allocation6] sm:$0xff]  }
  0x70   :  { %106 = vst.msk [vmem:[#allocation2] sm:$0xff] %vm105_vm0, %v494_v0  ;;  %107 = vst.msk [vmem:[#allocation2 + $0x8] sm:$0xff] %vm105_vm0, %v494_v0  ;;  %296 = vmatprep.subr.bf16.mxu0 %v494_v0  ;;  %300 = vmatprep.mubr.msk.bf16.mxu0 %vm495_vm1, %v494_v0  ;;  %v316_v2 = vld [vmem:[#allocation6 + $0x8] sm:$0xff]   ;;  %v317_v3 = vld [vmem:[#allocation3] sm:$0xff]   ;;  %vm255_vm2 = vcmask 257024   ;;  %s496_s5 = smov [#allocation14]  }
  0x71   :  { %297 = vmatpush3.bf16.msra.mxu0 %v315_v1  ;;  %v290_v12 = vld [vmem:[#allocation9] sm:$0xff]   ;;  %v282_v13 = vld [vmem:[#allocation8] ss:$0 sm:$0xff]  ;;  %v283_v41 = vld [vmem:[#allocation11] ss:$0 sm:$0xff]  ;;  %s263_s21 = sshll.u32 %s496_s5, 4  ;;  %s264_s21 = int_to_ptr.vmem [resolvable:$true] %s263_s21 }
  0x72   :  { %298 = vmatprep.subr.bf16.mxu0 %v494_v0  ;;  %v291_v14 = vunpack.c.l.bf16 %v290_v12  ;;  %v292_v17 = vunpack.c.h.bf16 %v290_v12  ;;  %v284_v43 = vld [vmem:[#allocation12] ss:$0 sm:$0xff]  ;;  %s454_s22 = scalar_lea.vmem %s264_s21, 128  ;;  %p459_p7 = scmp.lt.s32.totalorder %s264_s21, %s264_s21 }
  0x73   :  { %p455_p6 = scmp.ne.s32.totalorder %s264_s21, %s454_s22  ;;  %p460_p8 = scmp.lt.s32.totalorder %s454_s22, %s454_s22 }
  0x75   :  { %299 = vmatpush3.bf16.msra.mxu0 %v316_v2  ;;  %p461_p9 = por %p460_p8, %p459_p7 }
  0x77   :  { %v108_v4 = vld [vmem:[#allocation2] sm:$0xff]  ;;  %v109_v6 = vld [vmem:[#allocation2 + $0x8] sm:$0xff]  ;;  %p462_p10 = pnand %p461_p9, %p455_p6 }
  0x78   :  { %301 = vmatmul.mubr.msk.bf16.vlgmr.msra.gmra.mrb[0].mxu0 %vm105_vm0, %v317_v3 }
 0x14b   :  { %v171_v5 = vpop.f32.mrb[0].mxu0 }
 0x14c   :  { %v178_v7 = vadd.f32 %v171_v5, %v108_v4  ;;  %v302_v8 = vpop.f32.mrb[1].mxu0 }
 0x14d   :  { %v174_v9 = vpop.f32.mrb[2].mxu0 }
 0x14e   :  { %180 = vst.msk [vmem:[#allocation2] sm:$0xff] %vm105_vm0, %v178_v7  ;;  %v179_v10 = vadd.f32 %v174_v9, %v109_v6  ;;  %v303_v11 = vpop.f32.mrb[3].mxu0 }
 0x150   :  { %181 = vst.msk [vmem:[#allocation2 + $0x8] sm:$0xff] %vm105_vm0, %v179_v10 }
 0x155   :  { %v185_v15 = vld [vmem:[#allocation2] sm:$0xff] }
 0x156   :  { %v194_v16 = vadd.f32 %v282_v13, %v185_v15 }
 0x157   :  { %v186_v18 = vld [vmem:[#allocation2 + $0x8] sm:$0xff] }
 0x158   :  { %v200_v19 = vadd.f32 %v291_v14, %v194_v16  ;;  %v195_v20 = vadd.f32 %v282_v13, %v186_v18 }
 0x15a   :  { %v202_v21 = vsel %vm105_vm0, %v200_v19, 0.0  ;;  %v201_v22 = vadd.f32 %v292_v17, %v195_v20 }
 0x15b   :  { %203 = vadd.xlane.f32.xlu0 %v202_v21 }
 0x15c   :  { %v205_v23 = vsel %vm105_vm0, %v201_v22, 0.0 }
 0x15f   :  { %206 = vadd.xlane.f32.xlu0 %v205_v23 }
 0x1e8   :  { %v204_v24 = vpop.xlane.xlu0 %203 }
 0x1e9   :  { %v209_v25 = vmul.f32 0.03125, %v204_v24 }
 0x1eb   :  { %v211_v26 = vsub.f32 %v200_v19, %v209_v25 }
 0x1ec   :  { %v207_v27 = vpop.xlane.xlu0 %206 }
 0x1ed   :  { %v210_v28 = vmul.f32 0.03125, %v207_v27  ;;  %v213_v29 = vmul.f32 %v211_v26, %v211_v26 }
 0x1ef   :  { %v212_v30 = vsub.f32 %v201_v22, %v210_v28  ;;  %v215_v31 = vsel %vm105_vm0, %v213_v29, 0.0 }
 0x1f0   :  { %216 = vadd.xlane.f32.xlu1 %v215_v31 }
 0x1f1   :  { %v214_v32 = vmul.f32 %v212_v30, %v212_v30 }
 0x1f3   :  { %v218_v33 = vsel %vm105_vm0, %v214_v32, 0.0 }
 0x1f4   :  { %219 = vadd.xlane.f32.xlu1 %v218_v33 }
 0x27d   :  { %v217_v34 = vpop.xlane.xlu1 %216 }
 0x27e   :  { %v221_v35 = vmul.f32 0.03125, %v217_v34 }
 0x280   :  { %v223_v36 = vadd.f32 1e-12, %v221_v35 }
 0x281   :  { %v220_v37 = vpop.xlane.xlu1 %219 }
 0x282   :  { %318 = vrsqrt.f32 %v223_v36  ;;  %v222_v38 = vmul.f32 0.03125, %v220_v37 }
 0x284   :  { %v224_v39 = vadd.f32 1e-12, %v222_v38 }
 0x286   :  { %320 = vrsqrt.f32 %v224_v39 }
 0x28c   :  { %v319_v40 = vpop.eup %318 }
 0x28d   :  { %v227_v42 = vmul.f32 %v319_v40, %v211_v26 }
 0x28f   :  { %v236_v44 = vmul.f32 %v283_v41, %v227_v42 }
 0x290   :  { %v321_v45 = vpop.eup %320 }
 0x291   :  { %v228_v46 = vmul.f32 %v321_v45, %v212_v30  ;;  %v245_v47 = vadd.f32 %v284_v43, %v236_v44 }
 0x293   :  { %v237_v48 = vmul.f32 %v283_v41, %v228_v46  ;;  %v287_v49 = vpack.c.bf16 %v245_v47, %v245_v47 }
 0x295   :  { %v246_v50 = vadd.f32 %v284_v43, %v237_v48  ;;  %256 = vst.msk [vmem:[#allocation14] sm:$0xf] %vm255_vm2, %v287_v49 }
 0x297   :  { %v288_v51 = vpack.c.bf16 %v246_v50, %v246_v50 }
 0x299   :  { %257 = vst.msk [vmem:[#allocation14 + $0x4] sm:$0xf] %vm255_vm2, %v288_v51 }
 0x29a   :  { %465 = shalt.err (!%p462_p10)
}
 0x29b   :  { %s466_s27 = scalar_lea.hbm %s650_s6, 128 }
 0x29c   :  { %p467_p11 = scmp.ne.s32.totalorder %s650_s6, %s466_s27  ;;  %p470_p12 = scmp.lt.u32.totalorder %s466_s27, %s650_s6 }
 0x29e   :  { %p472_p13 = pnand %p470_p12, %p467_p11 }
 0x2a0   :  { %475 = shalt.err (!%p472_p13)
}
 0x2a1   :  { %269 = dma.vmem_to_hbm [thread:$0]  %s264_s21, 128, %s650_s6, [#allocation5], %s488_s9, %s488_s9, %s489_s10  }
 0x2a2   :  { %484 = dma.done.wait [#allocation5], 128  }
 0x2a3   :  { %485 = vsyncadd [#allocation5], 4294967168 }
 0x2a4   :  { %273 = vsyncpa [#allocation4], 1 }
 0x2a5   :  { %274 = vsyncpa [#allocation7], 1 }
 0x2a6   :  { %275 = vsyncpa [#allocation10], 1 }
 0x2a7   :  { %276 = vsyncpa [#allocation13], 1 }
 0x2a8   :  { %277 = vsyncpa [#allocation5], 1 }

// kernel: model_forward.14
= control target key start
LH: loop header
LB: loop body
LE: loop exit
PB: predicated region body
PF: predicated region fallthrough
CT: control target
= control target key end

     0   :  { %6 = vsyncpa [#allocation3], 0  ;;  %s787_s0 = inlined_call_operand.hbm [shape: bf16[2,8,96], index: 0, kind: input, shape index: {}]   ;;  %s788_s1 = inlined_call_operand.hbm [shape: bf16[2,8,32], index: 1, kind: output, shape index: {}]  }
   0x1   :  { %7 = vsyncpa [#allocation4], 0  ;;  %s659_s6 = smov [#allocation2]   ;;  %s611_s10 = scalar_lea.hbm %s787_s0, 128 }
   0x2   :  { %s13_s7 = sshll.u32 %s659_s6, 4  ;;  %p612_p0 = scmp.ne.s32.totalorder %s787_s0, %s611_s10  ;;  %s14_s7 = int_to_ptr.vmem [resolvable:$true] %s13_s7 }
   0x3   :  { %p615_p1 = scmp.lt.u32.totalorder %s611_s10, %s787_s0 }
   0x5   :  { %p617_p2 = pnand %p615_p1, %p612_p0 }
   0x7   :  { %620 = shalt.err (!%p617_p2)
}
   0x8   :  { %s621_s15 = scalar_lea.vmem %s14_s7, 128  ;;  %p626_p4 = scmp.lt.s32.totalorder %s14_s7, %s14_s7 }
   0x9   :  { %p622_p3 = scmp.ne.s32.totalorder %s14_s7, %s621_s15  ;;  %p627_p5 = scmp.lt.s32.totalorder %s621_s15, %s621_s15 }
   0xb   :  { %p628_p6 = por %p627_p5, %p626_p4 }
   0xd   :  { %p629_p7 = pnand %p628_p6, %p622_p3 }
   0xf   :  { %632 = shalt.err (!%p629_p7)
}
  0x10   :  { %s660_s16 = smov 64   ;;  %s661_s17 = smov 4  }
  0x11   :  { %19 = dma.hbm_to_vmem [thread:$0]  %s787_s0, 128, %s14_s7, [#allocation3], %s660_s16, %s660_s16, %s661_s17  }
  0x12   :  { %655 = dma.done.wait [#allocation3], 128  }
  0x13   :  { %656 = vsyncadd [#allocation3], 4294967168  ;;  %v662_v0 = vmov 0.0   ;;  %vm663_vm0 = vmmov 0   ;;  %v24_v1 = vld [vmem:[#allocation2] sm:$0xf] }
  0x14   :  { %529 = vmatprep.subr.bf16.mxu0 %v662_v0  ;;  %535 = vmatprep.subr.bf16.mxu1 %v662_v0  ;;  %v25_v2 = vld [vmem:[#allocation2 + $0x4] sm:$0xf]  ;;  %v701_v3 = vcombine.low %v24_v1, %v24_v1  ;;  %s664_s20 = smov 96   ;;  %vm31_vm1 = vcmask 130048   ;;  %s665_s0 = smov 80   ;;  %vm129_vm2 = vcmask 64512  }
  0x15   :  { %531 = vmatprep.mubr.msk.bf16.mxu0 %vm663_vm0, %v662_v0  ;;  %537 = vmatprep.mubr.msk.bf16.mxu1 %vm663_vm0, %v662_v0  ;;  %v704_v4 = vcombine.low %v25_v2, %v25_v2  ;;  %s666_s21 = smov 112   ;;  %vm155_vm3 = vcmask 1043456   ;;  %s667_s22 = smov 48   ;;  %vm483_vm4 = vcmask 257024  }
  0x16   :  { %29 = vrot.lane.b32.xlu0 %v701_v3, %s664_s20  ;;  %s668_s23 = smov 16   ;;  %s669_s24 = smov [#allocation5]  }
  0x17   :  { %s491_s25 = sshll.u32 %s669_s24, 4  ;;  %s492_s25 = int_to_ptr.vmem [resolvable:$true] %s491_s25 }
  0x18   :  { %s633_s26 = scalar_lea.vmem %s492_s25, 128  ;;  %p638_p9 = scmp.lt.s32.totalorder %s492_s25, %s492_s25 }
  0x19   :  { %p634_p8 = scmp.ne.s32.totalorder %s492_s25, %s633_s26  ;;  %p639_p10 = scmp.lt.s32.totalorder %s633_s26, %s633_s26 }
  0x1a   :  { %81 = vrot.lane.b32.xlu0 %v704_v4, %s664_s20 }
  0x1b   :  { %p640_p11 = por %p639_p10, %p638_p9 }
  0x1d   :  { %p641_p12 = pnand %p640_p11, %p634_p8 }
  0x1e   :  { %150 = vrot.lane.b32.xlu0 %v701_v3, %s660_s16 }
  0x22   :  { %253 = vrot.lane.b32.xlu0 %v701_v3, %s665_s0 }
  0x26   :  { %303 = vrot.lane.b32.xlu0 %v704_v4, %s665_s0 }
  0x2a   :  { %251 = vrot.lane.b32.xlu0 %v701_v3, %s666_s21 }
  0x2e   :  { %301 = vrot.lane.b32.xlu0 %v704_v4, %s666_s21 }
  0x88   :  { %v30_v5 = vpop.permute.xlu0 %29 }
  0x89   :  { %v36_v6 = vsel %vm31_vm1, %v30_v5, 0 }
  0x8a   :  { %530 = vmatpush3.bf16.xpose.msra.mxu0 %v36_v6 }
  0x8b   :  { %541 = vmatprep.subr.bf16.mxu0 %v662_v0 }
  0x8c   :  { %v82_v7 = vpop.permute.xlu0 %81 }
  0x8d   :  { %v87_v8 = vsel %vm31_vm1, %v82_v7, 0 }
  0x8e   :  { %536 = vmatpush3.bf16.xpose.msra.mxu1 %v87_v8 }
  0x8f   :  { %547 = vmatprep.subr.bf16.mxu1 %v662_v0 }
  0x90   :  { %v151_v19 = vpop.permute.xlu0 %150 }
  0x91   :  { %532 = vmatmul.mubr.msk.bf16.vlgmr.msra.gmra.mrb[0].mxu0 %vm31_vm1, %v24_v1  ;;  %v157_v20 = vsel %vm155_vm3, %v151_v19, 0 }
  0x92   :  { %543 = vmatprep.mubr.msk.bf16.mxu0 %vm663_vm0, %v662_v0  ;;  %542 = vmatpush3.bf16.msra.mxu0 %v157_v20 }
  0x93   :  { %553 = vmatprep.subr.bf16.mxu0 %v662_v0 }
  0x94   :  { %v254_v29 = vpop.permute.xlu0 %253 }
  0x95   :  { %538 = vmatmul.mubr.msk.bf16.vlgmr.msra.gmra.mrb[0].mxu1 %vm31_vm1, %v25_v2  ;;  %v259_v32 = vsel %vm31_vm1, %v254_v29, 0 }
  0x96   :  { %549 = vmatprep.mubr.msk.bf16.mxu1 %vm663_vm0, %v662_v0 }
  0x98   :  { %v304_v31 = vpop.permute.xlu0 %303 }
  0x99   :  { %v309_v35 = vsel %vm31_vm1, %v304_v31, 0 }
  0x9c   :  { %v252_v37 = vpop.permute.xlu0 %251 }
  0xa0   :  { %v302_v38 = vpop.permute.xlu0 %301 }
 0x164   :  { %v72_v9 = vpop.f32.mrb[0].mxu0 }
 0x165   :  { %v533_v10 = vpop.f32.mrb[1].mxu0  ;;  %v130_v11 = vsel %vm129_vm2, %v72_v9, -inf }
 0x166   :  { %131 = vmax.xlane.f32.xlu1 %v130_v11  ;;  %v75_v12 = vpop.f32.mrb[2].mxu0 }
 0x167   :  { %v534_v13 = vpop.f32.mrb[3].mxu0 }
 0x168   :  { %v123_v14 = vpop.f32.mrb[0].mxu1 }
 0x169   :  { %v539_v15 = vpop.f32.mrb[1].mxu1  ;;  %v133_v16 = vsel %vm129_vm2, %v123_v14, -inf }
 0x16a   :  { %134 = vmax.xlane.f32.xlu1 %v133_v16  ;;  %v126_v17 = vpop.f32.mrb[2].mxu1 }
 0x16b   :  { %v540_v18 = vpop.f32.mrb[3].mxu1 }
 0x17b   :  { %199 = vrot.lane.b32.xlu1 %v704_v4, %s660_s16 }
 0x1f3   :  { %v132_v21 = vpop.xlane.xlu1 %131 }
 0x1f4   :  { %v136_v22 = vsub.f32 %v72_v9, %v132_v21 }
 0x1f6   :  { %v138_v23 = vmul.f32 1.442695, %v136_v22 }
 0x1f7   :  { %v135_v24 = vpop.xlane.xlu1 %134 }
 0x1f8   :  { %595 = vpow2.f32 %v138_v23  ;;  %v137_v25 = vsub.f32 %v123_v14, %v135_v24 }
 0x1fa   :  { %v140_v26 = vmul.f32 1.442695, %v137_v25 }
 0x1fb   :  { %v200_v27 = vpop.permute.xlu1 %199 }
 0x1fc   :  { %597 = vpow2.f32 %v140_v26  ;;  %v205_v28 = vsel %vm155_vm3, %v200_v27, 0 }
 0x1fd   :  { %548 = vmatpush3.bf16.msra.mxu1 %v205_v28 }
 0x1fe   :  { %559 = vmatprep.subr.bf16.mxu1 %v662_v0 }
 0x202   :  { %v731_v30 = vpop.eup %595 }
 0x203   :  { %v148_v33 = vpack.c.bf16 %v731_v30, %v731_v30  ;;  %v142_v10 = vsel %vm129_vm2, %v731_v30, 0.0 }
 0x205   :  { %544 = vmatmul.mubr.msk.bf16.vlgmr.msra.gmra.mrb[4].mxu0 %vm129_vm2, %v148_v33 }
 0x206   :  { %v598_v34 = vpop.eup %597  ;;  %554 = vmatpush3.bf16.xpose.msra.mxu0 %v259_v32  ;;  %555 = vmatprep.mubr.msk.bf16.mxu0 %vm663_vm0, %v662_v0 }
 0x207   :  { %v149_v36 = vpack.c.bf16 %v598_v34, %v598_v34  ;;  %565 = vmatprep.subr.bf16.mxu0 %v662_v0  ;;  %v145_v7 = vsel %vm129_vm2, %v598_v34, 0.0 }
 0x209   :  { %550 = vmatmul.mubr.msk.bf16.vlgmr.msra.gmra.mrb[4].mxu1 %vm129_vm2, %v149_v36 }
 0x20a   :  { %560 = vmatpush3.bf16.xpose.msra.mxu1 %v309_v35  ;;  %561 = vmatprep.mubr.msk.bf16.mxu1 %vm663_vm0, %v662_v0 }
 0x20b   :  { %571 = vmatprep.subr.bf16.mxu1 %v662_v0 }
 0x20d   :  { %556 = vmatmul.mubr.msk.bf16.vlgmr.msra.gmra.mrb[8].mxu0 %vm31_vm1, %v252_v37 }
 0x20e   :  { %567 = vmatprep.mubr.msk.bf16.mxu0 %vm663_vm0, %v662_v0 }
 0x211   :  { %562 = vmatmul.mubr.msk.bf16.vlgmr.msra.gmra.mrb[8].mxu1 %vm31_vm1, %v302_v38 }
 0x212   :  { %573 = vmatprep.mubr.msk.bf16.mxu1 %vm663_vm0, %v662_v0 }
 0x2d8   :  { %v751_v39 = vpop.f32.mrb[4].mxu0 }
 0x2d9   :  { %v545_v40 = vpop.f32.mrb[5].mxu0 }
 0x2da   :  { %v196_v41 = vpop.f32.mrb[6].mxu0 }
 0x2db   :  { %v546_v42 = vpop.f32.mrb[7].mxu0 }
 0x2dc   :  { %v753_v43 = vpop.f32.mrb[4].mxu1 }
 0x2dd   :  { %v551_v44 = vpop.f32.mrb[5].mxu1 }
 0x2de   :  { %v244_v45 = vpop.f32.mrb[6].mxu1 }
 0x2df   :  { %v552_v46 = vpop.f32.mrb[7].mxu1 }
 0x2e0   :  { %v295_v47 = vpop.f32.mrb[8].mxu0 }
 0x2e1   :  { %v557_v48 = vpop.f32.mrb[9].mxu0  ;;  %v351_v49 = vsel %vm129_vm2, %v295_v47, -inf }
 0x2e2   :  { %352 = vmax.xlane.f32.xlu1 %v351_v49  ;;  %v298_v50 = vpop.f32.mrb[10].mxu0 }
 0x2e3   :  { %v558_v51 = vpop.f32.mrb[11].mxu0 }
 0x2e4   :  { %v345_v52 = vpop.f32.mrb[8].mxu1 }
 0x2e5   :  { %v563_v53 = vpop.f32.mrb[9].mxu1  ;;  %v354_v54 = vsel %vm129_vm2, %v345_v52, -inf }
 0x2e6   :  { %355 = vmax.xlane.f32.xlu0 %v354_v54  ;;  %v348_v55 = vpop.f32.mrb[10].mxu1 }
 0x2e7   :  { %v564_v56 = vpop.f32.mrb[11].mxu1 }
 0x2f3   :  { %419 = vrot.lane.b32.xlu1 %v704_v4, %s667_s22 }
 0x2fc   :  { %371 = vrot.lane.b32.xlu0 %v701_v3, %s667_s22 }
 0x36f   :  { %v353_v57 = vpop.xlane.xlu1 %352 }
 0x370   :  { %v357_v58 = vsub.f32 %v295_v47, %v353_v57 }
 0x372   :  { %v359_v59 = vmul.f32 1.442695, %v357_v58 }
 0x373   :  { %v356_v60 = vpop.xlane.xlu0 %355  ;;  %v420_v61 = vpop.permute.xlu1 %419 }
 0x374   :  { %599 = vpow2.f32 %v359_v59  ;;  %v358_v62 = vsub.f32 %v345_v52, %v356_v60  ;;  %v425_v63 = vsel %vm155_vm3, %v420_v61, 0 }
 0x375   :  { %572 = vmatpush3.bf16.msra.mxu1 %v425_v63 }
 0x376   :  { %v361_v0 = vmul.f32 1.442695, %v358_v62 }
 0x377   :  { %v372_v1 = vpop.permute.xlu0 %371 }
 0x378   :  { %601 = vpow2.f32 %v361_v0  ;;  %v377_v2 = vsel %vm155_vm3, %v372_v1, 0 }
 0x379   :  { %566 = vmatpush3.bf16.msra.mxu0 %v377_v2 }
 0x37e   :  { %v600_v5 = vpop.eup %599 }
 0x37f   :  { %v363_v4 = vsel %vm129_vm2, %v600_v5, 0.0  ;;  %v369_v3 = vpack.c.bf16 %v600_v5, %v600_v5 }
 0x380   :  { %364 = vadd.xlane.f32.xlu1 %v363_v4 }
 0x381   :  { %568 = vmatmul.mubr.msk.bf16.vlgmr.msra.gmra.mrb[12].mxu0 %vm129_vm2, %v369_v3 }
 0x382   :  { %v602_v6 = vpop.eup %601 }
 0x383   :  { %v366_v8 = vsel %vm129_vm2, %v602_v6, 0.0  ;;  %v370_v9 = vpack.c.bf16 %v602_v6, %v602_v6 }
 0x384   :  { %146 = vadd.xlane.f32.xlu1 %v145_v7  ;;  %367 = vadd.xlane.f32.xlu0 %v366_v8 }
 0x385   :  { %574 = vmatmul.mubr.msk.bf16.vlgmr.msra.gmra.mrb[12].mxu1 %vm129_vm2, %v370_v9 }
 0x388   :  { %143 = vadd.xlane.f32.xlu0 %v142_v10 }
 0x40d   :  { %v365_v11 = vpop.xlane.xlu1 %364 }
 0x40e   :  { %603 = vrcp.f32 %v365_v11 }
 0x411   :  { %v368_v12 = vpop.xlane.xlu0 %367  ;;  %v147_v26 = vpop.xlane.xlu1 %146 }
 0x412   :  { %605 = vrcp.f32 %v368_v12 }
 0x413   :  { %607 = vrcp.f32 %v147_v26 }
 0x415   :  { %v144_v27 = vpop.xlane.xlu0 %143 }
 0x416   :  { %609 = vrcp.f32 %v144_v27 }
 0x418   :  { %v604_v16 = vpop.eup %603 }
 0x41c   :  { %v606_v18 = vpop.eup %605 }
 0x41d   :  { %v608_v28 = vpop.eup %607 }
 0x41e   :  { %v250_v32 = vmul.f32 %v608_v28, %v753_v43 }
 0x420   :  { %v610_v29 = vpop.eup %609 }
 0x421   :  { %v249_v31 = vmul.f32 %v610_v29, %v751_v39 }
 0x454   :  { %v413_v13 = vpop.f32.mrb[12].mxu0 }
 0x455   :  { %v569_v14 = vpop.f32.mrb[13].mxu0  ;;  %v469_v20 = vmul.f32 %v604_v16, %v413_v13 }
 0x456   :  { %v416_v15 = vpop.f32.mrb[14].mxu0 }
 0x457   :  { %v570_v17 = vpop.f32.mrb[15].mxu0 }
 0x458   :  { %v461_v19 = vpop.f32.mrb[12].mxu1 }
 0x459   :  { %v470_v21 = vmul.f32 %v606_v18, %v461_v19  ;;  %v575_v22 = vpop.f32.mrb[13].mxu1 }
 0x45a   :  { %v464_v23 = vpop.f32.mrb[14].mxu1 }
 0x45b   :  { %v588_v24 = vpack.i.bf16 %v470_v21, %v469_v20  ;;  %v576_v25 = vpop.f32.mrb[15].mxu1 }
 0x45d   :  { %589 = vrot.lane.b32.xlu0 %v588_v24, %s668_s23 }
 0x4cf   :  { %v590_v30 = vpop.permute.xlu0 %589 }
 0x4d0   :  { %v592_v33 = vunpack.i.h.bf16 %v590_v30  ;;  %v591_v34 = vunpack.i.l.bf16 %v590_v30 }
 0x4d2   :  { %v480_v35 = vsel %vm31_vm1, %v250_v32, %v592_v33  ;;  %v479_v36 = vsel %vm31_vm1, %v249_v31, %v591_v34 }
 0x4d3   :  { %v482_v37 = vpack.c.bf16 %v480_v35, %v480_v35  ;;  %v481_v38 = vpack.c.bf16 %v479_v36, %v479_v36 }
 0x4d5   :  { %484 = vst.msk [vmem:[#allocation5] sm:$0xf] %vm483_vm4, %v481_v38  ;;  %485 = vst.msk [vmem:[#allocation5 + $0x4] sm:$0xf] %vm483_vm4, %v482_v37 }
 0x4d6   :  { %644 = shalt.err (!%p641_p12)
}
 0x4d7   :  { %s645_s29 = scalar_lea.hbm %s788_s1, 128 }
 0x4d8   :  { %p646_p13 = scmp.ne.s32.totalorder %s788_s1, %s645_s29  ;;  %p649_p0 = scmp.lt.u32.totalorder %s645_s29, %s788_s1 }
 0x4da   :  { %p651_p1 = pnand %p649_p0, %p646_p13 }
 0x4dc   :  { %654 = shalt.err (!%p651_p1)
}
 0x4dd   :  { %497 = dma.vmem_to_hbm [thread:$0]  %s492_s25, 128, %s788_s1, [#allocation4], %s660_s16, %s660_s16, %s661_s17  }
 0x4de   :  { %657 = dma.done.wait [#allocation4], 128  }
 0x4df   :  { %658 = vsyncadd [#allocation4], 4294967168 }
 0x4e0   :  { %501 = vsyncpa [#allocation3], 1 }
 0x4e1   :  { %502 = vsyncpa [#allocation4], 1 }

// kernel: model_forward.16
= control target key start
LH: loop header
LB: loop body
LE: loop exit
PB: predicated region body
PF: predicated region fallthrough
CT: control target
= control target key end

     0   :  { %8 = vsyncpa [#allocation4], 0  ;;  %s423_s0 = inlined_call_operand.hbm [shape: bf16[16,32], index: 0, kind: input, shape index: {}]   ;;  %s424_s1 = inlined_call_operand.hbm [shape: bf16[32,64], index: 1, kind: input, shape index: {}]   ;;  %s425_s2 = inlined_call_operand.hbm [shape: f32[1,64], index: 2, kind: input, shape index: {}]   ;;  %s426_s3 = inlined_call_operand.hbm [shape: bf16[16,64], index: 3, kind: output, shape index: {}]  }
   0x1   :  { %9 = vsyncpa [#allocation7], 0 }
   0x2   :  { %10 = vsyncpa [#allocation5], 0  ;;  %s327_s12 = smov [#allocation6]   ;;  %s328_s14 = smov [#allocation3]  }
   0x3   :  { %s28_s13 = sshll.u32 %s327_s12, 4  ;;  %s16_s15 = sshll.u32 %s328_s14, 4  ;;  %s29_s13 = int_to_ptr.vmem [resolvable:$true] %s28_s13  ;;  %s355_s15 = int_to_ptr.vmem [resolvable:$true] %s16_s15 }
   0x4   :  { %s233_s18 = scalar_lea.hbm %s424_s1, 256 }
   0x5   :  { %p234_p0 = scmp.ne.s32.totalorder %s424_s1, %s233_s18  ;;  %p237_p1 = scmp.lt.u32.totalorder %s233_s18, %s424_s1 }
   0x7   :  { %p239_p2 = pnand %p237_p1, %p234_p0 }
   0x9   :  { %242 = shalt.err (!%p239_p2)
}
   0xa   :  { %s243_s23 = scalar_lea.vmem %s29_s13, 256  ;;  %p248_p4 = scmp.lt.s32.totalorder %s29_s13, %s29_s13 }
   0xb   :  { %p244_p3 = scmp.ne.s32.totalorder %s29_s13, %s243_s23  ;;  %p249_p5 = scmp.lt.s32.totalorder %s243_s23, %s243_s23 }
   0xd   :  { %p250_p6 = por %p249_p5, %p248_p4 }
   0xf   :  { %p251_p7 = pnand %p250_p6, %p244_p3 }
  0x11   :  { %254 = shalt.err (!%p251_p7)
}
  0x12   :  { %s329_s24 = smov 64   ;;  %s330_s25 = smov 4  }
  0x13   :  { %34 = dma.hbm_to_vmem [thread:$0]  %s424_s1, 256, %s29_s13, [#allocation7], %s329_s24, %s329_s24, %s330_s25  }
  0x14   :  { %s255_s30 = scalar_lea.hbm %s423_s0, 128 }
  0x15   :  { %p256_p8 = scmp.ne.s32.totalorder %s423_s0, %s255_s30  ;;  %p259_p9 = scmp.lt.u32.totalorder %s255_s30, %s423_s0 }
  0x17   :  { %p261_p10 = pnand %p259_p9, %p256_p8 }
  0x19   :  { %264 = shalt.err (!%p261_p10)
}
  0x1a   :  { %s265_s8 = scalar_lea.vmem %s355_s15, 128  ;;  %p270_p12 = scmp.lt.s32.totalorder %s355_s15, %s355_s15 }
  0x1b   :  { %p266_p11 = scmp.ne.s32.totalorder %s355_s15, %s265_s8  ;;  %p271_p13 = scmp.lt.s32.totalorder %s265_s8, %s265_s8 }
  0x1d   :  { %p272_p0 = por %p271_p13, %p270_p12 }
  0x1f   :  { %p273_p1 = pnand %p272_p0, %p266_p11 }
  0x21   :  { %276 = shalt.err (!%p273_p1)
}
  0x22   :  { %22 = dma.hbm_to_vmem [thread:$0]  %s423_s0, 128, %s355_s15, [#allocation4], %s329_s24, %s329_s24, %s330_s25  }
  0x23   :  { %s331_s10 = smov [#allocation8]   ;;  %s277_s14 = scalar_lea.hbm %s425_s2, 16 }
  0x24   :  { %s41_s11 = sshll.u32 %s331_s10, 4  ;;  %p278_p2 = scmp.ne.s32.totalorder %s425_s2, %s277_s14  ;;  %s42_s11 = int_to_ptr.vmem [resolvable:$true] %s41_s11 }
  0x25   :  { %p281_p3 = scmp.lt.u32.totalorder %s277_s14, %s425_s2 }
  0x27   :  { %p283_p4 = pnand %p281_p3, %p278_p2 }
  0x29   :  { %286 = shalt.err (!%p283_p4)
}
  0x2a   :  { %s287_s20 = scalar_lea.vmem %s42_s11, 16  ;;  %s291_s0 = scalar_lea.vmem %s42_s11, 32 }
  0x2b   :  { %p288_p5 = scmp.ne.s32.totalorder %s42_s11, %s287_s20  ;;  %p292_p6 = scmp.lt.s32.totalorder %s42_s11, %s42_s11 }
  0x2c   :  { %p293_p7 = scmp.lt.s32.totalorder %s291_s0, %s287_s20 }
  0x2e   :  { %p294_p8 = por %p293_p7, %p292_p6 }
  0x30   :  { %p295_p9 = pnand %p294_p8, %p288_p5 }
  0x32   :  { %298 = shalt.err (!%p295_p9)
}
  0x33   :  { %44 = dma.hbm_to_vmem [thread:$0]  %s425_s2, 16, %s42_s11, [#allocation7]  }
  0x34   :  { %321 = dma.done.wait [#allocation4], 128  }
  0x35   :  { %322 = vsyncadd [#allocation4], 4294967168 }
  0x36   :  { %323 = dma.done.wait [#allocation7], 272  }
  0x37   :  { %324 = vsyncadd [#allocation7], 4294967024  ;;  %vm59_vm0 = vcmask 523264   ;;  %v332_v0 = vmov 0.0   ;;  %vm333_vm1 = vmmov 0   ;;  %v226_v1 = vld [vmem:[#allocation6] sm:$0xff]  }
  0x38   :  { %60 = vst.msk [vmem:[#allocation2] sm:$0xff] %vm59_vm0, %v332_v0  ;;  %61 = vst.msk [vmem:[#allocation2 + $0x8] sm:$0xff] %vm59_vm0, %v332_v0  ;;  %210 = vmatprep.subr.bf16.mxu0 %v332_v0  ;;  %214 = vmatprep.mubr.msk.bf16.mxu0 %vm333_vm1, %v332_v0  ;;  %v227_v2 = vld [vmem:[#allocation6 + $0x8] sm:$0xff]   ;;  %v228_v3 = vld [vmem:[#allocation3] sm:$0xff]   ;;  %vm87_vm2 = vcmask 261120   ;;  %vm177_vm3 = vcmask 519168  }
  0x39   :  { %211 = vmatpush3.bf16.msra.mxu0 %v226_v1  ;;  %v202_v12 = vld [vmem:[#allocation8] ss:$0 sm:$0xff]  ;;  %s334_s2 = smov [#allocation9]  }
  0x3a   :  { %212 = vmatprep.subr.bf16.mxu0 %v332_v0  ;;  %s185_s22 = sshll.u32 %s334_s2, 4  ;;  %s186_s22 = int_to_ptr.vmem [resolvable:$true] %s185_s22 }
  0x3b   :  { %s299_s23 = scalar_lea.vmem %s186_s22, 128  ;;  %p304_p11 = scmp.lt.s32.totalorder %s186_s22, %s186_s22 }
  0x3c   :  { %p300_p10 = scmp.ne.s32.totalorder %s186_s22, %s299_s23  ;;  %p305_p12 = scmp.lt.s32.totalorder %s299_s23, %s299_s23 }
  0x3d   :  { %213 = vmatpush3.bf16.msra.mxu0 %v227_v2 }
  0x3e   :  { %p306_p13 = por %p305_p12, %p304_p11 }
  0x3f   :  { %v62_v4 = vld [vmem:[#allocation2] sm:$0xff]  ;;  %v63_v6 = vld [vmem:[#allocation2 + $0x8] sm:$0xff] }
  0x40   :  { %215 = vmatmul.mubr.msk.bf16.vlgmr.msra.gmra.mrb[0].mxu0 %vm87_vm2, %v228_v3  ;;  %p307_p0 = pnand %p306_p13, %p300_p10 }
 0x113   :  { %v125_v5 = vpop.f32.mrb[0].mxu0 }
 0x114   :  { %v132_v7 = vadd.f32 %v125_v5, %v62_v4  ;;  %v216_v8 = vpop.f32.mrb[1].mxu0 }
 0x115   :  { %v128_v9 = vpop.f32.mrb[2].mxu0 }
 0x116   :  { %135 = vst.msk [vmem:[#allocation2] sm:$0xff] %vm59_vm0, %v132_v7  ;;  %v133_v10 = vadd.f32 %v128_v9, %v63_v6  ;;  %v217_v11 = vpop.f32.mrb[3].mxu0 }
 0x118   :  { %136 = vst.msk [vmem:[#allocation2 + $0x8] sm:$0xff] %vm59_vm0, %v133_v10 }
 0x11d   :  { %v140_v13 = vld [vmem:[#allocation2] sm:$0xff] }
 0x11e   :  { %v149_v14 = vadd.f32 %v202_v12, %v140_v13 }
 0x11f   :  { %v141_v15 = vld [vmem:[#allocation2 + $0x8] sm:$0xff] }
 0x120   :  { %v150_v16 = vadd.f32 %v202_v12, %v141_v15  ;;  %v153_v17 = vmul.f32 0.044715, %v149_v14  ;;  %v151_v28 = vmul.f32 0.5, %v149_v14 }
 0x122   :  { %v154_v18 = vmul.f32 0.044715, %v150_v16  ;;  %v155_v19 = vmul.f32 %v153_v17, %v149_v14  ;;  %v152_v31 = vmul.f32 0.5, %v150_v16 }
 0x124   :  { %v156_v20 = vmul.f32 %v154_v18, %v150_v16  ;;  %v157_v21 = vmul.f32 %v155_v19, %v149_v14 }
 0x126   :  { %v158_v22 = vmul.f32 %v156_v20, %v150_v16  ;;  %v159_v23 = vadd.f32 %v157_v21, %v149_v14 }
 0x128   :  { %v160_v24 = vadd.f32 %v158_v22, %v150_v16  ;;  %v161_v25 = vmul.f32 0.7978846, %v159_v23 }
 0x12a   :  { %v162_v26 = vmul.f32 0.7978846, %v160_v24  ;;  %229 = vtanh.f32 %v161_v25 }
 0x12c   :  { %231 = vtanh.f32 %v162_v26 }
 0x134   :  { %v230_v27 = vpop.eup %229 }
 0x135   :  { %v165_v29 = vadd.f32 1.0, %v230_v27 }
 0x136   :  { %v232_v30 = vpop.eup %231 }
 0x137   :  { %v166_v32 = vadd.f32 1.0, %v232_v30  ;;  %v167_v33 = vmul.f32 %v165_v29, %v151_v28 }
 0x139   :  { %v168_v34 = vmul.f32 %v166_v32, %v152_v31  ;;  %v205_v35 = vpack.c.bf16 %v167_v33, %v167_v33 }
 0x13b   :  { %v206_v36 = vpack.c.bf16 %v168_v34, %v168_v34  ;;  %178 = vst.msk [vmem:[#allocation9] sm:$0xf] %vm177_vm3, %v205_v35 }
 0x13d   :  { %179 = vst.msk [vmem:[#allocation9 + $0x4] sm:$0xf] %vm177_vm3, %v206_v36 }
 0x13e   :  { %310 = shalt.err (!%p307_p0)
}
 0x13f   :  { %s311_s28 = scalar_lea.hbm %s426_s3, 128 }
 0x140   :  { %p312_p1 = scmp.ne.s32.totalorder %s426_s3, %s311_s28  ;;  %p315_p2 = scmp.lt.u32.totalorder %s311_s28, %s426_s3 }
 0x142   :  { %p317_p3 = pnand %p315_p2, %p312_p1 }
 0x144   :  { %320 = shalt.err (!%p317_p3)
}
 0x145   :  { %191 = dma.vmem_to_hbm [thread:$0]  %s186_s22, 128, %s426_s3, [#allocation5], %s329_s24, %s329_s24, %s330_s25  }
 0x146   :  { %325 = dma.done.wait [#allocation5], 128  }
 0x147   :  { %326 = vsyncadd [#allocation5], 4294967168 }
 0x148   :  { %195 = vsyncpa [#allocation4], 1 }
 0x149   :  { %196 = vsyncpa [#allocation7], 1 }
 0x14a   :  { %197 = vsyncpa [#allocation5], 1 }

// kernel: model_forward.17
= control target key start
LH: loop header
LB: loop body
LE: loop exit
PB: predicated region body
PF: predicated region fallthrough
CT: control target
= control target key end

     0   :  { %11 = vsyncpa [#allocation4], 0  ;;  %s670_s0 = inlined_call_operand.hbm [shape: bf16[16,64], index: 0, kind: input, shape index: {}]   ;;  %s671_s1 = inlined_call_operand.hbm [shape: bf16[64,32], index: 1, kind: input, shape index: {}]   ;;  %s672_s2 = inlined_call_operand.hbm [shape: f32[1,32], index: 2, kind: input, shape index: {}]   ;;  %s673_s3 = inlined_call_operand.hbm [shape: bf16[16,32], index: 3, kind: input, shape index: {}]   ;;  %s674_s4 = inlined_call_operand.hbm [shape: f32[1,32], index: 4, kind: input, shape index: {}]   ;;  %s675_s5 = inlined_call_operand.hbm [shape: f32[1,32], index: 5, kind: input, shape index: {}]   ;;  %s676_s6 = inlined_call_operand.hbm [shape: bf16[16,32], index: 6, kind: output, shape index: {}]  }
   0x1   :  { %12 = vsyncpa [#allocation7], 0 }
   0x2   :  { %13 = vsyncpa [#allocation10], 0 }
   0x3   :  { %14 = vsyncpa [#allocation13], 0 }
   0x4   :  { %15 = vsyncpa [#allocation5], 0  ;;  %s513_s21 = smov [#allocation6]   ;;  %s514_s23 = smov [#allocation9]  }
   0x5   :  { %s33_s22 = sshll.u32 %s513_s21, 4  ;;  %s55_s24 = sshll.u32 %s514_s23, 4  ;;  %s34_s22 = int_to_ptr.vmem [resolvable:$true] %s33_s22  ;;  %s559_s24 = int_to_ptr.vmem [resolvable:$true] %s55_s24 }
   0x6   :  { %s349_s27 = scalar_lea.hbm %s671_s1, 512 }
   0x7   :  { %p350_p0 = scmp.ne.s32.totalorder %s671_s1, %s349_s27  ;;  %p353_p1 = scmp.lt.u32.totalorder %s349_s27, %s671_s1 }
   0x9   :  { %p355_p2 = pnand %p353_p1, %p350_p0 }
   0xb   :  { %358 = shalt.err (!%p355_p2)
}
   0xc   :  { %s359_s8 = scalar_lea.vmem %s34_s22, 512  ;;  %p364_p4 = scmp.lt.s32.totalorder %s34_s22, %s34_s22 }
   0xd   :  { %p360_p3 = scmp.ne.s32.totalorder %s34_s22, %s359_s8  ;;  %p365_p5 = scmp.lt.s32.totalorder %s359_s8, %s359_s8 }
   0xf   :  { %p366_p6 = por %p365_p5, %p364_p4 }
  0x11   :  { %p367_p7 = pnand %p366_p6, %p360_p3 }
  0x13   :  { %370 = shalt.err (!%p367_p7)
}
  0x14   :  { %s515_s9 = smov 64   ;;  %s516_s10 = smov 4  }
  0x15   :  { %39 = dma.hbm_to_vmem [thread:$0]  %s671_s1, 512, %s34_s22, [#allocation7], %s515_s9, %s515_s9, %s516_s10  }
  0x16   :  { %s371_s15 = scalar_lea.hbm %s673_s3, 128 }
  0x17   :  { %p372_p8 = scmp.ne.s32.totalorder %s673_s3, %s371_s15  ;;  %p375_p9 = scmp.lt.u32.totalorder %s371_s15, %s673_s3 }
  0x19   :  { %p377_p10 = pnand %p375_p9, %p372_p8 }
  0x1b   :  { %380 = shalt.err (!%p377_p10)
}
  0x1c   :  { %s381_s20 = scalar_lea.vmem %s559_s24, 128  ;;  %p386_p12 = scmp.lt.s32.totalorder %s559_s24, %s559_s24 }
  0x1d   :  { %p382_p11 = scmp.ne.s32.totalorder %s559_s24, %s381_s20  ;;  %p387_p13 = scmp.lt.s32.totalorder %s381_s20, %s381_s20 }
  0x1f   :  { %p388_p0 = por %p387_p13, %p386_p12 }
  0x21   :  { %p389_p1 = pnand %p388_p0, %p382_p11 }
  0x23   :  { %392 = shalt.err (!%p389_p1)
}
  0x24   :  { %61 = dma.hbm_to_vmem [thread:$0]  %s673_s3, 128, %s559_s24, [#allocation10], %s515_s9, %s515_s9, %s516_s10  }
  0x25   :  { %s517_s22 = smov [#allocation3]   ;;  %s518_s25 = smov [#allocation8]  }
  0x26   :  { %s21_s23 = sshll.u32 %s517_s22, 4  ;;  %s46_s26 = sshll.u32 %s518_s25, 4  ;;  %s22_s23 = int_to_ptr.vmem [resolvable:$true] %s21_s23  ;;  %s47_s26 = int_to_ptr.vmem [resolvable:$true] %s46_s26 }
  0x27   :  { %s393_s29 = scalar_lea.hbm %s670_s0, 128 }
  0x28   :  { %p394_p2 = scmp.ne.s32.totalorder %s670_s0, %s393_s29  ;;  %p397_p3 = scmp.lt.u32.totalorder %s393_s29, %s670_s0 }
  0x2a   :  { %p399_p4 = pnand %p397_p3, %p394_p2 }
  0x2c   :  { %402 = shalt.err (!%p399_p4)
}
  0x2d   :  { %s403_s3 = scalar_lea.vmem %s22_s23, 128  ;;  %p408_p6 = scmp.lt.s32.totalorder %s22_s23, %s22_s23 }
  0x2e   :  { %p404_p5 = scmp.ne.s32.totalorder %s22_s23, %s403_s3  ;;  %p409_p7 = scmp.lt.s32.totalorder %s403_s3, %s403_s3 }
  0x30   :  { %p410_p8 = por %p409_p7, %p408_p6 }
  0x32   :  { %p411_p9 = pnand %p410_p8, %p404_p5 }
  0x34   :  { %414 = shalt.err (!%p411_p9)
}
  0x35   :  { %27 = dma.hbm_to_vmem [thread:$0]  %s670_s0, 128, %s22_s23, [#allocation4], %s515_s9, %s515_s9, %s516_s10  }
  0x36   :  { %s415_s15 = scalar_lea.hbm %s672_s2, 16 }
  0x37   :  { %p416_p10 = scmp.ne.s32.totalorder %s672_s2, %s415_s15  ;;  %p419_p11 = scmp.lt.u32.totalorder %s415_s15, %s672_s2 }
  0x39   :  { %p421_p12 = pnand %p419_p11, %p416_p10 }
  0x3b   :  { %424 = shalt.err (!%p421_p12)
}
  0x3c   :  { %s425_s20 = scalar_lea.vmem %s47_s26, 16  ;;  %s429_s1 = scalar_lea.vmem %s47_s26, 32 }
  0x3d   :  { %p426_p13 = scmp.ne.s32.totalorder %s47_s26, %s425_s20  ;;  %p430_p0 = scmp.lt.s32.totalorder %s47_s26, %s47_s26 }
  0x3e   :  { %p431_p1 = scmp.lt.s32.totalorder %s429_s1, %s425_s20 }
  0x40   :  { %p432_p2 = por %p431_p1, %p430_p0 }
  0x42   :  { %p433_p3 = pnand %p432_p2, %p426_p13 }
  0x44   :  { %436 = shalt.err (!%p433_p3)
}
  0x45   :  { %49 = dma.hbm_to_vmem [thread:$0]  %s672_s2, 16, %s47_s26, [#allocation7]  }
  0x46   :  { %s519_s22 = smov [#allocation11]   ;;  %s520_s25 = smov [#allocation12]  }
  0x47   :  { %s68_s23 = sshll.u32 %s519_s22, 4  ;;  %s78_s27 = sshll.u32 %s520_s25, 4  ;;  %s69_s23 = int_to_ptr.vmem [resolvable:$true] %s68_s23  ;;  %s79_s27 = int_to_ptr.vmem [resolvable:$true] %s78_s27 }
  0x48   :  { %s437_s30 = scalar_lea.hbm %s674_s4, 16 }
  0x49   :  { %p438_p4 = scmp.ne.s32.totalorder %s674_s4, %s437_s30  ;;  %p441_p5 = scmp.lt.u32.totalorder %s437_s30, %s674_s4 }
  0x4b   :  { %p443_p6 = pnand %p441_p5, %p438_p4 }
  0x4d   :  { %446 = shalt.err (!%p443_p6)
}
  0x4e   :  { %s447_s2 = scalar_lea.vmem %s69_s23, 16  ;;  %s451_s26 = scalar_lea.vmem %s69_s23, 32 }
  0x4f   :  { %p448_p7 = scmp.ne.s32.totalorder %s69_s23, %s447_s2  ;;  %p452_p8 = scmp.lt.s32.totalorder %s69_s23, %s69_s23 }
  0x50   :  { %p453_p9 = scmp.lt.s32.totalorder %s451_s26, %s447_s2 }
  0x52   :  { %p454_p10 = por %p453_p9, %p452_p8 }
  0x54   :  { %p455_p11 = pnand %p454_p10, %p448_p7 }
  0x56   :  { %458 = shalt.err (!%p455_p11)
}
  0x57   :  { %71 = dma.hbm_to_vmem [thread:$0]  %s674_s4, 16, %s69_s23, [#allocation10]  }
  0x58   :  { %s459_s15 = scalar_lea.hbm %s675_s5, 16 }
  0x59   :  { %p460_p12 = scmp.ne.s32.totalorder %s675_s5, %s459_s15  ;;  %p463_p13 = scmp.lt.u32.totalorder %s459_s15, %s675_s5 }
  0x5b   :  { %p465_p0 = pnand %p463_p13, %p460_p12 }
  0x5d   :  { %468 = shalt.err (!%p465_p0)
}
  0x5e   :  { %s469_s20 = scalar_lea.vmem %s79_s27, 16  ;;  %s473_s1 = scalar_lea.vmem %s79_s27, 32 }
  0x5f   :  { %p470_p1 = scmp.ne.s32.totalorder %s79_s27, %s469_s20  ;;  %p474_p2 = scmp.lt.s32.totalorder %s79_s27, %s79_s27 }
  0x60   :  { %p475_p3 = scmp.lt.s32.totalorder %s473_s1, %s469_s20 }
  0x62   :  { %p476_p4 = por %p475_p3, %p474_p2 }
  0x64   :  { %p477_p5 = pnand %p476_p4, %p470_p1 }
  0x66   :  { %480 = shalt.err (!%p477_p5)
}
  0x67   :  { %81 = dma.hbm_to_vmem [thread:$0]  %s675_s5, 16, %s79_s27, [#allocation13]  }
  0x68   :  { %503 = dma.done.wait [#allocation4], 128  }
  0x69   :  { %504 = vsyncadd [#allocation4], 4294967168 }
  0x6a   :  { %505 = dma.done.wait [#allocation7], 528  }
  0x6b   :  { %506 = vsyncadd [#allocation7], 4294966768 }
  0x6c   :  { %507 = dma.done.wait [#allocation10], 144  }
  0x6d   :  { %508 = vsyncadd [#allocation10], 4294967152 }
  0x6e   :  { %509 = dma.done.wait [#allocation13], 16  }
  0x6f   :  { %510 = vsyncadd [#allocation13], 4294967280  ;;  %vm105_vm0 = vcmask 261120   ;;  %v521_v0 = vmov 0.0   ;;  %vm522_vm1 = vmmov 0   ;;  %v340_v1 = vld [vmem:[#allocation6] sm:$0xff]  }
  0x70   :  { %317 = vmatprep.subr.bf16.mxu0 %v521_v0  ;;  %325 = vmatprep.mubr.msk.bf16.mxu0 %vm522_vm1, %v521_v0  ;;  %106 = vst.msk [vmem:[#allocation2] sm:$0xff] %vm105_vm0, %v521_v0  ;;  %107 = vst.msk [vmem:[#allocation2 + $0x8] sm:$0xff] %vm105_vm0, %v521_v0  ;;  %v341_v2 = vld [vmem:[#allocation6 + $0x8] sm:$0xff]   ;;  %v342_v3 = vld [vmem:[#allocation6 + $0x10] sm:$0xff]   ;;  %vm149_vm2 = vcmask 523264   ;;  %vm272_vm3 = vcmask 257024  }
  0x71   :  { %318 = vmatpush3.bf16.msra.mxu0 %v340_v1  ;;  %v343_v4 = vld [vmem:[#allocation6 + $0x18] sm:$0xff]   ;;  %v309_v14 = vld [vmem:[#allocation9] sm:$0xff]   ;;  %v301_v15 = vld [vmem:[#allocation8] ss:$0 sm:$0xff]  ;;  %s523_s5 = smov [#allocation14]  }
  0x72   :  { %319 = vmatprep.subr.bf16.mxu0 %v521_v0  ;;  %v344_v5 = vld [vmem:[#allocation3] sm:$0xff]   ;;  %v310_v16 = vunpack.c.l.bf16 %v309_v14  ;;  %v311_v19 = vunpack.c.h.bf16 %v309_v14  ;;  %v302_v43 = vld [vmem:[#allocation11] ss:$0 sm:$0xff]  ;;  %v303_v45 = vld [vmem:[#allocation12] ss:$0 sm:$0xff]  ;;  %s280_s21 = sshll.u32 %s523_s5, 4  ;;  %s281_s21 = int_to_ptr.vmem [resolvable:$true] %s280_s21 }
  0x73   :  { %s481_s22 = scalar_lea.vmem %s281_s21, 128  ;;  %p486_p7 = scmp.lt.s32.totalorder %s281_s21, %s281_s21 }
  0x74   :  { %p482_p6 = scmp.ne.s32.totalorder %s281_s21, %s481_s22  ;;  %p487_p8 = scmp.lt.s32.totalorder %s481_s22, %s481_s22 }
  0x75   :  { %320 = vmatpush3.bf16.msra.mxu0 %v341_v2 }
  0x76   :  { %321 = vmatprep.subr.bf16.mxu0 %v521_v0  ;;  %p488_p9 = por %p487_p8, %p486_p7 }
  0x77   :  { %v108_v6 = vld [vmem:[#allocation2] sm:$0xff]  ;;  %v109_v8 = vld [vmem:[#allocation2 + $0x8] sm:$0xff] }
  0x78   :  { %p489_p10 = pnand %p488_p9, %p482_p6 }
  0x79   :  { %322 = vmatpush3.bf16.msra.mxu0 %v342_v3 }
  0x7a   :  { %323 = vmatprep.subr.bf16.mxu0 %v521_v0 }
  0x7d   :  { %324 = vmatpush3.bf16.msra.mxu0 %v343_v4 }
  0x80   :  { %326 = vmatmul.mubr.msk.bf16.vlgmr.msra.gmra.mrb[0].mxu0 %vm149_vm2, %v344_v5 }
 0x153   :  { %v187_v7 = vpop.f32.mrb[0].mxu0 }
 0x154   :  { %v194_v9 = vadd.f32 %v187_v7, %v108_v6  ;;  %v327_v10 = vpop.f32.mrb[1].mxu0 }
 0x155   :  { %v190_v11 = vpop.f32.mrb[2].mxu0 }
 0x156   :  { %197 = vst.msk [vmem:[#allocation2] sm:$0xff] %vm105_vm0, %v194_v9  ;;  %v195_v12 = vadd.f32 %v190_v11, %v109_v8  ;;  %v328_v13 = vpop.f32.mrb[3].mxu0 }
 0x158   :  { %198 = vst.msk [vmem:[#allocation2 + $0x8] sm:$0xff] %vm105_vm0, %v195_v12 }
 0x15d   :  { %v202_v17 = vld [vmem:[#allocation2] sm:$0xff] }
 0x15e   :  { %v211_v18 = vadd.f32 %v301_v15, %v202_v17 }
 0x15f   :  { %v203_v20 = vld [vmem:[#allocation2 + $0x8] sm:$0xff] }
 0x160   :  { %v217_v21 = vadd.f32 %v310_v16, %v211_v18  ;;  %v212_v22 = vadd.f32 %v301_v15, %v203_v20 }
 0x162   :  { %v219_v23 = vsel %vm105_vm0, %v217_v21, 0.0  ;;  %v218_v24 = vadd.f32 %v311_v19, %v212_v22 }
 0x163   :  { %220 = vadd.xlane.f32.xlu0 %v219_v23 }
 0x164   :  { %v222_v25 = vsel %vm105_vm0, %v218_v24, 0.0 }
 0x167   :  { %223 = vadd.xlane.f32.xlu0 %v222_v25 }
 0x1f0   :  { %v221_v26 = vpop.xlane.xlu0 %220 }
 0x1f1   :  { %v226_v27 = vmul.f32 0.03125, %v221_v26 }
 0x1f3   :  { %v228_v28 = vsub.f32 %v217_v21, %v226_v27 }
 0x1f4   :  { %v224_v29 = vpop.xlane.xlu0 %223 }
 0x1f5   :  { %v227_v30 = vmul.f32 0.03125, %v224_v29  ;;  %v230_v31 = vmul.f32 %v228_v28, %v228_v28 }
 0x1f7   :  { %v229_v32 = vsub.f32 %v218_v24, %v227_v30  ;;  %v232_v33 = vsel %vm105_vm0, %v230_v31, 0.0 }
 0x1f8   :  { %233 = vadd.xlane.f32.xlu1 %v232_v33 }
 0x1f9   :  { %v231_v34 = vmul.f32 %v229_v32, %v229_v32 }
 0x1fb   :  { %v235_v35 = vsel %vm105_vm0, %v231_v34, 0.0 }
 0x1fc   :  { %236 = vadd.xlane.f32.xlu1 %v235_v35 }
 0x285   :  { %v234_v36 = vpop.xlane.xlu1 %233 }
 0x286   :  { %v238_v37 = vmul.f32 0.03125, %v234_v36 }
 0x288   :  { %v240_v38 = vadd.f32 1e-12, %v238_v37 }
 0x289   :  { %v237_v39 = vpop.xlane.xlu1 %236 }
 0x28a   :  { %345 = vrsqrt.f32 %v240_v38  ;;  %v239_v40 = vmul.f32 0.03125, %v237_v39 }
 0x28c   :  { %v241_v41 = vadd.f32 1e-12, %v239_v40 }
 0x28e   :  { %347 = vrsqrt.f32 %v241_v41 }
 0x294   :  { %v346_v42 = vpop.eup %345 }
 0x295   :  { %v244_v44 = vmul.f32 %v346_v42, %v228_v28 }
 0x297   :  { %v253_v46 = vmul.f32 %v302_v43, %v244_v44 }
 0x298   :  { %v348_v47 = vpop.eup %347 }
 0x299   :  { %v245_v48 = vmul.f32 %v348_v47, %v229_v32  ;;  %v262_v49 = vadd.f32 %v303_v45, %v253_v46 }
 0x29b   :  { %v254_v50 = vmul.f32 %v302_v43, %v245_v48  ;;  %v306_v51 = vpack.c.bf16 %v262_v49, %v262_v49 }
 0x29d   :  { %v263_v52 = vadd.f32 %v303_v45, %v254_v50  ;;  %273 = vst.msk [vmem:[#allocation14] sm:$0xf] %vm272_vm3, %v306_v51 }
 0x29f   :  { %v307_v53 = vpack.c.bf16 %v263_v52, %v263_v52 }
 0x2a1   :  { %274 = vst.msk [vmem:[#allocation14 + $0x4] sm:$0xf] %vm272_vm3, %v307_v53 }
 0x2a2   :  { %492 = shalt.err (!%p489_p10)
}
 0x2a3   :  { %s493_s27 = scalar_lea.hbm %s676_s6, 128 }
 0x2a4   :  { %p494_p11 = scmp.ne.s32.totalorder %s676_s6, %s493_s27  ;;  %p497_p12 = scmp.lt.u32.totalorder %s493_s27, %s676_s6 }
 0x2a6   :  { %p499_p13 = pnand %p497_p12, %p494_p11 }
 0x2a8   :  { %502 = shalt.err (!%p499_p13)
}
 0x2a9   :  { %286 = dma.vmem_to_hbm [thread:$0]  %s281_s21, 128, %s676_s6, [#allocation5], %s515_s9, %s515_s9, %s516_s10  }
 0x2aa   :  { %511 = dma.done.wait [#allocation5], 128  }
 0x2ab   :  { %512 = vsyncadd [#allocation5], 4294967168 }
 0x2ac   :  { %290 = vsyncpa [#allocation4], 1 }
 0x2ad   :  { %291 = vsyncpa [#allocation7], 1 }
 0x2ae   :  { %292 = vsyncpa [#allocation10], 1 }
 0x2af   :  { %293 = vsyncpa [#allocation13], 1 }
 0x2b0   :  { %294 = vsyncpa [#allocation5], 1 }

// kernel: model_forward.23
= control target key start
LH: loop header
LB: loop body
LE: loop exit
PB: predicated region body
PF: predicated region fallthrough
CT: control target
= control target key end

     0   :  { %14 = vsyncpa [#allocation3], 0  ;;  %s2163_s0 = inlined_call_operand.hbm [shape: bf16[2,8,32], index: 0, kind: input, shape index: {}]   ;;  %s2164_s1 = inlined_call_operand.hbm [shape: bf16[3,32,128], index: 1, kind: input, shape index: {}]   ;;  %s2165_s2 = inlined_call_operand.hbm [shape: f32[1,128], index: 2, kind: input, shape index: {}]   ;;  %s2166_s3 = inlined_call_operand.hbm [shape: bf16[4,32,128], index: 3, kind: input, shape index: {}]   ;;  %s2167_s4 = inlined_call_operand.hbm [shape: f32[1,128], index: 4, kind: input, shape index: {}]   ;;  %s2168_s5 = inlined_call_operand.hbm [shape: bf16[5,32,128], index: 5, kind: input, shape index: {}]   ;;  %s2169_s6 = inlined_call_operand.hbm [shape: f32[1,128], index: 6, kind: input, shape index: {}]   ;;  %s2170_s7 = inlined_call_operand.hbm [shape: bf16[384,128], index: 7, kind: input, shape index: {}]   ;;  %s2171_s8 = inlined_call_operand.hbm [shape: f32[1,128], index: 8, kind: input, shape index: {}]   ;;  %s2172_s9 = inlined_call_operand.hbm [shape: f32[2,128], index: 9, kind: output, shape index: {}]  }
   0x1   :  { %15 = vsyncpa [#allocation6], 0 }
   0x2   :  { %16 = vsyncpa [#allocation9], 0 }
   0x3   :  { %17 = vsyncpa [#allocation12], 0 }
   0x4   :  { %18 = vsyncpa [#allocation15], 0 }
   0x5   :  { %19 = vsyncpa [#allocation4], 0  ;;  %s1850_s30 = smov [#allocation5]   ;;  %s1851_s11 = smov [#allocation8]  }
   0x6   :  { %s37_s10 = sshll.u32 %s1850_s30, 4  ;;  %s59_s12 = sshll.u32 %s1851_s11, 4  ;;  %s38_s10 = int_to_ptr.vmem [resolvable:$true] %s37_s10  ;;  %s1914_s12 = int_to_ptr.vmem [resolvable:$true] %s59_s12 }
   0x7   :  { %s1618_s15 = scalar_lea.hbm %s2164_s1, 768 }
   0x8   :  { %p1619_p0 = scmp.ne.s32.totalorder %s2164_s1, %s1618_s15  ;;  %p1622_p1 = scmp.lt.u32.totalorder %s1618_s15, %s2164_s1 }
   0xa   :  { %p1624_p2 = pnand %p1622_p1, %p1619_p0 }
   0xc   :  { %1627 = shalt.err (!%p1624_p2)
}
   0xd   :  { %s1628_s20 = scalar_lea.vmem %s38_s10, 768  ;;  %p1633_p4 = scmp.lt.s32.totalorder %s38_s10, %s38_s10 }
   0xe   :  { %p1629_p3 = scmp.ne.s32.totalorder %s38_s10, %s1628_s20  ;;  %p1634_p5 = scmp.lt.s32.totalorder %s1628_s20, %s1628_s20 }
  0x10   :  { %p1635_p6 = por %p1634_p5, %p1633_p4 }
  0x12   :  { %p1636_p7 = pnand %p1635_p6, %p1629_p3 }
  0x14   :  { %1639 = shalt.err (!%p1636_p7)
}
  0x15   :  { %s1852_s21 = smov 64   ;;  %s1853_s22 = smov 4  }
  0x16   :  { %43 = dma.hbm_to_vmem [thread:$0]  %s2164_s1, 768, %s38_s10, [#allocation6], %s1852_s21, %s1852_s21, %s1853_s22  }
  0x17   :  { %s1640_s27 = scalar_lea.hbm %s2166_s3, 1024 }
  0x18   :  { %p1641_p8 = scmp.ne.s32.totalorder %s2166_s3, %s1640_s27  ;;  %p1644_p9 = scmp.lt.u32.totalorder %s1640_s27, %s2166_s3 }
  0x1a   :  { %p1646_p10 = pnand %p1644_p9, %p1641_p8 }
  0x1c   :  { %1649 = shalt.err (!%p1646_p10)
}
  0x1d   :  { %s1650_s13 = scalar_lea.vmem %s1914_s12, 1024  ;;  %p1655_p12 = scmp.lt.s32.totalorder %s1914_s12, %s1914_s12 }
  0x1e   :  { %p1651_p11 = scmp.ne.s32.totalorder %s1914_s12, %s1650_s13  ;;  %p1656_p13 = scmp.lt.s32.totalorder %s1650_s13, %s1650_s13 }
  0x20   :  { %p1657_p0 = por %p1656_p13, %p1655_p12 }
  0x22   :  { %p1658_p1 = pnand %p1657_p0, %p1651_p11 }
  0x24   :  { %1661 = shalt.err (!%p1658_p1)
}
  0x25   :  { %65 = dma.hbm_to_vmem [thread:$0]  %s2166_s3, 1024, %s1914_s12, [#allocation9], %s1852_s21, %s1852_s21, %s1853_s22  }
  0x26   :  { %s1854_s14 = smov [#allocation11]   ;;  %s1855_s16 = smov [#allocation14]  }
  0x27   :  { %s81_s15 = sshll.u32 %s1854_s14, 4  ;;  %s103_s17 = sshll.u32 %s1855_s16, 4  ;;  %s82_s15 = int_to_ptr.vmem [resolvable:$true] %s81_s15  ;;  %s1951_s17 = int_to_ptr.vmem [resolvable:$true] %s103_s17 }
  0x28   :  { %s1662_s20 = scalar_lea.hbm %s2168_s5, 1280 }
  0x29   :  { %p1663_p2 = scmp.ne.s32.totalorder %s2168_s5, %s1662_s20  ;;  %p1666_p3 = scmp.lt.u32.totalorder %s1662_s20, %s2168_s5 }
  0x2b   :  { %p1668_p4 = pnand %p1666_p3, %p1663_p2 }
  0x2d   :  { %1671 = shalt.err (!%p1668_p4)
}
  0x2e   :  { %s1672_s3 = scalar_lea.vmem %s82_s15, 1280  ;;  %p1677_p6 = scmp.lt.s32.totalorder %s82_s15, %s82_s15 }
  0x2f   :  { %p1673_p5 = scmp.ne.s32.totalorder %s82_s15, %s1672_s3  ;;  %p1678_p7 = scmp.lt.s32.totalorder %s1672_s3, %s1672_s3 }
  0x31   :  { %p1679_p8 = por %p1678_p7, %p1677_p6 }
  0x33   :  { %p1680_p9 = pnand %p1679_p8, %p1673_p5 }
  0x35   :  { %1683 = shalt.err (!%p1680_p9)
}
  0x36   :  { %87 = dma.hbm_to_vmem [thread:$0]  %s2168_s5, 1280, %s82_s15, [#allocation12], %s1852_s21, %s1852_s21, %s1853_s22  }
  0x37   :  { %s1684_s30 = scalar_lea.hbm %s2170_s7, 3072 }
  0x38   :  { %p1685_p10 = scmp.ne.s32.totalorder %s2170_s7, %s1684_s30  ;;  %p1688_p11 = scmp.lt.u32.totalorder %s1684_s30, %s2170_s7 }
  0x3a   :  { %p1690_p12 = pnand %p1688_p11, %p1685_p10 }
  0x3c   :  { %1693 = shalt.err (!%p1690_p12)
}
  0x3d   :  { %s1694_s14 = scalar_lea.vmem %s1951_s17, 3072  ;;  %p1699_p0 = scmp.lt.s32.totalorder %s1951_s17, %s1951_s17 }
  0x3e   :  { %p1695_p13 = scmp.ne.s32.totalorder %s1951_s17, %s1694_s14  ;;  %p1700_p1 = scmp.lt.s32.totalorder %s1694_s14, %s1694_s14 }
  0x40   :  { %p1701_p2 = por %p1700_p1, %p1699_p0 }
  0x42   :  { %p1702_p3 = pnand %p1701_p2, %p1695_p13 }
  0x44   :  { %1705 = shalt.err (!%p1702_p3)
}
  0x45   :  { %109 = dma.hbm_to_vmem [thread:$0]  %s2170_s7, 3072, %s1951_s17, [#allocation15], %s1852_s21, %s1852_s21, %s1853_s22  }
  0x46   :  { %s1856_s16 = smov [#allocation2]   ;;  %s1857_s19 = smov [#allocation7]  }
  0x47   :  { %s25_s18 = sshll.u32 %s1856_s16, 4  ;;  %s50_s20 = sshll.u32 %s1857_s19, 4  ;;  %s26_s18 = int_to_ptr.vmem [resolvable:$true] %s25_s18  ;;  %s51_s20 = int_to_ptr.vmem [resolvable:$true] %s50_s20 }
  0x48   :  { %s1706_s25 = scalar_lea.hbm %s2163_s0, 128 }
  0x49   :  { %p1707_p4 = scmp.ne.s32.totalorder %s2163_s0, %s1706_s25  ;;  %p1710_p5 = scmp.lt.u32.totalorder %s1706_s25, %s2163_s0 }
  0x4b   :  { %p1712_p6 = pnand %p1710_p5, %p1707_p4 }
  0x4d   :  { %1715 = shalt.err (!%p1712_p6)
}
  0x4e   :  { %s1716_s7 = scalar_lea.vmem %s26_s18, 128  ;;  %p1721_p8 = scmp.lt.s32.totalorder %s26_s18, %s26_s18 }
  0x4f   :  { %p1717_p7 = scmp.ne.s32.totalorder %s26_s18, %s1716_s7  ;;  %p1722_p9 = scmp.lt.s32.totalorder %s1716_s7, %s1716_s7 }
  0x51   :  { %p1723_p10 = por %p1722_p9, %p1721_p8 }
  0x53   :  { %p1724_p11 = pnand %p1723_p10, %p1717_p7 }
  0x55   :  { %1727 = shalt.err (!%p1724_p11)
}
  0x56   :  { %31 = dma.hbm_to_vmem [thread:$0]  %s2163_s0, 128, %s26_s18, [#allocation3], %s1852_s21, %s1852_s21, %s1853_s22  }
  0x57   :  { %s1728_s11 = scalar_lea.hbm %s2165_s2, 16 }
  0x58   :  { %p1729_p12 = scmp.ne.s32.totalorder %s2165_s2, %s1728_s11  ;;  %p1732_p13 = scmp.lt.u32.totalorder %s1728_s11, %s2165_s2 }
  0x5a   :  { %p1734_p0 = pnand %p1732_p13, %p1729_p12 }
  0x5c   :  { %1737 = shalt.err (!%p1734_p0)
}
  0x5d   :  { %s1738_s5 = scalar_lea.vmem %s51_s20, 16  ;;  %s1742_s15 = scalar_lea.vmem %s51_s20, 32 }
  0x5e   :  { %p1739_p1 = scmp.ne.s32.totalorder %s51_s20, %s1738_s5  ;;  %p1743_p2 = scmp.lt.s32.totalorder %s51_s20, %s51_s20 }
  0x5f   :  { %p1744_p3 = scmp.lt.s32.totalorder %s1742_s15, %s1738_s5 }
  0x61   :  { %p1745_p4 = por %p1744_p3, %p1743_p2 }
  0x63   :  { %p1746_p5 = pnand %p1745_p4, %p1739_p1 }
  0x65   :  { %1749 = shalt.err (!%p1746_p5)
}
  0x66   :  { %53 = dma.hbm_to_vmem [thread:$0]  %s2165_s2, 16, %s51_s20, [#allocation6]  }
  0x67   :  { %s1858_s22 = smov [#allocation10]   ;;  %s1859_s18 = smov [#allocation13]  }
  0x68   :  { %s72_s16 = sshll.u32 %s1858_s22, 4  ;;  %s94_s19 = sshll.u32 %s1859_s18, 4  ;;  %s73_s16 = int_to_ptr.vmem [resolvable:$true] %s72_s16  ;;  %s95_s19 = int_to_ptr.vmem [resolvable:$true] %s94_s19 }
  0x69   :  { %s1750_s25 = scalar_lea.hbm %s2167_s4, 16 }
  0x6a   :  { %p1751_p6 = scmp.ne.s32.totalorder %s2167_s4, %s1750_s25  ;;  %p1754_p7 = scmp.lt.u32.totalorder %s1750_s25, %s2167_s4 }
  0x6c   :  { %p1756_p8 = pnand %p1754_p7, %p1751_p6 }
  0x6e   :  { %1759 = shalt.err (!%p1756_p8)
}
  0x6f   :  { %s1760_s2 = scalar_lea.vmem %s73_s16, 16  ;;  %s1764_s20 = scalar_lea.vmem %s73_s16, 32 }
  0x70   :  { %p1761_p9 = scmp.ne.s32.totalorder %s73_s16, %s1760_s2  ;;  %p1765_p10 = scmp.lt.s32.totalorder %s73_s16, %s73_s16 }
  0x71   :  { %p1766_p11 = scmp.lt.s32.totalorder %s1764_s20, %s1760_s2 }
  0x73   :  { %p1767_p12 = por %p1766_p11, %p1765_p10 }
  0x75   :  { %p1768_p13 = pnand %p1767_p12, %p1761_p9 }
  0x77   :  { %1771 = shalt.err (!%p1768_p13)
}
  0x78   :  { %75 = dma.hbm_to_vmem [thread:$0]  %s2167_s4, 16, %s73_s16, [#allocation9]  }
  0x79   :  { %s1772_s30 = scalar_lea.hbm %s2169_s6, 16 }
  0x7a   :  { %p1773_p0 = scmp.ne.s32.totalorder %s2169_s6, %s1772_s30  ;;  %p1776_p1 = scmp.lt.u32.totalorder %s1772_s30, %s2169_s6 }
  0x7c   :  { %p1778_p2 = pnand %p1776_p1, %p1773_p0 }
  0x7e   :  { %1781 = shalt.err (!%p1778_p2)
}
  0x7f   :  { %s1782_s14 = scalar_lea.vmem %s95_s19, 16  ;;  %s1786_s5 = scalar_lea.vmem %s95_s19, 32 }
  0x80   :  { %p1783_p3 = scmp.ne.s32.totalorder %s95_s19, %s1782_s14  ;;  %p1787_p4 = scmp.lt.s32.totalorder %s95_s19, %s95_s19 }
  0x81   :  { %p1788_p5 = scmp.lt.s32.totalorder %s1786_s5, %s1782_s14 }
  0x83   :  { %p1789_p6 = por %p1788_p5, %p1787_p4 }
  0x85   :  { %p1790_p7 = pnand %p1789_p6, %p1783_p3 }
  0x87   :  { %1793 = shalt.err (!%p1790_p7)
}
  0x88   :  { %97 = dma.hbm_to_vmem [thread:$0]  %s2169_s6, 16, %s95_s19, [#allocation12]  }
  0x89   :  { %s1860_s0 = smov [#allocation16]   ;;  %s1794_s18 = scalar_lea.hbm %s2171_s8, 16 }
  0x8a   :  { %s116_s21 = sshll.u32 %s1860_s0, 4  ;;  %p1795_p8 = scmp.ne.s32.totalorder %s2171_s8, %s1794_s18  ;;  %s117_s21 = int_to_ptr.vmem [resolvable:$true] %s116_s21 }
  0x8b   :  { %p1798_p9 = scmp.lt.u32.totalorder %s1794_s18, %s2171_s8 }
  0x8d   :  { %p1800_p10 = pnand %p1798_p9, %p1795_p8 }
  0x8f   :  { %1803 = shalt.err (!%p1800_p10)
}
  0x90   :  { %s1804_s3 = scalar_lea.vmem %s117_s21, 16  ;;  %s1808_s6 = scalar_lea.vmem %s117_s21, 32 }
  0x91   :  { %p1805_p11 = scmp.ne.s32.totalorder %s117_s21, %s1804_s3  ;;  %p1809_p12 = scmp.lt.s32.totalorder %s117_s21, %s117_s21 }
  0x92   :  { %p1810_p13 = scmp.lt.s32.totalorder %s1808_s6, %s1804_s3 }
  0x94   :  { %p1811_p0 = por %p1810_p13, %p1809_p12 }
  0x96   :  { %p1812_p1 = pnand %p1811_p0, %p1805_p11 }
  0x98   :  { %1815 = shalt.err (!%p1812_p1)
}
  0x99   :  { %119 = dma.hbm_to_vmem [thread:$0]  %s2171_s8, 16, %s117_s21, [#allocation15]  }
  0x9a   :  { %1838 = dma.done.wait [#allocation3], 128  }
  0x9b   :  { %1839 = vsyncadd [#allocation3], 4294967168 }
  0x9c   :  { %1840 = dma.done.wait [#allocation6], 784  }
  0x9d   :  { %1841 = vsyncadd [#allocation6], 4294966512 }
  0x9e   :  { %1842 = dma.done.wait [#allocation9], 1040  }
  0x9f   :  { %1843 = vsyncadd [#allocation9], 4294966256 }
  0xa0   :  { %1844 = dma.done.wait [#allocation12], 1296  }
  0xa1   :  { %1845 = vsyncadd [#allocation12], 4294966000 }
  0xa2   :  { %1846 = dma.done.wait [#allocation15], 3088  }
  0xa3   :  { %1847 = vsyncadd [#allocation15], 4294964208  ;;  %v1861_v0 = vmov 0.0   ;;  %vm1862_vm0 = vmmov 0   ;;  %v1557_v1 = vld [vmem:[#allocation5] sm:$0xff]   ;;  %v1558_v2 = vld [vmem:[#allocation5 + $0x10] sm:$0xff]  }
  0xa4   :  { %1427 = vmatprep.subr.bf16.mxu0 %v1861_v0  ;;  %1435 = vmatprep.subr.bf16.mxu1 %v1861_v0  ;;  %v1559_v3 = vld [vmem:[#allocation5 + $0x8] sm:$0xff]   ;;  %v1560_v4 = vld [vmem:[#allocation5 + $0x18] sm:$0xff]   ;;  %vm171_vm1 = vcmask 261120   ;;  %v1562_v6 = vld [vmem:[#allocation5 + $0x20] sm:$0xff]   ;;  %vm982_vm3 = vcmask 1041409   ;;  %s1863_s8 = smov [#allocation17]  }
  0xa5   :  { %1431 = vmatprep.mubr.msk.bf16.mxu0 %vm1862_vm0, %v1861_v0  ;;  %1439 = vmatprep.mubr.msk.bf16.mxu1 %vm1862_vm0, %v1861_v0  ;;  %v2059_v5 = vld [vmem:[#allocation2] sm:$0xff]   ;;  %v1564_v8 = vld [vmem:[#allocation5 + $0x28] sm:$0xff]   ;;  %s1282_s27 = sshll.u32 %s1863_s8, 4  ;;  %s1283_s27 = int_to_ptr.vmem [resolvable:$true] %s1282_s27 }
  0xa6   :  { %1428 = vmatpush3.bf16.msra.mxu0 %v1557_v1  ;;  %1436 = vmatpush3.bf16.msra.mxu1 %v1558_v2  ;;  %v1563_v7 = vld [vmem:[#allocation8] sm:$0xff]   ;;  %v1565_v9 = vld [vmem:[#allocation8 + $0x8] sm:$0xff]   ;;  %v1566_v10 = vld [vmem:[#allocation8 + $0x10] sm:$0xff]   ;;  %s1816_s2 = scalar_lea.vmem %s1283_s27, 32  ;;  %p1821_p3 = scmp.lt.s32.totalorder %s1283_s27, %s1283_s27 }
  0xa7   :  { %1429 = vmatprep.subr.bf16.mxu0 %v1861_v0  ;;  %1437 = vmatprep.subr.bf16.mxu1 %v1861_v0  ;;  %v1567_v11 = vld [vmem:[#allocation8 + $0x20] sm:$0xff]   ;;  %v1568_v12 = vld [vmem:[#allocation8 + $0x18] sm:$0xff]   ;;  %v1569_v13 = vld [vmem:[#allocation8 + $0x28] sm:$0xff]   ;;  %p1817_p2 = scmp.ne.s32.totalorder %s1283_s27, %s1816_s2  ;;  %p1822_p4 = scmp.lt.s32.totalorder %s1816_s2, %s1816_s2 }
  0xa8   :  { %v1570_v14 = vld [vmem:[#allocation8 + $0x30] sm:$0xff]   ;;  %v1571_v15 = vld [vmem:[#allocation11] sm:$0xff]   ;;  %v1572_v16 = vld [vmem:[#allocation8 + $0x38] sm:$0xff]  }
  0xa9   :  { %v1573_v17 = vld [vmem:[#allocation11 + $0x8] sm:$0xff]   ;;  %v1574_v18 = vld [vmem:[#allocation11 + $0x10] sm:$0xff]   ;;  %v1575_v19 = vld [vmem:[#allocation11 + $0x20] sm:$0xff]   ;;  %p1823_p5 = por %p1822_p4, %p1821_p3 }
  0xaa   :  { %1430 = vmatpush3.bf16.msra.mxu0 %v1559_v3  ;;  %1438 = vmatpush3.bf16.msra.mxu1 %v1560_v4  ;;  %v1576_v20 = vld [vmem:[#allocation11 + $0x18] sm:$0xff]   ;;  %v1577_v21 = vld [vmem:[#allocation11 + $0x28] sm:$0xff]   ;;  %v1578_v22 = vld [vmem:[#allocation11 + $0x30] sm:$0xff]  }
  0xab   :  { %1443 = vmatprep.subr.bf16.mxu0 %v1861_v0  ;;  %1451 = vmatprep.subr.bf16.mxu1 %v1861_v0  ;;  %v1579_v23 = vld [vmem:[#allocation11 + $0x40] sm:$0xff]   ;;  %v1580_v24 = vld [vmem:[#allocation11 + $0x38] sm:$0xff]   ;;  %v1581_v25 = vld [vmem:[#allocation11 + $0x48] sm:$0xff]   ;;  %p1824_p6 = pnand %p1823_p5, %p1817_p2 }
  0xac   :  { %v1582_v26 = vld [vmem:[#allocation14 + $0x40] sm:$0xff]   ;;  %v1584_v28 = vld [vmem:[#allocation14 + $0x48] sm:$0xff]   ;;  %v1586_v30 = vld [vmem:[#allocation14 + $0x50] sm:$0xff]  }
  0xad   :  { %1432 = vmatmul.mubr.msk.bf16.vlgmr.msra.gmra.mrb[0].mxu0 %vm171_vm1, %v2059_v5  ;;  %1440 = vmatmul.mubr.msk.bf16.vlgmr.msra.gmra.mrb[0].mxu1 %vm171_vm1, %v2059_v5  ;;  %v1583_v27 = vld [vmem:[#allocation14] sm:$0xff]   ;;  %v1585_v29 = vld [vmem:[#allocation14 + $0x8] sm:$0xff]   ;;  %v1587_v31 = vld [vmem:[#allocation14 + $0x10] sm:$0xff]  }
  0xae   :  { %1444 = vmatpush3.bf16.msra.mxu0 %v1562_v6  ;;  %1452 = vmatpush3.bf16.msra.mxu1 %v1563_v7  ;;  %v1588_v32 = vld [vmem:[#allocation14 + $0x58] sm:$0xff]   ;;  %v1590_v34 = vld [vmem:[#allocation14 + $0x60] sm:$0xff]   ;;  %v1593_v37 = vld [vmem:[#allocation14 + $0x68] sm:$0xff]  }
  0xaf   :  { %1445 = vmatprep.subr.bf16.mxu0 %v1861_v0  ;;  %1453 = vmatprep.subr.bf16.mxu1 %v1861_v0  ;;  %v1589_v33 = vld [vmem:[#allocation14 + $0x18] sm:$0xff]   ;;  %v1591_v35 = vld [vmem:[#allocation14 + $0x20] sm:$0xff]   ;;  %v1594_v38 = vld [vmem:[#allocation14 + $0x28] sm:$0xff]  }
  0xb0   :  { %1447 = vmatprep.mubr.msk.bf16.mxu0 %vm1862_vm0, %v1861_v0  ;;  %1455 = vmatprep.mubr.msk.bf16.mxu1 %vm1862_vm0, %v1861_v0  ;;  %v1592_v36 = vld [vmem:[#allocation14 + $0x80] sm:$0xff]   ;;  %v1595_v39 = vld [vmem:[#allocation14 + $0x88] sm:$0xff]   ;;  %v1596_v40 = vld [vmem:[#allocation14 + $0x70] sm:$0xff]  }
  0xb1   :  { %v1597_v41 = vld [vmem:[#allocation14 + $0x30] sm:$0xff]   ;;  %v1599_v43 = vld [vmem:[#allocation14 + $0x78] sm:$0xff]   ;;  %v1602_v46 = vld [vmem:[#allocation14 + $0xa0] sm:$0xff]  }
  0xb2   :  { %1446 = vmatpush3.bf16.msra.mxu0 %v1564_v8  ;;  %1454 = vmatpush3.bf16.msra.mxu1 %v1565_v9  ;;  %v1598_v42 = vld [vmem:[#allocation14 + $0x90] sm:$0xff]   ;;  %v1600_v44 = vld [vmem:[#allocation14 + $0x38] sm:$0xff]   ;;  %v1603_v47 = vld [vmem:[#allocation14 + $0xa8] sm:$0xff]  }
  0xb3   :  { %1459 = vmatprep.subr.bf16.mxu0 %v1861_v0  ;;  %1467 = vmatprep.subr.bf16.mxu1 %v1861_v0  ;;  %v1601_v45 = vld [vmem:[#allocation14 + $0x98] sm:$0xff]   ;;  %v1604_v48 = vld [vmem:[#allocation14 + $0xb0] sm:$0xff]   ;;  %v1305_v3 = vld [vmem:[#allocation7] ss:$0 sm:$0xff] }
  0xb4   :  { %v1605_v49 = vld [vmem:[#allocation14 + $0xb8] sm:$0xff]  }
  0xb5   :  { %1448 = vmatmul.mubr.msk.bf16.vlgmr.msra.gmra.mrb[4].mxu0 %vm171_vm1, %v2059_v5  ;;  %1456 = vmatmul.mubr.msk.bf16.vlgmr.msra.gmra.mrb[4].mxu1 %vm171_vm1, %v2059_v5 }
  0xb6   :  { %1460 = vmatpush3.bf16.msra.mxu0 %v1566_v10  ;;  %1468 = vmatpush3.bf16.msra.mxu1 %v1567_v11 }
  0xb7   :  { %1461 = vmatprep.subr.bf16.mxu0 %v1861_v0  ;;  %1469 = vmatprep.subr.bf16.mxu1 %v1861_v0 }
  0xb8   :  { %1463 = vmatprep.mubr.msk.bf16.mxu0 %vm1862_vm0, %v1861_v0  ;;  %1471 = vmatprep.mubr.msk.bf16.mxu1 %vm1862_vm0, %v1861_v0 }
  0xba   :  { %1462 = vmatpush3.bf16.msra.mxu0 %v1568_v12  ;;  %1470 = vmatpush3.bf16.msra.mxu1 %v1569_v13  ;;  %v353_v12 = vlaneseq }
  0xbb   :  { %1475 = vmatprep.subr.bf16.mxu0 %v1861_v0  ;;  %1483 = vmatprep.subr.bf16.mxu1 %v1861_v0 }
  0xbd   :  { %1464 = vmatmul.mubr.msk.bf16.vlgmr.msra.gmra.mrb[8].mxu0 %vm171_vm1, %v2059_v5  ;;  %1472 = vmatmul.mubr.msk.bf16.vlgmr.msra.gmra.mrb[8].mxu1 %vm171_vm1, %v2059_v5 }
  0xbe   :  { %1476 = vmatpush3.bf16.msra.mxu0 %v1570_v14  ;;  %1484 = vmatpush3.bf16.msra.mxu1 %v1571_v15 }
  0xbf   :  { %1477 = vmatprep.subr.bf16.mxu0 %v1861_v0  ;;  %1485 = vmatprep.subr.bf16.mxu1 %v1861_v0 }
  0xc0   :  { %1479 = vmatprep.mubr.msk.bf16.mxu0 %vm1862_vm0, %v1861_v0  ;;  %1487 = vmatprep.mubr.msk.bf16.mxu1 %vm1862_vm0, %v1861_v0 }
  0xc2   :  { %1478 = vmatpush3.bf16.msra.mxu0 %v1572_v16  ;;  %1486 = vmatpush3.bf16.msra.mxu1 %v1573_v17 }
  0xc3   :  { %1491 = vmatprep.subr.bf16.mxu0 %v1861_v0  ;;  %1499 = vmatprep.subr.bf16.mxu1 %v1861_v0 }
  0xc5   :  { %1480 = vmatmul.mubr.msk.bf16.vlgmr.msra.gmra.mrb[12].mxu0 %vm171_vm1, %v2059_v5  ;;  %1488 = vmatmul.mubr.msk.bf16.vlgmr.msra.gmra.mrb[12].mxu1 %vm171_vm1, %v2059_v5 }
  0xc6   :  { %1492 = vmatpush3.bf16.msra.mxu0 %v1574_v18  ;;  %1500 = vmatpush3.bf16.msra.mxu1 %v1575_v19 }
  0xc7   :  { %1493 = vmatprep.subr.bf16.mxu0 %v1861_v0  ;;  %1501 = vmatprep.subr.bf16.mxu1 %v1861_v0 }
  0xc8   :  { %1495 = vmatprep.mubr.msk.bf16.mxu0 %vm1862_vm0, %v1861_v0  ;;  %1503 = vmatprep.mubr.msk.bf16.mxu1 %vm1862_vm0, %v1861_v0 }
  0xca   :  { %1494 = vmatpush3.bf16.msra.mxu0 %v1576_v20  ;;  %1502 = vmatpush3.bf16.msra.mxu1 %v1577_v21  ;;  %v2135_v21 = vshrl.u32 %v353_v12, 7 }
  0xcb   :  { %1507 = vmatprep.subr.bf16.mxu0 %v1861_v0  ;;  %1515 = vmatprep.subr.bf16.mxu1 %v1861_v0 }
  0xcc   :  { %vm355_vm2 = vcmp.lt.s32.totalorder %v2135_v21, 6  ;;  %vm628_vm4 = vcmp.lt.s32.totalorder %v2135_v21, 5  ;;  %vm963_vm5 = vcmp.lt.s32.totalorder %v2135_v21, 4 }
  0xcd   :  { %1496 = vmatmul.mubr.msk.bf16.vlgmr.msra.gmra.mrb[16].mxu0 %vm171_vm1, %v2059_v5  ;;  %1504 = vmatmul.mubr.msk.bf16.vlgmr.msra.gmra.mrb[16].mxu1 %vm171_vm1, %v2059_v5 }
  0xce   :  { %1508 = vmatpush3.bf16.msra.mxu0 %v1578_v22  ;;  %1516 = vmatpush3.bf16.msra.mxu1 %v1579_v23 }
  0xcf   :  { %1509 = vmatprep.subr.bf16.mxu0 %v1861_v0  ;;  %1517 = vmatprep.subr.bf16.mxu1 %v1861_v0 }
  0xd0   :  { %1511 = vmatprep.mubr.msk.bf16.mxu0 %vm1862_vm0, %v1861_v0  ;;  %1519 = vmatprep.mubr.msk.bf16.mxu1 %vm1862_vm0, %v1861_v0 }
  0xd2   :  { %1510 = vmatpush3.bf16.msra.mxu0 %v1580_v24  ;;  %1518 = vmatpush3.bf16.msra.mxu1 %v1581_v25 }
  0xd3   :  { %1523 = vmatprep.subr.bf16.mxu1 %v1861_v0  ;;  %1396 = vmatprep.subr.bf16.mxu0 %v1582_v26 }
  0xd5   :  { %1512 = vmatmul.mubr.msk.bf16.vlgmr.msra.gmra.mrb[20].mxu0 %vm171_vm1, %v2059_v5  ;;  %1520 = vmatmul.mubr.msk.bf16.vlgmr.msra.gmra.mrb[20].mxu1 %vm171_vm1, %v2059_v5 }
  0xd6   :  { %1539 = vmatprep.mubr.msk.bf16.mxu1 %vm1862_vm0, %v1861_v0  ;;  %1397 = vmatpush3.bf16.msra.mxu0 %v1583_v27 }
  0xd7   :  { %1398 = vmatprep.subr.bf16.mxu0 %v1584_v28  ;;  %1524 = vmatpush3.bf16.msra.mxu1 %v1592_v36 }
  0xd8   :  { %1525 = vmatprep.subr.bf16.mxu1 %v1861_v0 }
  0xda   :  { %1399 = vmatpush3.bf16.msra.mxu0 %v1585_v29 }
  0xdb   :  { %1400 = vmatprep.subr.bf16.mxu0 %v1586_v30  ;;  %1526 = vmatpush3.bf16.msra.mxu1 %v1595_v39 }
  0xdc   :  { %1527 = vmatprep.subr.bf16.mxu1 %v1861_v0 }
  0xde   :  { %1401 = vmatpush3.bf16.msra.mxu0 %v1587_v31 }
  0xdf   :  { %1402 = vmatprep.subr.bf16.mxu0 %v1588_v32  ;;  %1528 = vmatpush3.bf16.msra.mxu1 %v1598_v42 }
  0xe0   :  { %1529 = vmatprep.subr.bf16.mxu1 %v1861_v0 }
  0xe2   :  { %1403 = vmatpush3.bf16.msra.mxu0 %v1589_v33 }
  0xe3   :  { %1404 = vmatprep.subr.bf16.mxu0 %v1590_v34  ;;  %1530 = vmatpush3.bf16.msra.mxu1 %v1601_v45 }
  0xe4   :  { %1531 = vmatprep.subr.bf16.mxu1 %v1861_v0 }
  0xe6   :  { %1405 = vmatpush3.bf16.msra.mxu0 %v1591_v35 }
  0xe7   :  { %1406 = vmatprep.subr.bf16.mxu0 %v1593_v37  ;;  %1532 = vmatpush3.bf16.msra.mxu1 %v1602_v46  ;;  %v1318_v37 = vld [vmem:[#allocation10] ss:$0 sm:$0xff] }
  0xe8   :  { %1533 = vmatprep.subr.bf16.mxu1 %v1861_v0 }
  0xea   :  { %1407 = vmatpush3.bf16.msra.mxu0 %v1594_v38 }
  0xeb   :  { %1408 = vmatprep.subr.bf16.mxu0 %v1596_v40  ;;  %1534 = vmatpush3.bf16.msra.mxu1 %v1603_v47 }
  0xec   :  { %1535 = vmatprep.subr.bf16.mxu1 %v1861_v0 }
  0xee   :  { %1409 = vmatpush3.bf16.msra.mxu0 %v1597_v41 }
  0xef   :  { %1410 = vmatprep.subr.bf16.mxu0 %v1599_v43  ;;  %1536 = vmatpush3.bf16.msra.mxu1 %v1604_v48 }
  0xf0   :  { %1537 = vmatprep.subr.bf16.mxu1 %v1861_v0 }
  0xf2   :  { %1411 = vmatpush3.bf16.msra.mxu0 %v1600_v44 }
  0xf3   :  { %1538 = vmatpush3.bf16.msra.mxu1 %v1605_v49 }
 0x180   :  { %v209_v50 = vpop.f32.mrb[0].mxu0  ;;  %v269_v51 = vpop.f32.mrb[0].mxu1 }
 0x181   :  { %v1433_v52 = vpop.f32.mrb[1].mxu0  ;;  %v276_v53 = vrot.slane %v269_v51, 1  ;;  %v1441_v54 = vpop.f32.mrb[1].mxu1 }
 0x182   :  { %v212_v55 = vpop.f32.mrb[2].mxu0  ;;  %v272_v56 = vpop.f32.mrb[2].mxu1 }
 0x183   :  { %v1434_v57 = vpop.f32.mrb[3].mxu0  ;;  %v278_v58 = vadd.f32 %v276_v53, %v209_v50  ;;  %v277_v59 = vrot.slane %v272_v56, 1  ;;  %v1442_v60 = vpop.f32.mrb[3].mxu1 }
 0x185   :  { %v279_v61 = vadd.f32 %v277_v59, %v212_v55 }
 0x188   :  { %v331_v62 = vpop.f32.mrb[4].mxu0  ;;  %v422_v1 = vpop.f32.mrb[4].mxu1 }
 0x189   :  { %v338_v63 = vrot.slane %v331_v62, 2  ;;  %v1449_v2 = vpop.f32.mrb[5].mxu0  ;;  %v1457_v4 = vpop.f32.mrb[5].mxu1 }
 0x18a   :  { %v334_v0 = vpop.f32.mrb[6].mxu0  ;;  %v425_v7 = vpop.f32.mrb[6].mxu1 }
 0x18b   :  { %v340_v5 = vadd.f32 %v338_v63, %v278_v58  ;;  %v339_v6 = vrot.slane %v334_v0, 2  ;;  %v1450_v8 = vpop.f32.mrb[7].mxu0  ;;  %v1458_v9 = vpop.f32.mrb[7].mxu1 }
 0x18d   :  { %v349_v10 = vadd.f32 %v1305_v3, %v340_v5  ;;  %v341_v11 = vadd.f32 %v339_v6, %v279_v61 }
 0x18f   :  { %1606 = vtanh.f32 %v349_v10  ;;  %v350_v13 = vadd.f32 %v1305_v3, %v341_v11 }
 0x190   :  { %v482_v14 = vpop.f32.mrb[8].mxu0  ;;  %v544_v16 = vpop.f32.mrb[8].mxu1 }
 0x191   :  { %1608 = vtanh.f32 %v350_v13  ;;  %v489_v15 = vrot.slane %v482_v14, 1  ;;  %v1465_v17 = vpop.f32.mrb[9].mxu0  ;;  %v551_v18 = vrot.slane %v544_v16, 2  ;;  %v1473_v19 = vpop.f32.mrb[9].mxu1 }
 0x192   :  { %v485_v20 = vpop.f32.mrb[10].mxu0  ;;  %v547_v24 = vpop.f32.mrb[10].mxu1 }
 0x193   :  { %v491_v22 = vadd.f32 %v489_v15, %v422_v1  ;;  %v490_v23 = vrot.slane %v485_v20, 1  ;;  %v1466_v25 = vpop.f32.mrb[11].mxu0  ;;  %v1474_v26 = vpop.f32.mrb[11].mxu1  ;;  %v552_v29 = vrot.slane %v547_v24, 2 }
 0x195   :  { %v553_v27 = vadd.f32 %v551_v18, %v491_v22  ;;  %v492_v28 = vadd.f32 %v490_v23, %v425_v7 }
 0x197   :  { %v554_v30 = vadd.f32 %v552_v29, %v492_v28 }
 0x198   :  { %v606_v31 = vpop.f32.mrb[12].mxu0  ;;  %v695_v34 = vpop.f32.mrb[12].mxu1 }
 0x199   :  { %v1607_v32 = vpop.eup %1606  ;;  %v613_v33 = vrot.slane %v606_v31, 3  ;;  %v1481_v35 = vpop.f32.mrb[13].mxu0  ;;  %v1334_v31 = vld [vmem:[#allocation13] ss:$0 sm:$0xff] }
 0x19a   :  { %v358_v36 = vsel %vm355_vm2, %v1607_v32, -2.0  ;;  %v1489_v38 = vpop.f32.mrb[13].mxu1  ;;  %v609_v39 = vpop.f32.mrb[14].mxu0 }
 0x19b   :  { %v1609_v40 = vpop.eup %1608  ;;  %v360_v41 = vrot.slane %v358_v36, 4  ;;  %v615_v42 = vadd.f32 %v613_v33, %v553_v27  ;;  %v614_v43 = vrot.slane %v609_v39, 3  ;;  %v698_v44 = vpop.f32.mrb[14].mxu1 }
 0x19c   :  { %v1482_v45 = vpop.f32.mrb[15].mxu0  ;;  %v359_v46 = vsel %vm355_vm2, %v1609_v40, -2.0  ;;  %v1490_v47 = vpop.f32.mrb[15].mxu1 }
 0x19d   :  { %v366_v48 = vrot.slane %v359_v46, 4  ;;  %v624_v49 = vadd.f32 %v1318_v37, %v615_v42  ;;  %v616_v50 = vadd.f32 %v614_v43, %v554_v30  ;;  %v361_v51 = vmax.f32 %v358_v36, %v360_v41 }
 0x19f   :  { %1610 = vtanh.f32 %v624_v49  ;;  %v625_v52 = vadd.f32 %v1318_v37, %v616_v50  ;;  %v362_v53 = vrot.slane %v361_v51, 2  ;;  %v367_v54 = vmax.f32 %v359_v46, %v366_v48 }
 0x1a0   :  { %v755_v55 = vpop.f32.mrb[16].mxu0  ;;  %v817_v57 = vpop.f32.mrb[16].mxu1 }
 0x1a1   :  { %1612 = vtanh.f32 %v625_v52  ;;  %v762_v56 = vrot.slane %v755_v55, 1  ;;  %v1497_v58 = vpop.f32.mrb[17].mxu0  ;;  %v363_v59 = vmax.f32 %v361_v51, %v362_v53  ;;  %v368_v60 = vrot.slane %v367_v54, 2  ;;  %v1505_v62 = vpop.f32.mrb[17].mxu1 }
 0x1a2   :  { %v824_v61 = vrot.slane %v817_v57, 2  ;;  %v758_v63 = vpop.f32.mrb[18].mxu0  ;;  %v820_v3 = vpop.f32.mrb[18].mxu1 }
 0x1a3   :  { %v764_v1 = vadd.f32 %v762_v56, %v695_v34  ;;  %v763_v2 = vrot.slane %v758_v63, 1  ;;  %v1498_v4 = vpop.f32.mrb[19].mxu0  ;;  %v364_v0 = vrot.slane %v363_v59, 1  ;;  %v369_v5 = vmax.f32 %v367_v54, %v368_v60  ;;  %v1506_v6 = vpop.f32.mrb[19].mxu1 }
 0x1a4   :  { %v825_v9 = vrot.slane %v820_v3, 2 }
 0x1a5   :  { %v826_v7 = vadd.f32 %v824_v61, %v764_v1  ;;  %v765_v8 = vadd.f32 %v763_v2, %v698_v44  ;;  %v370_v10 = vrot.slane %v369_v5, 1  ;;  %v365_v12 = vmax.f32 %v363_v59, %v364_v0 }
 0x1a7   :  { %v827_v11 = vadd.f32 %v825_v9, %v765_v8  ;;  %v371_v13 = vmax.f32 %v369_v5, %v370_v10 }
 0x1a8   :  { %v879_v14 = vpop.f32.mrb[20].mxu0  ;;  %v941_v17 = vpop.f32.mrb[20].mxu1 }
 0x1a9   :  { %v1611_v15 = vpop.eup %1610  ;;  %v886_v16 = vrot.slane %v879_v14, 3  ;;  %v1513_v18 = vpop.f32.mrb[21].mxu0  ;;  %v983_v19 = vsel %vm982_vm3, %v371_v13, %v365_v12  ;;  %v948_v20 = vrot.slane %v941_v17, 4  ;;  %v1335_v12 = vld [vmem:[#allocation16] ss:$0 sm:$0xff] }
 0x1aa   :  { %v1521_v22 = vpop.f32.mrb[21].mxu1  ;;  %v882_v23 = vpop.f32.mrb[22].mxu0  ;;  %v631_v24 = vsel %vm628_vm4, %v1611_v15, -2.0  ;;  %v993_v54 = vpack.c.bf16 %v983_v19, %v983_v19 }
 0x1ab   :  { %v1613_v25 = vpop.eup %1612  ;;  %v888_v26 = vadd.f32 %v886_v16, %v826_v7  ;;  %v887_v27 = vrot.slane %v882_v23, 3  ;;  %v944_v28 = vpop.f32.mrb[22].mxu1  ;;  %v633_v30 = vrot.slane %v631_v24, 4 }
 0x1ac   :  { %v1514_v29 = vpop.f32.mrb[23].mxu0  ;;  %v949_v32 = vrot.slane %v944_v28, 4  ;;  %v1522_v33 = vpop.f32.mrb[23].mxu1  ;;  %v632_v34 = vsel %vm628_vm4, %v1613_v25, -2.0 }
 0x1ad   :  { %v950_v35 = vadd.f32 %v948_v20, %v888_v26  ;;  %v889_v36 = vadd.f32 %v887_v27, %v827_v11  ;;  %v634_v37 = vmax.f32 %v631_v24, %v633_v30  ;;  %v639_v38 = vrot.slane %v632_v34, 4 }
 0x1af   :  { %v959_v39 = vadd.f32 %v1334_v31, %v950_v35  ;;  %v951_v40 = vadd.f32 %v949_v32, %v889_v36  ;;  %v635_v41 = vrot.slane %v634_v37, 2  ;;  %v640_v42 = vmax.f32 %v632_v34, %v639_v38 }
 0x1b1   :  { %1614 = vtanh.f32 %v959_v39  ;;  %v960_v43 = vadd.f32 %v1334_v31, %v951_v40  ;;  %v636_v44 = vmax.f32 %v634_v37, %v635_v41  ;;  %v641_v45 = vrot.slane %v640_v42, 2 }
 0x1b3   :  { %1616 = vtanh.f32 %v960_v43  ;;  %v637_v46 = vrot.slane %v636_v44, 1  ;;  %v642_v47 = vmax.f32 %v640_v42, %v641_v45 }
 0x1b5   :  { %v643_v48 = vrot.slane %v642_v47, 1  ;;  %v638_v49 = vmax.f32 %v636_v44, %v637_v46 }
 0x1b7   :  { %v644_v50 = vmax.f32 %v642_v47, %v643_v48 }
 0x1b9   :  { %v987_v51 = vsel %vm982_vm3, %v644_v50, %v638_v49 }
 0x1ba   :  { %v994_v52 = vpack.c.bf16 %v987_v51, %v987_v51 }
 0x1bb   :  { %v1615_v53 = vpop.eup %1614 }
 0x1bc   :  { %v966_v55 = vsel %vm963_vm5, %v1615_v53, -2.0  ;;  %1227 = vmatprep.mubr.bf16.mxu0 %v994_v52 }
 0x1bd   :  { %v1617_v56 = vpop.eup %1616  ;;  %v968_v57 = vrot.slane %v966_v55, 4  ;;  %1228 = vmatmul.mubr.bf16.vlgmr.msra.gmra.mrb[24].mxu0 %v993_v54 }
 0x1be   :  { %v967_v58 = vsel %vm963_vm5, %v1617_v56, -2.0 }
 0x1bf   :  { %v974_v59 = vrot.slane %v967_v58, 4  ;;  %v969_v60 = vmax.f32 %v966_v55, %v968_v57 }
 0x1c1   :  { %v970_v61 = vrot.slane %v969_v60, 2  ;;  %v975_v62 = vmax.f32 %v967_v58, %v974_v59 }
 0x1c3   :  { %v971_v63 = vmax.f32 %v969_v60, %v970_v61  ;;  %v976_v1 = vrot.slane %v975_v62, 2 }
 0x1c5   :  { %v972_v2 = vrot.slane %v971_v63, 1  ;;  %v977_v3 = vmax.f32 %v975_v62, %v976_v1 }
 0x1c7   :  { %v978_v21 = vrot.slane %v977_v3, 1  ;;  %v973_v4 = vmax.f32 %v971_v63, %v972_v2 }
 0x1c9   :  { %v979_v0 = vmax.f32 %v977_v3, %v978_v21 }
 0x1cb   :  { %v991_v5 = vsel %vm982_vm3, %v979_v0, %v973_v4 }
 0x1cc   :  { %v995_v6 = vpack.c.bf16 %v991_v5, %v991_v5 }
 0x1ce   :  { %1540 = vmatmul.mubr.bf16.vlgmr.msra.gmra.mrb[24].mxu1 %v995_v6 }
 0x290   :  { %v1412_v7 = vpop.f32.mrb[24].mxu0 }
 0x291   :  { %v1413_v8 = vpop.f32.mrb[25].mxu0 }
 0x292   :  { %v1414_v9 = vadd.f32 %v1413_v8, %v1412_v7  ;;  %v1415_v10 = vpop.f32.mrb[26].mxu0 }
 0x293   :  { %v1416_v11 = vpop.f32.mrb[27].mxu0 }
 0x294   :  { %v1230_v13 = vadd.f32 %v1414_v9, %v1335_v12 }
 0x2a1   :  { %v1269_v14 = vpop.f32.mrb[24].mxu1 }
 0x2a2   :  { %v1270_v15 = vadd.f32 %v1269_v14, %v1230_v13  ;;  %v1541_v16 = vpop.f32.mrb[25].mxu1 }
 0x2a3   :  { %v1272_v17 = vpop.f32.mrb[26].mxu1 }
 0x2a4   :  { %1275 = vst [vmem:[#allocation17] sm:$0x3] %v1270_v15  ;;  %v1542_v18 = vpop.f32.mrb[27].mxu1 }
 0x2a5   :  { %1827 = shalt.err (!%p1824_p6)
}
 0x2a6   :  { %s1828_s17 = scalar_lea.hbm %s2172_s9, 32 }
 0x2a7   :  { %p1829_p7 = scmp.ne.s32.totalorder %s2172_s9, %s1828_s17  ;;  %p1832_p8 = scmp.lt.u32.totalorder %s1828_s17, %s2172_s9 }
 0x2a9   :  { %p1834_p9 = pnand %p1832_p8, %p1829_p7 }
 0x2ab   :  { %1837 = shalt.err (!%p1834_p9)
}
 0x2ac   :  { %1285 = dma.vmem_to_hbm [thread:$0]  %s1283_s27, 32, %s2172_s9, [#allocation4]  }
 0x2ad   :  { %1848 = dma.done.wait [#allocation4], 32  }
 0x2ae   :  { %1849 = vsyncadd [#allocation4], 4294967264 }
 0x2af   :  { %1289 = vsyncpa [#allocation3], 1 }
 0x2b0   :  { %1290 = vsyncpa [#allocation6], 1 }
 0x2b1   :  { %1291 = vsyncpa [#allocation9], 1 }
 0x2b2   :  { %1292 = vsyncpa [#allocation12], 1 }
 0x2b3   :  { %1293 = vsyncpa [#allocation15], 1 }
 0x2b4   :  { %1294 = vsyncpa [#allocation4], 1 }

</bundles_post_ra>
